<compile_context>
chip_gen: v6e
topology: v6e:2x2x1
jax: 0.10.0
libtpu: 0.0.40
codegen_flags: <defaults>
</compile_context>

<pallas_src>
import functools

import jax
import jax.numpy as jnp
from jax.experimental import pallas as pl
from jax.experimental.pallas import tpu as pltpu

BN_EPS = 1e-5


def _rup(x, m):
    return ((x + m - 1) // m) * m


def _pick_tile(p, cands=(512, 384, 256, 128)):
    """Largest candidate tile that divides the (already 128-padded) extent p."""
    for c in cands:
        if c <= p and p % c == 0:
            return c
    return p


# ----------------------------- Pallas kernels -------------------------------

def _matmul_stats_kernel(a_ref, b_ref, o_ref, s_ref, q_ref, acc_ref):
    """bf16 matmul, f32 accumulation; BN sum / sum-sq epilogue per (M-tile, N-tile)."""
    k = pl.program_id(2)

    @pl.when(k == 0)
    def _():
        acc_ref[...] = jnp.zeros_like(acc_ref)
        s_ref[...] = jnp.zeros_like(s_ref)
        q_ref[...] = jnp.zeros_like(q_ref)

    acc_ref[...] += jnp.dot(a_ref[...], b_ref[...],
                            preferred_element_type=jnp.float32)

    @pl.when(k == pl.num_programs(2) - 1)
    def _():
        y = acc_ref[...]
        o_ref[...] = y.astype(o_ref.dtype)                       # single store at last K
        s_ref[...] += jnp.sum(y, axis=0, keepdims=True)          # broadcast into (8, TN)
        q_ref[...] += jnp.sum(y * y, axis=0, keepdims=True)


def _affine_relu_kernel(x_ref, p_ref, o_ref):
    x = x_ref[...].astype(jnp.float32)
    p = p_ref[...]
    o_ref[...] = jnp.maximum(x * p[0:1, :] + p[1:2, :], 0.0).astype(o_ref.dtype)


def _affine_add_kernel(x_ref, p_ref, r_ref, o_ref):
    x = x_ref[...].astype(jnp.float32)
    p = p_ref[...]
    y = x * p[0:1, :] + p[1:2, :] + r_ref[...].astype(jnp.float32)
    o_ref[...] = y.astype(o_ref.dtype)


def _bias_tanh_kernel(x_ref, p_ref, o_ref):
    x = x_ref[...].astype(jnp.float32)
    p = p_ref[...]
    o_ref[...] = jnp.tanh(x + p[0:1, :]).astype(o_ref.dtype)


# --------------------------- Pallas call wrappers ----------------------------

def matmul_bn_stats(a, b):
    """a:(Mp,Kp) bf16 @ b:(Kp,Np) bf16 -> (y (Mp,Np) bf16, chan_sum (Np,), chan_sq (Np,))."""
    Mp, Kp = a.shape
    _, Np = b.shape
    tm = _pick_tile(Mp)
    tn = _pick_tile(Np, (256, 128))
    tk = _pick_tile(Kp)
    ni, nj, nk = Mp // tm, Np // tn, Kp // tk

    y, s, q = pl.pallas_call(
        _matmul_stats_kernel,
        out_shape=(jax.ShapeDtypeStruct((Mp, Np), jnp.bfloat16),
                   jax.ShapeDtypeStruct((ni * 8, Np), jnp.float32),
                   jax.ShapeDtypeStruct((ni * 8, Np), jnp.float32)),
        grid_spec=pltpu.PrefetchScalarGridSpec(
            num_scalar_prefetch=0,
            grid=(ni, nj, nk),
            in_specs=[pl.BlockSpec((tm, tk), lambda i, j, k: (i, k)),
                      pl.BlockSpec((tk, tn), lambda i, j, k: (k, j))],
            out_specs=(pl.BlockSpec((tm, tn), lambda i, j, k: (i, j)),
                       pl.BlockSpec((8, tn), lambda i, j, k: (i, j)),
                       pl.BlockSpec((8, tn), lambda i, j, k: (i, j))),
            scratch_shapes=[pltpu.VMEM((tm, tn), jnp.float32)]),
        compiler_params=pltpu.CompilerParams(
            dimension_semantics=("parallel", "parallel", "arbitrary")),
    )(a, b)

    ch_sum = s.reshape(ni, 8, Np)[:, 0, :].sum(axis=0)
    ch_sq = q.reshape(ni, 8, Np)[:, 0, :].sum(axis=0)
    return y, ch_sum, ch_sq


def _ew_call(kernel, x, param_slab, extra=None, out_dtype=jnp.bfloat16):
    """Elementwise pass over a padded (Mp, Cp) slab; param_slab is a resident (8, Cp) block."""
    Mp, Cp = x.shape
    tm = _pick_tile(Mp, (1024, 512, 256, 128))
    arrays = [x, param_slab]
    in_specs = [pl.BlockSpec((tm, Cp), lambda i: (i, 0)),
                pl.BlockSpec((8, Cp), lambda i: (0, 0))]
    if extra is not None:
        arrays.append(extra)
        in_specs.append(pl.BlockSpec((tm, Cp), lambda i: (i, 0)))
    return pl.pallas_call(
        kernel,
        out_shape=jax.ShapeDtypeStruct((Mp, Cp), out_dtype),
        grid_spec=pltpu.PrefetchScalarGridSpec(
            num_scalar_prefetch=0,
            grid=(Mp // tm,),
            in_specs=in_specs,
            out_specs=pl.BlockSpec((tm, Cp), lambda i: (i, 0))),
        compiler_params=pltpu.CompilerParams(dimension_semantics=("parallel",)),
    )(*arrays)


# ------------------------------ model pieces --------------------------------

def _param_slab(row0, row1, cp):
    slab = jnp.zeros((8, cp), jnp.float32)
    slab = slab.at[0, :row0.shape[0]].set(row0)
    if row1 is not None:
        slab = slab.at[1, :row1.shape[0]].set(row1)
    return slab


def _bn_scale_shift(ch_sum, ch_sq, m, c, gamma, beta):
    mean = ch_sum[:c] / m
    var = jnp.maximum(ch_sq[:c] / m - mean * mean, 0.0)   # biased var (BN training mode)
    scale = gamma * jax.lax.rsqrt(var + BN_EPS)
    shift = beta - mean * scale
    return scale, shift


def _conv_matmul(x, w, stride, pad, pad_mode):
    """x: (N,H,W,Cin) bf16, w: (Cout,Cin,kh,kw) f32 -> (y_pad (Mp,Np) bf16, dims, sum, sq)."""
    if pad > 0:
        mode = 'reflect' if pad_mode == 'reflect' else 'constant'
        x = jnp.pad(x, ((0, 0), (pad, pad), (pad, pad), (0, 0)), mode=mode)
    cout, cin, kh, kw = w.shape
    n, hp, wp, _ = x.shape
    oh = (hp - kh) // stride + 1
    ow = (wp - kw) // stride + 1

    taps = []
    for di in range(kh):
        for dj in range(kw):
            taps.append(x[:, di:di + stride * (oh - 1) + 1:stride,
                             dj:dj + stride * (ow - 1) + 1:stride, :])
    K = cin * kh * kw
    Kp = _rup(K, 128)
    if Kp > K:
        taps.append(jnp.zeros((n, oh, ow, Kp - K), jnp.bfloat16))
    patches = jnp.concatenate(taps, axis=-1).reshape(n * oh * ow, Kp)

    M = n * oh * ow
    Mp = _rup(M, 128)
    if Mp > M:
        patches = jnp.pad(patches, ((0, Mp - M), (0, 0)))

    # K ordering (di, dj, cin) matches the tap concat above.
    wmat = w.transpose(2, 3, 1, 0).reshape(K, cout)
    Np = _rup(cout, 128)
    wmat = jnp.pad(wmat, ((0, Kp - K), (0, Np - cout))).astype(jnp.bfloat16)

    y, ch_sum, ch_sq = matmul_bn_stats(patches, wmat)
    return y, (n, oh, ow, cout), ch_sum, ch_sq


def conv_bn_relu(x, w, gamma, beta, stride, pad, pad_mode):
    y, dims, s, q = _conv_matmul(x, w, stride, pad, pad_mode)
    n, oh, ow, c = dims
    scale, shift = _bn_scale_shift(s, q, n * oh * ow, c, gamma, beta)
    out = _ew_call(_affine_relu_kernel, y, _param_slab(scale, shift, y.shape[1]))
    return out[:n * oh * ow, :c].reshape(n, oh, ow, c)


def resnet_block(x, w1, g1, b1, w2, g2, b2):
    n, hh, ww, c = x.shape
    m = n * hh * ww

    y1, _, s1, q1 = _conv_matmul(x, w1, 1, 1, 'reflect')
    sc1, sh1 = _bn_scale_shift(s1, q1, m, c, g1, b1)
    h1 = _ew_call(_affine_relu_kernel, y1, _param_slab(sc1, sh1, y1.shape[1]))
    h1 = h1[:m, :c].reshape(n, hh, ww, c)

    y2, _, s2, q2 = _conv_matmul(h1, w2, 1, 1, 'reflect')
    sc2, sh2 = _bn_scale_shift(s2, q2, m, c, g2, b2)

    Mp, Cp = y2.shape
    res = jnp.pad(x.reshape(m, c), ((0, Mp - m), (0, Cp - c)))
    out = _ew_call(_affine_add_kernel, y2, _param_slab(sc2, sh2, Cp), extra=res)
    return out[:m, :c].reshape(n, hh, ww, c)


def _phase_matmul(x_ext, w_conv, taps, offs, oh, ow):
    """One sub-pixel phase of a stride-2 transposed conv as an im2col matmul."""
    n, _, _, cin = x_ext.shape
    cout = w_conv.shape[0]
    slabs = [x_ext[:, oy:oy + oh, ox:ox + ow, :] for (oy, ox) in offs]
    K = cin * len(taps)
    Kp = _rup(K, 128)
    if Kp > K:
        slabs.append(jnp.zeros((n, oh, ow, Kp - K), jnp.bfloat16))
    patches = jnp.concatenate(slabs, axis=-1).reshape(n * oh * ow, Kp)
    M = n * oh * ow
    Mp = _rup(M, 128)
    if Mp > M:
        patches = jnp.pad(patches, ((0, Mp - M), (0, 0)))

    wm = jnp.concatenate([w_conv[:, :, di, dj].T for (di, dj) in taps], axis=0)
    Np = _rup(cout, 128)
    wm = jnp.pad(wm, ((0, Kp - K), (0, Np - cout))).astype(jnp.bfloat16)
    return matmul_bn_stats(patches, wm)


def convT_bn_relu(x, w_t, gamma, beta):
    """ConvTranspose2d(k=3, stride=2, padding=1, output_padding=1) + BN + ReLU,
    via sub-pixel decomposition into 4 phase convs (no zero-dilated input)."""
    n, hh, ww, cin = x.shape
    cout = w_t.shape[1]
    # equivalent forward-conv weight: flip spatially, swap in/out channel axes
    w_conv = jnp.flip(w_t, axis=(2, 3)).transpose(1, 0, 2, 3)   # (Cout, Cin, 3, 3)
    x_ext = jnp.pad(x, ((0, 0), (0, 1), (0, 1), (0, 0)))        # zero pad bottom/right

    ys = []
    ssum = jnp.zeros((0,), jnp.float32)
    ssq = jnp.zeros((0,), jnp.float32)
    first = True
    for a in (0, 1):
        for b in (0, 1):
            dis = (1,) if a == 0 else (0, 2)
            djs = (1,) if b == 0 else (0, 2)
            taps = [(di, dj) for di in dis for dj in djs]
            offs = [(1 if di == 2 else 0, 1 if dj == 2 else 0) for (di, dj) in taps]
            y, s, q = _phase_matmul(x_ext, w_conv, taps, offs, hh, ww)
            ys.append(y)
            if first:
                ssum, ssq, first = s, q, False
            else:
                ssum, ssq = ssum + s, ssq + q

    m_total = 4 * n * hh * ww                       # total output positions (N*2H*2W)
    scale, shift = _bn_scale_shift(ssum, ssq, m_total, cout, gamma, beta)
    pslab = _param_slab(scale, shift, ys[0].shape[1])

    m_ph = n * hh * ww
    phases = []
    for y in ys:
        o = _ew_call(_affine_relu_kernel, y, pslab)
        phases.append(o[:m_ph, :cout].reshape(n, hh, ww, cout))

    # interleave phases: out[n, 2y+a, 2x+b, c] = phase[a*2+b][n, y, x, c]
    t = jnp.stack(phases, axis=3).reshape(n, hh, ww, 2, 2, cout)
    out = t.transpose(0, 1, 3, 2, 4, 5).reshape(n, 2 * hh, 2 * ww, cout)
    return out


def final_conv_tanh(x, w, bias):
    y, dims, _, _ = _conv_matmul(x, w, 1, 3, 'reflect')
    n, oh, ow, c = dims
    pslab = _param_slab(bias, None, y.shape[1])
    out = _ew_call(_bias_tanh_kernel, y, pslab, out_dtype=jnp.float32)
    return out[:n * oh * ow, :c].reshape(n, oh, ow, c)


def resnet_generator_forward(x, p, n_blocks):
    # NCHW -> NHWC bf16 (channels-last kept end-to-end)
    h = jnp.transpose(x, (0, 2, 3, 1)).astype(jnp.bfloat16)
    # ReflectionPad(3) -> Conv7x7 -> BN -> ReLU
    h = conv_bn_relu(h, p['c1_w'], p['c1_g'], p['c1_b'], stride=1, pad=3, pad_mode='reflect')
    # 2x downsampling: Conv3x3 stride 2 pad 1 -> BN -> ReLU
    for i in range(2):
        h = conv_bn_relu(h, p[f'd{i}_w'], p[f'd{i}_g'], p[f'd{i}_b'],
                         stride=2, pad=1, pad_mode='zero')
    # n_blocks resnet blocks
    for b in range(n_blocks):
        h = resnet_block(h, p[f'r{b}_w1'], p[f'r{b}_g1'], p[f'r{b}_b1'],
                         p[f'r{b}_w2'], p[f'r{b}_g2'], p[f'r{b}_b2'])
    # 2x upsampling: ConvTranspose3x3 stride 2 -> BN -> ReLU
    for i in range(2):
        h = convT_bn_relu(h, p[f'u{i}_w'], p[f'u{i}_g'], p[f'u{i}_b'])
    # ReflectionPad(3) -> Conv7x7 (with bias) -> Tanh
    out = final_conv_tanh(h, p['cf_w'], p['cf_bias'])
    return jnp.transpose(out, (0, 3, 1, 2))          # NHWC -> NCHW, f32


# ------------------------------- parameters ---------------------------------

def init_params(key, input_nc, output_nc, ngf, n_blocks):
    # norm_layer = BatchNorm2d => use_bias=False for all convs except the final one.
    def nrm(k, shape):
        return jax.random.normal(k, shape, jnp.float32) * 0.02

    keys = iter(jax.random.split(key, 64))
    p = {}
    p['c1_w'] = nrm(next(keys), (ngf, input_nc, 7, 7))
    p['c1_g'] = jnp.ones((ngf,), jnp.float32)
    p['c1_b'] = jnp.zeros((ngf,), jnp.float32)
    for i in range(2):
        cin = ngf * (2 ** i)
        cout = cin * 2
        p[f'd{i}_w'] = nrm(next(keys), (cout, cin, 3, 3))
        p[f'd{i}_g'] = jnp.ones((cout,), jnp.float32)
        p[f'd{i}_b'] = jnp.zeros((cout,), jnp.float32)
    dim = ngf * 4
    for b in range(n_blocks):
        p[f'r{b}_w1'] = nrm(next(keys), (dim, dim, 3, 3))
        p[f'r{b}_g1'] = jnp.ones((dim,), jnp.float32)
        p[f'r{b}_b1'] = jnp.zeros((dim,), jnp.float32)
        p[f'r{b}_w2'] = nrm(next(keys), (dim, dim, 3, 3))
        p[f'r{b}_g2'] = jnp.ones((dim,), jnp.float32)
        p[f'r{b}_b2'] = jnp.zeros((dim,), jnp.float32)
    for i in range(2):
        cin = ngf * (2 ** (2 - i))
        cout = cin // 2
        p[f'u{i}_w'] = nrm(next(keys), (cin, cout, 3, 3))   # ConvTranspose2d weight layout
        p[f'u{i}_g'] = jnp.ones((cout,), jnp.float32)
        p[f'u{i}_b'] = jnp.zeros((cout,), jnp.float32)
    p['cf_w'] = nrm(next(keys), (output_nc, ngf, 7, 7))
    p['cf_bias'] = nrm(next(keys), (output_nc,))
    return p


if __name__ == "__main__":
    B, INPUT_NC, OUTPUT_NC, NGF, N_BLOCKS, HW = 2, 4, 4, 8, 2, 16

    key = jax.random.PRNGKey(0)
    kx, kp = jax.random.split(key)
    x = jax.random.normal(kx, (B, INPUT_NC, HW, HW), jnp.float32)
    params = init_params(kp, INPUT_NC, OUTPUT_NC, NGF, N_BLOCKS)

    fwd = jax.jit(functools.partial(resnet_generator_forward, n_blocks=N_BLOCKS))
    out = fwd(x, params)
    jax.block_until_ready(out)

    assert out.shape == (B, OUTPUT_NC, HW, HW), out.shape
    assert jnp.all(jnp.isfinite(out))
    print("KERNEL_OK")
</pallas_src>

<mosaic_0001>
module attributes {stable_mosaic.version = 11 : i64} {
  func.func @_matmul_stats_kernel(%arg0: i32, %arg1: i32, %arg2: i32, %arg3: memref<512x256xbf16, #tpu.memory_space<vmem>>, %arg4: memref<256x128xbf16, #tpu.memory_space<vmem>>, %arg5: memref<512x128xbf16, #tpu.memory_space<vmem>>, %arg6: memref<8x128xf32, #tpu.memory_space<vmem>>, %arg7: memref<8x128xf32, #tpu.memory_space<vmem>>, %arg8: memref<512x128xf32, #tpu.memory_space<vmem>>) attributes {dimension_semantics = [#tpu.dimension_semantics<parallel>, #tpu.dimension_semantics<parallel>, #tpu.dimension_semantics<arbitrary>], iteration_bounds = array<i64: 1, 1, 1>, scalar_prefetch = 0 : i64, scratch_operands = 1 : i64, tpu.core_type = #tpu.core_type<tc>, window_params = [{transform_indices = @transform_0, window_bounds = array<i64: 512, 256>}, {transform_indices = @transform_1, window_bounds = array<i64: 256, 128>}, {transform_indices = @transform_2, window_bounds = array<i64: 512, 128>}, {transform_indices = @transform_3, window_bounds = array<i64: 8, 128>}, {transform_indices = @transform_4, window_bounds = array<i64: 8, 128>}]} {
    %c0_i32 = arith.constant 0 : i32
    %0 = arith.cmpi eq, %arg2, %c0_i32 : i32
    %1 = arith.extui %0 : i1 to i32
    %c0_i32_0 = arith.constant 0 : i32
    %2 = arith.cmpi ne, %1, %c0_i32_0 : i32
    scf.if %2 {
      %cst_10 = arith.constant 0.000000e+00 : f32
      %12 = vector.broadcast %cst_10 : f32 to vector<512x128xf32>
      %c0_11 = arith.constant 0 : index
      %c0_12 = arith.constant 0 : index
      %13 = vector.load %arg8[%c0_11, %c0_12] : memref<512x128xf32, #tpu.memory_space<vmem>>, vector<512x128xf32>
      tpu.vector_store %arg8[%c0_11, %c0_12], %12 {strides = array<i32>} : memref<512x128xf32, #tpu.memory_space<vmem>>, vector<512x128xf32>,
      %cst_13 = arith.constant 0.000000e+00 : f32
      %14 = vector.broadcast %cst_13 : f32 to vector<8x128xf32>
      %c0_14 = arith.constant 0 : index
      %c0_15 = arith.constant 0 : index
      %15 = vector.load %arg6[%c0_14, %c0_15] : memref<8x128xf32, #tpu.memory_space<vmem>>, vector<8x128xf32>
      tpu.vector_store %arg6[%c0_14, %c0_15], %14 {strides = array<i32>} : memref<8x128xf32, #tpu.memory_space<vmem>>, vector<8x128xf32>,
      %cst_16 = arith.constant 0.000000e+00 : f32
      %16 = vector.broadcast %cst_16 : f32 to vector<8x128xf32>
      %c0_17 = arith.constant 0 : index
      %c0_18 = arith.constant 0 : index
      %17 = vector.load %arg7[%c0_17, %c0_18] : memref<8x128xf32, #tpu.memory_space<vmem>>, vector<8x128xf32>
      tpu.vector_store %arg7[%c0_17, %c0_18], %16 {strides = array<i32>} : memref<8x128xf32, #tpu.memory_space<vmem>>, vector<8x128xf32>,
    } else {
    }
    %c0 = arith.constant 0 : index
    %c0_1 = arith.constant 0 : index
    %3 = vector.load %arg8[%c0, %c0_1] : memref<512x128xf32, #tpu.memory_space<vmem>>, vector<512x128xf32>
    %c0_2 = arith.constant 0 : index
    %c0_3 = arith.constant 0 : index
    %4 = vector.load %arg3[%c0_2, %c0_3] : memref<512x256xbf16, #tpu.memory_space<vmem>>, vector<512x256xbf16>
    %c0_4 = arith.constant 0 : index
    %c0_5 = arith.constant 0 : index
    %5 = vector.load %arg4[%c0_4, %c0_5] : memref<256x128xbf16, #tpu.memory_space<vmem>>, vector<256x128xbf16>
    %cst = arith.constant dense<0.000000e+00> : vector<512x128xf32>
    %6 = tpu.matmul %4, %5, %cst {dimension_numbers = #tpu.dot_dimension_numbers<[1], [0], [0], [1], [0, 0, 1, 1], [], []>} : vector<512x256xbf16>, vector<256x128xbf16>, vector<512x128xf32> -> vector<512x128xf32>
    %7 = arith.addf %3, %6 : vector<512x128xf32>
    %c0_6 = arith.constant 0 : index
    %c0_7 = arith.constant 0 : index
    %8 = vector.load %arg8[%c0_6, %c0_7] : memref<512x128xf32, #tpu.memory_space<vmem>>, vector<512x128xf32>
    tpu.vector_store %arg8[%c0_6, %c0_7], %7 {strides = array<i32>} : memref<512x128xf32, #tpu.memory_space<vmem>>, vector<512x128xf32>,
    %c0_i32_8 = arith.constant 0 : i32
    %9 = arith.cmpi eq, %arg2, %c0_i32_8 : i32
    %10 = arith.extui %9 : i1 to i32
    %c0_i32_9 = arith.constant 0 : i32
    %11 = arith.cmpi ne, %10, %c0_i32_9 : i32
    scf.if %11 {
      %c0_10 = arith.constant 0 : index
      %c0_11 = arith.constant 0 : index
      %12 = vector.load %arg8[%c0_10, %c0_11] : memref<512x128xf32, #tpu.memory_space<vmem>>, vector<512x128xf32>
      %13 = arith.truncf %12 : vector<512x128xf32> to vector<512x128xbf16>
      %c0_12 = arith.constant 0 : index
      %c0_13 = arith.constant 0 : index
      %14 = vector.load %arg5[%c0_12, %c0_13] : memref<512x128xbf16, #tpu.memory_space<vmem>>, vector<512x128xbf16>
      tpu.vector_store %arg5[%c0_12, %c0_13], %13 {strides = array<i32>} : memref<512x128xbf16, #tpu.memory_space<vmem>>, vector<512x128xbf16>,
      %c0_14 = arith.constant 0 : index
      %c0_15 = arith.constant 0 : index
      %15 = vector.load %arg6[%c0_14, %c0_15] : memref<8x128xf32, #tpu.memory_space<vmem>>, vector<8x128xf32>
      %cst_16 = arith.constant dense<0.000000e+00> : vector<128xf32>
      %16 = vector.multi_reduction <add>, %12, %cst_16 [0] : vector<512x128xf32> to vector<128xf32>
      %17 = vector.shape_cast %16 : vector<128xf32> to vector<1x128xf32>
      %18 = vector.broadcast %17 : vector<1x128xf32> to vector<8x128xf32>
      %19 = arith.addf %15, %18 : vector<8x128xf32>
      %c0_17 = arith.constant 0 : index
      %c0_18 = arith.constant 0 : index
      %20 = vector.load %arg6[%c0_17, %c0_18] : memref<8x128xf32, #tpu.memory_space<vmem>>, vector<8x128xf32>
      tpu.vector_store %arg6[%c0_17, %c0_18], %19 {strides = array<i32>} : memref<8x128xf32, #tpu.memory_space<vmem>>, vector<8x128xf32>,
      %c0_19 = arith.constant 0 : index
      %c0_20 = arith.constant 0 : index
      %21 = vector.load %arg7[%c0_19, %c0_20] : memref<8x128xf32, #tpu.memory_space<vmem>>, vector<8x128xf32>
      %22 = arith.mulf %12, %12 : vector<512x128xf32>
      %cst_21 = arith.constant dense<0.000000e+00> : vector<128xf32>
      %23 = vector.multi_reduction <add>, %22, %cst_21 [0] : vector<512x128xf32> to vector<128xf32>
      %24 = vector.shape_cast %23 : vector<128xf32> to vector<1x128xf32>
      %25 = vector.broadcast %24 : vector<1x128xf32> to vector<8x128xf32>
      %26 = arith.addf %21, %25 : vector<8x128xf32>
      %c0_22 = arith.constant 0 : index
      %c0_23 = arith.constant 0 : index
      %27 = vector.load %arg7[%c0_22, %c0_23] : memref<8x128xf32, #tpu.memory_space<vmem>>, vector<8x128xf32>
      tpu.vector_store %arg7[%c0_22, %c0_23], %26 {strides = array<i32>} : memref<8x128xf32, #tpu.memory_space<vmem>>, vector<8x128xf32>,
    } else {
    }
    return
  }
  func.func @transform_0(%arg0: i32, %arg1: i32, %arg2: i32) -> (i32, i32) {
    %c0_i32 = arith.constant 0 : i32
    return %arg0, %arg2 : i32, i32
  }
  func.func @transform_1(%arg0: i32, %arg1: i32, %arg2: i32) -> (i32, i32) {
    %c0_i32 = arith.constant 0 : i32
    return %arg2, %arg1 : i32, i32
  }
  func.func @transform_2(%arg0: i32, %arg1: i32, %arg2: i32) -> (i32, i32) {
    %c0_i32 = arith.constant 0 : i32
    return %arg0, %arg1 : i32, i32
  }
  func.func @transform_3(%arg0: i32, %arg1: i32, %arg2: i32) -> (i32, i32) {
    %c0_i32 = arith.constant 0 : i32
    return %arg0, %arg1 : i32, i32
  }
  func.func @transform_4(%arg0: i32, %arg1: i32, %arg2: i32) -> (i32, i32) {
    %c0_i32 = arith.constant 0 : i32
    return %arg0, %arg1 : i32, i32
  }
}

module attributes {stable_mosaic.version = 11 : i64} {
  func.func @_affine_relu_kernel(%arg0: i32, %arg1: memref<512x128xbf16, #tpu.memory_space<vmem>>, %arg2: memref<8x128xf32, #tpu.memory_space<vmem>>, %arg3: memref<512x128xbf16, #tpu.memory_space<vmem>>) attributes {dimension_semantics = [#tpu.dimension_semantics<parallel>], iteration_bounds = array<i64: 1>, scalar_prefetch = 0 : i64, scratch_operands = 0 : i64, tpu.core_type = #tpu.core_type<tc>, window_params = [{transform_indices = @transform_0, window_bounds = array<i64: 512, 128>}, {pipeline_mode = #tpu.pipeline_mode<synchronous>, transform_indices = @transform_1, window_bounds = array<i64: 8, 128>}, {transform_indices = @transform_2, window_bounds = array<i64: 512, 128>}]} {
    %c0 = arith.constant 0 : index
    %c0_0 = arith.constant 0 : index
    %0 = vector.load %arg1[%c0, %c0_0] : memref<512x128xbf16, #tpu.memory_space<vmem>>, vector<512x128xbf16>
    %1 = arith.extf %0 : vector<512x128xbf16> to vector<512x128xf32>
    %c0_1 = arith.constant 0 : index
    %c0_2 = arith.constant 0 : index
    %2 = vector.load %arg2[%c0_1, %c0_2] : memref<8x128xf32, #tpu.memory_space<vmem>>, vector<8x128xf32>
    %3 = vector.extract_strided_slice %2 {offsets = [0, 0], sizes = [1, 128], strides = [1, 1]} : vector<8x128xf32> to vector<1x128xf32>
    %4 = vector.broadcast %3 : vector<1x128xf32> to vector<512x128xf32>
    %5 = arith.mulf %1, %4 : vector<512x128xf32>
    %6 = vector.extract_strided_slice %2 {offsets = [1, 0], sizes = [1, 128], strides = [1, 1]} : vector<8x128xf32> to vector<1x128xf32>
    %7 = vector.broadcast %6 : vector<1x128xf32> to vector<512x128xf32>
    %8 = arith.addf %5, %7 : vector<512x128xf32>
    %cst = arith.constant 0.000000e+00 : f32
    %9 = vector.broadcast %cst : f32 to vector<512x128xf32>
    %10 = arith.maximumf %8, %9 : vector<512x128xf32>
    %11 = arith.truncf %10 : vector<512x128xf32> to vector<512x128xbf16>
    %c0_3 = arith.constant 0 : index
    %c0_4 = arith.constant 0 : index
    %12 = vector.load %arg3[%c0_3, %c0_4] : memref<512x128xbf16, #tpu.memory_space<vmem>>, vector<512x128xbf16>
    tpu.vector_store %arg3[%c0_3, %c0_4], %11 {strides = array<i32>} : memref<512x128xbf16, #tpu.memory_space<vmem>>, vector<512x128xbf16>,
    return
  }
  func.func @transform_0(%arg0: i32) -> (i32, i32) {
    %c0_i32 = arith.constant 0 : i32
    %c0_i32_0 = arith.constant 0 : i32
    return %arg0, %c0_i32 : i32, i32
  }
  func.func @transform_1(%arg0: i32) -> (i32, i32) {
    %c0_i32 = arith.constant 0 : i32
    %c0_i32_0 = arith.constant 0 : i32
    %c0_i32_1 = arith.constant 0 : i32
    return %c0_i32, %c0_i32_0 : i32, i32
  }
  func.func @transform_2(%arg0: i32) -> (i32, i32) {
    %c0_i32 = arith.constant 0 : i32
    %c0_i32_0 = arith.constant 0 : i32
    return %arg0, %c0_i32 : i32, i32
  }
}

module attributes {stable_mosaic.version = 11 : i64} {
  func.func @_matmul_stats_kernel(%arg0: i32, %arg1: i32, %arg2: i32, %arg3: memref<128x128xbf16, #tpu.memory_space<vmem>>, %arg4: memref<128x128xbf16, #tpu.memory_space<vmem>>, %arg5: memref<128x128xbf16, #tpu.memory_space<vmem>>, %arg6: memref<8x128xf32, #tpu.memory_space<vmem>>, %arg7: memref<8x128xf32, #tpu.memory_space<vmem>>, %arg8: memref<128x128xf32, #tpu.memory_space<vmem>>) attributes {dimension_semantics = [#tpu.dimension_semantics<parallel>, #tpu.dimension_semantics<parallel>, #tpu.dimension_semantics<arbitrary>], iteration_bounds = array<i64: 1, 1, 1>, scalar_prefetch = 0 : i64, scratch_operands = 1 : i64, tpu.core_type = #tpu.core_type<tc>, window_params = [{transform_indices = @transform_0, window_bounds = array<i64: 128, 128>}, {transform_indices = @transform_1, window_bounds = array<i64: 128, 128>}, {transform_indices = @transform_2, window_bounds = array<i64: 128, 128>}, {transform_indices = @transform_3, window_bounds = array<i64: 8, 128>}, {transform_indices = @transform_4, window_bounds = array<i64: 8, 128>}]} {
    %c0_i32 = arith.constant 0 : i32
    %0 = arith.cmpi eq, %arg2, %c0_i32 : i32
    %1 = arith.extui %0 : i1 to i32
    %c0_i32_0 = arith.constant 0 : i32
    %2 = arith.cmpi ne, %1, %c0_i32_0 : i32
    scf.if %2 {
      %cst_10 = arith.constant 0.000000e+00 : f32
      %12 = vector.broadcast %cst_10 : f32 to vector<128x128xf32>
      %c0_11 = arith.constant 0 : index
      %c0_12 = arith.constant 0 : index
      %13 = vector.load %arg8[%c0_11, %c0_12] : memref<128x128xf32, #tpu.memory_space<vmem>>, vector<128x128xf32>
      tpu.vector_store %arg8[%c0_11, %c0_12], %12 {strides = array<i32>} : memref<128x128xf32, #tpu.memory_space<vmem>>, vector<128x128xf32>,
      %cst_13 = arith.constant 0.000000e+00 : f32
      %14 = vector.broadcast %cst_13 : f32 to vector<8x128xf32>
      %c0_14 = arith.constant 0 : index
      %c0_15 = arith.constant 0 : index
      %15 = vector.load %arg6[%c0_14, %c0_15] : memref<8x128xf32, #tpu.memory_space<vmem>>, vector<8x128xf32>
      tpu.vector_store %arg6[%c0_14, %c0_15], %14 {strides = array<i32>} : memref<8x128xf32, #tpu.memory_space<vmem>>, vector<8x128xf32>,
      %cst_16 = arith.constant 0.000000e+00 : f32
      %16 = vector.broadcast %cst_16 : f32 to vector<8x128xf32>
      %c0_17 = arith.constant 0 : index
      %c0_18 = arith.constant 0 : index
      %17 = vector.load %arg7[%c0_17, %c0_18] : memref<8x128xf32, #tpu.memory_space<vmem>>, vector<8x128xf32>
      tpu.vector_store %arg7[%c0_17, %c0_18], %16 {strides = array<i32>} : memref<8x128xf32, #tpu.memory_space<vmem>>, vector<8x128xf32>,
    } else {
    }
    %c0 = arith.constant 0 : index
    %c0_1 = arith.constant 0 : index
    %3 = vector.load %arg8[%c0, %c0_1] : memref<128x128xf32, #tpu.memory_space<vmem>>, vector<128x128xf32>
    %c0_2 = arith.constant 0 : index
    %c0_3 = arith.constant 0 : index
    %4 = vector.load %arg3[%c0_2, %c0_3] : memref<128x128xbf16, #tpu.memory_space<vmem>>, vector<128x128xbf16>
    %c0_4 = arith.constant 0 : index
    %c0_5 = arith.constant 0 : index
    %5 = vector.load %arg4[%c0_4, %c0_5] : memref<128x128xbf16, #tpu.memory_space<vmem>>, vector<128x128xbf16>
    %cst = arith.constant dense<0.000000e+00> : vector<128x128xf32>
    %6 = tpu.matmul %4, %5, %cst {dimension_numbers = #tpu.dot_dimension_numbers<[1], [0], [0], [1], [0, 0, 1, 1], [], []>} : vector<128x128xbf16>, vector<128x128xbf16>, vector<128x128xf32> -> vector<128x128xf32>
    %7 = arith.addf %3, %6 : vector<128x128xf32>
    %c0_6 = arith.constant 0 : index
    %c0_7 = arith.constant 0 : index
    %8 = vector.load %arg8[%c0_6, %c0_7] : memref<128x128xf32, #tpu.memory_space<vmem>>, vector<128x128xf32>
    tpu.vector_store %arg8[%c0_6, %c0_7], %7 {strides = array<i32>} : memref<128x128xf32, #tpu.memory_space<vmem>>, vector<128x128xf32>,
    %c0_i32_8 = arith.constant 0 : i32
    %9 = arith.cmpi eq, %arg2, %c0_i32_8 : i32
    %10 = arith.extui %9 : i1 to i32
    %c0_i32_9 = arith.constant 0 : i32
    %11 = arith.cmpi ne, %10, %c0_i32_9 : i32
    scf.if %11 {
      %c0_10 = arith.constant 0 : index
      %c0_11 = arith.constant 0 : index
      %12 = vector.load %arg8[%c0_10, %c0_11] : memref<128x128xf32, #tpu.memory_space<vmem>>, vector<128x128xf32>
      %13 = arith.truncf %12 : vector<128x128xf32> to vector<128x128xbf16>
      %c0_12 = arith.constant 0 : index
      %c0_13 = arith.constant 0 : index
      %14 = vector.load %arg5[%c0_12, %c0_13] : memref<128x128xbf16, #tpu.memory_space<vmem>>, vector<128x128xbf16>
      tpu.vector_store %arg5[%c0_12, %c0_13], %13 {strides = array<i32>} : memref<128x128xbf16, #tpu.memory_space<vmem>>, vector<128x128xbf16>,
      %c0_14 = arith.constant 0 : index
      %c0_15 = arith.constant 0 : index
      %15 = vector.load %arg6[%c0_14, %c0_15] : memref<8x128xf32, #tpu.memory_space<vmem>>, vector<8x128xf32>
      %cst_16 = arith.constant dense<0.000000e+00> : vector<128xf32>
      %16 = vector.multi_reduction <add>, %12, %cst_16 [0] : vector<128x128xf32> to vector<128xf32>
      %17 = vector.shape_cast %16 : vector<128xf32> to vector<1x128xf32>
      %18 = vector.broadcast %17 : vector<1x128xf32> to vector<8x128xf32>
      %19 = arith.addf %15, %18 : vector<8x128xf32>
      %c0_17 = arith.constant 0 : index
      %c0_18 = arith.constant 0 : index
      %20 = vector.load %arg6[%c0_17, %c0_18] : memref<8x128xf32, #tpu.memory_space<vmem>>, vector<8x128xf32>
      tpu.vector_store %arg6[%c0_17, %c0_18], %19 {strides = array<i32>} : memref<8x128xf32, #tpu.memory_space<vmem>>, vector<8x128xf32>,
      %c0_19 = arith.constant 0 : index
      %c0_20 = arith.constant 0 : index
      %21 = vector.load %arg7[%c0_19, %c0_20] : memref<8x128xf32, #tpu.memory_space<vmem>>, vector<8x128xf32>
      %22 = arith.mulf %12, %12 : vector<128x128xf32>
      %cst_21 = arith.constant dense<0.000000e+00> : vector<128xf32>
      %23 = vector.multi_reduction <add>, %22, %cst_21 [0] : vector<128x128xf32> to vector<128xf32>
      %24 = vector.shape_cast %23 : vector<128xf32> to vector<1x128xf32>
      %25 = vector.broadcast %24 : vector<1x128xf32> to vector<8x128xf32>
      %26 = arith.addf %21, %25 : vector<8x128xf32>
      %c0_22 = arith.constant 0 : index
      %c0_23 = arith.constant 0 : index
      %27 = vector.load %arg7[%c0_22, %c0_23] : memref<8x128xf32, #tpu.memory_space<vmem>>, vector<8x128xf32>
      tpu.vector_store %arg7[%c0_22, %c0_23], %26 {strides = array<i32>} : memref<8x128xf32, #tpu.memory_space<vmem>>, vector<8x128xf32>,
    } else {
    }
    return
  }
  func.func @transform_0(%arg0: i32, %arg1: i32, %arg2: i32) -> (i32, i32) {
    %c0_i32 = arith.constant 0 : i32
    return %arg0, %arg2 : i32, i32
  }
  func.func @transform_1(%arg0: i32, %arg1: i32, %arg2: i32) -> (i32, i32) {
    %c0_i32 = arith.constant 0 : i32
    return %arg2, %arg1 : i32, i32
  }
  func.func @transform_2(%arg0: i32, %arg1: i32, %arg2: i32) -> (i32, i32) {
    %c0_i32 = arith.constant 0 : i32
    return %arg0, %arg1 : i32, i32
  }
  func.func @transform_3(%arg0: i32, %arg1: i32, %arg2: i32) -> (i32, i32) {
    %c0_i32 = arith.constant 0 : i32
    return %arg0, %arg1 : i32, i32
  }
  func.func @transform_4(%arg0: i32, %arg1: i32, %arg2: i32) -> (i32, i32) {
    %c0_i32 = arith.constant 0 : i32
    return %arg0, %arg1 : i32, i32
  }
}

module attributes {stable_mosaic.version = 11 : i64} {
  func.func @_affine_relu_kernel(%arg0: i32, %arg1: memref<128x128xbf16, #tpu.memory_space<vmem>>, %arg2: memref<8x128xf32, #tpu.memory_space<vmem>>, %arg3: memref<128x128xbf16, #tpu.memory_space<vmem>>) attributes {dimension_semantics = [#tpu.dimension_semantics<parallel>], iteration_bounds = array<i64: 1>, scalar_prefetch = 0 : i64, scratch_operands = 0 : i64, tpu.core_type = #tpu.core_type<tc>, window_params = [{transform_indices = @transform_0, window_bounds = array<i64: 128, 128>}, {pipeline_mode = #tpu.pipeline_mode<synchronous>, transform_indices = @transform_1, window_bounds = array<i64: 8, 128>}, {transform_indices = @transform_2, window_bounds = array<i64: 128, 128>}]} {
    %c0 = arith.constant 0 : index
    %c0_0 = arith.constant 0 : index
    %0 = vector.load %arg1[%c0, %c0_0] : memref<128x128xbf16, #tpu.memory_space<vmem>>, vector<128x128xbf16>
    %1 = arith.extf %0 : vector<128x128xbf16> to vector<128x128xf32>
    %c0_1 = arith.constant 0 : index
    %c0_2 = arith.constant 0 : index
    %2 = vector.load %arg2[%c0_1, %c0_2] : memref<8x128xf32, #tpu.memory_space<vmem>>, vector<8x128xf32>
    %3 = vector.extract_strided_slice %2 {offsets = [0, 0], sizes = [1, 128], strides = [1, 1]} : vector<8x128xf32> to vector<1x128xf32>
    %4 = vector.broadcast %3 : vector<1x128xf32> to vector<128x128xf32>
    %5 = arith.mulf %1, %4 : vector<128x128xf32>
    %6 = vector.extract_strided_slice %2 {offsets = [1, 0], sizes = [1, 128], strides = [1, 1]} : vector<8x128xf32> to vector<1x128xf32>
    %7 = vector.broadcast %6 : vector<1x128xf32> to vector<128x128xf32>
    %8 = arith.addf %5, %7 : vector<128x128xf32>
    %cst = arith.constant 0.000000e+00 : f32
    %9 = vector.broadcast %cst : f32 to vector<128x128xf32>
    %10 = arith.maximumf %8, %9 : vector<128x128xf32>
    %11 = arith.truncf %10 : vector<128x128xf32> to vector<128x128xbf16>
    %c0_3 = arith.constant 0 : index
    %c0_4 = arith.constant 0 : index
    %12 = vector.load %arg3[%c0_3, %c0_4] : memref<128x128xbf16, #tpu.memory_space<vmem>>, vector<128x128xbf16>
    tpu.vector_store %arg3[%c0_3, %c0_4], %11 {strides = array<i32>} : memref<128x128xbf16, #tpu.memory_space<vmem>>, vector<128x128xbf16>,
    return
  }
  func.func @transform_0(%arg0: i32) -> (i32, i32) {
    %c0_i32 = arith.constant 0 : i32
    %c0_i32_0 = arith.constant 0 : i32
    return %arg0, %c0_i32 : i32, i32
  }
  func.func @transform_1(%arg0: i32) -> (i32, i32) {
    %c0_i32 = arith.constant 0 : i32
    %c0_i32_0 = arith.constant 0 : i32
    %c0_i32_1 = arith.constant 0 : i32
    return %c0_i32, %c0_i32_0 : i32, i32
  }
  func.func @transform_2(%arg0: i32) -> (i32, i32) {
    %c0_i32 = arith.constant 0 : i32
    %c0_i32_0 = arith.constant 0 : i32
    return %arg0, %c0_i32 : i32, i32
  }
}

module attributes {stable_mosaic.version = 11 : i64} {
  func.func @_matmul_stats_kernel(%arg0: i32, %arg1: i32, %arg2: i32, %arg3: memref<128x256xbf16, #tpu.memory_space<vmem>>, %arg4: memref<256x128xbf16, #tpu.memory_space<vmem>>, %arg5: memref<128x128xbf16, #tpu.memory_space<vmem>>, %arg6: memref<8x128xf32, #tpu.memory_space<vmem>>, %arg7: memref<8x128xf32, #tpu.memory_space<vmem>>, %arg8: memref<128x128xf32, #tpu.memory_space<vmem>>) attributes {dimension_semantics = [#tpu.dimension_semantics<parallel>, #tpu.dimension_semantics<parallel>, #tpu.dimension_semantics<arbitrary>], iteration_bounds = array<i64: 1, 1, 1>, scalar_prefetch = 0 : i64, scratch_operands = 1 : i64, tpu.core_type = #tpu.core_type<tc>, window_params = [{transform_indices = @transform_0, window_bounds = array<i64: 128, 256>}, {transform_indices = @transform_1, window_bounds = array<i64: 256, 128>}, {transform_indices = @transform_2, window_bounds = array<i64: 128, 128>}, {transform_indices = @transform_3, window_bounds = array<i64: 8, 128>}, {transform_indices = @transform_4, window_bounds = array<i64: 8, 128>}]} {
    %c0_i32 = arith.constant 0 : i32
    %0 = arith.cmpi eq, %arg2, %c0_i32 : i32
    %1 = arith.extui %0 : i1 to i32
    %c0_i32_0 = arith.constant 0 : i32
    %2 = arith.cmpi ne, %1, %c0_i32_0 : i32
    scf.if %2 {
      %cst_10 = arith.constant 0.000000e+00 : f32
      %12 = vector.broadcast %cst_10 : f32 to vector<128x128xf32>
      %c0_11 = arith.constant 0 : index
      %c0_12 = arith.constant 0 : index
      %13 = vector.load %arg8[%c0_11, %c0_12] : memref<128x128xf32, #tpu.memory_space<vmem>>, vector<128x128xf32>
      tpu.vector_store %arg8[%c0_11, %c0_12], %12 {strides = array<i32>} : memref<128x128xf32, #tpu.memory_space<vmem>>, vector<128x128xf32>,
      %cst_13 = arith.constant 0.000000e+00 : f32
      %14 = vector.broadcast %cst_13 : f32 to vector<8x128xf32>
      %c0_14 = arith.constant 0 : index
      %c0_15 = arith.constant 0 : index
      %15 = vector.load %arg6[%c0_14, %c0_15] : memref<8x128xf32, #tpu.memory_space<vmem>>, vector<8x128xf32>
      tpu.vector_store %arg6[%c0_14, %c0_15], %14 {strides = array<i32>} : memref<8x128xf32, #tpu.memory_space<vmem>>, vector<8x128xf32>,
      %cst_16 = arith.constant 0.000000e+00 : f32
      %16 = vector.broadcast %cst_16 : f32 to vector<8x128xf32>
      %c0_17 = arith.constant 0 : index
      %c0_18 = arith.constant 0 : index
      %17 = vector.load %arg7[%c0_17, %c0_18] : memref<8x128xf32, #tpu.memory_space<vmem>>, vector<8x128xf32>
      tpu.vector_store %arg7[%c0_17, %c0_18], %16 {strides = array<i32>} : memref<8x128xf32, #tpu.memory_space<vmem>>, vector<8x128xf32>,
    } else {
    }
    %c0 = arith.constant 0 : index
    %c0_1 = arith.constant 0 : index
    %3 = vector.load %arg8[%c0, %c0_1] : memref<128x128xf32, #tpu.memory_space<vmem>>, vector<128x128xf32>
    %c0_2 = arith.constant 0 : index
    %c0_3 = arith.constant 0 : index
    %4 = vector.load %arg3[%c0_2, %c0_3] : memref<128x256xbf16, #tpu.memory_space<vmem>>, vector<128x256xbf16>
    %c0_4 = arith.constant 0 : index
    %c0_5 = arith.constant 0 : index
    %5 = vector.load %arg4[%c0_4, %c0_5] : memref<256x128xbf16, #tpu.memory_space<vmem>>, vector<256x128xbf16>
    %cst = arith.constant dense<0.000000e+00> : vector<128x128xf32>
    %6 = tpu.matmul %4, %5, %cst {dimension_numbers = #tpu.dot_dimension_numbers<[1], [0], [0], [1], [0, 0, 1, 1], [], []>} : vector<128x256xbf16>, vector<256x128xbf16>, vector<128x128xf32> -> vector<128x128xf32>
    %7 = arith.addf %3, %6 : vector<128x128xf32>
    %c0_6 = arith.constant 0 : index
    %c0_7 = arith.constant 0 : index
    %8 = vector.load %arg8[%c0_6, %c0_7] : memref<128x128xf32, #tpu.memory_space<vmem>>, vector<128x128xf32>
    tpu.vector_store %arg8[%c0_6, %c0_7], %7 {strides = array<i32>} : memref<128x128xf32, #tpu.memory_space<vmem>>, vector<128x128xf32>,
    %c0_i32_8 = arith.constant 0 : i32
    %9 = arith.cmpi eq, %arg2, %c0_i32_8 : i32
    %10 = arith.extui %9 : i1 to i32
    %c0_i32_9 = arith.constant 0 : i32
    %11 = arith.cmpi ne, %10, %c0_i32_9 : i32
    scf.if %11 {
      %c0_10 = arith.constant 0 : index
      %c0_11 = arith.constant 0 : index
      %12 = vector.load %arg8[%c0_10, %c0_11] : memref<128x128xf32, #tpu.memory_space<vmem>>, vector<128x128xf32>
      %13 = arith.truncf %12 : vector<128x128xf32> to vector<128x128xbf16>
      %c0_12 = arith.constant 0 : index
      %c0_13 = arith.constant 0 : index
      %14 = vector.load %arg5[%c0_12, %c0_13] : memref<128x128xbf16, #tpu.memory_space<vmem>>, vector<128x128xbf16>
      tpu.vector_store %arg5[%c0_12, %c0_13], %13 {strides = array<i32>} : memref<128x128xbf16, #tpu.memory_space<vmem>>, vector<128x128xbf16>,
      %c0_14 = arith.constant 0 : index
      %c0_15 = arith.constant 0 : index
      %15 = vector.load %arg6[%c0_14, %c0_15] : memref<8x128xf32, #tpu.memory_space<vmem>>, vector<8x128xf32>
      %cst_16 = arith.constant dense<0.000000e+00> : vector<128xf32>
      %16 = vector.multi_reduction <add>, %12, %cst_16 [0] : vector<128x128xf32> to vector<128xf32>
      %17 = vector.shape_cast %16 : vector<128xf32> to vector<1x128xf32>
      %18 = vector.broadcast %17 : vector<1x128xf32> to vector<8x128xf32>
      %19 = arith.addf %15, %18 : vector<8x128xf32>
      %c0_17 = arith.constant 0 : index
      %c0_18 = arith.constant 0 : index
      %20 = vector.load %arg6[%c0_17, %c0_18] : memref<8x128xf32, #tpu.memory_space<vmem>>, vector<8x128xf32>
      tpu.vector_store %arg6[%c0_17, %c0_18], %19 {strides = array<i32>} : memref<8x128xf32, #tpu.memory_space<vmem>>, vector<8x128xf32>,
      %c0_19 = arith.constant 0 : index
      %c0_20 = arith.constant 0 : index
      %21 = vector.load %arg7[%c0_19, %c0_20] : memref<8x128xf32, #tpu.memory_space<vmem>>, vector<8x128xf32>
      %22 = arith.mulf %12, %12 : vector<128x128xf32>
      %cst_21 = arith.constant dense<0.000000e+00> : vector<128xf32>
      %23 = vector.multi_reduction <add>, %22, %cst_21 [0] : vector<128x128xf32> to vector<128xf32>
      %24 = vector.shape_cast %23 : vector<128xf32> to vector<1x128xf32>
      %25 = vector.broadcast %24 : vector<1x128xf32> to vector<8x128xf32>
      %26 = arith.addf %21, %25 : vector<8x128xf32>
      %c0_22 = arith.constant 0 : index
      %c0_23 = arith.constant 0 : index
      %27 = vector.load %arg7[%c0_22, %c0_23] : memref<8x128xf32, #tpu.memory_space<vmem>>, vector<8x128xf32>
      tpu.vector_store %arg7[%c0_22, %c0_23], %26 {strides = array<i32>} : memref<8x128xf32, #tpu.memory_space<vmem>>, vector<8x128xf32>,
    } else {
    }
    return
  }
  func.func @transform_0(%arg0: i32, %arg1: i32, %arg2: i32) -> (i32, i32) {
    %c0_i32 = arith.constant 0 : i32
    return %arg0, %arg2 : i32, i32
  }
  func.func @transform_1(%arg0: i32, %arg1: i32, %arg2: i32) -> (i32, i32) {
    %c0_i32 = arith.constant 0 : i32
    return %arg2, %arg1 : i32, i32
  }
  func.func @transform_2(%arg0: i32, %arg1: i32, %arg2: i32) -> (i32, i32) {
    %c0_i32 = arith.constant 0 : i32
    return %arg0, %arg1 : i32, i32
  }
  func.func @transform_3(%arg0: i32, %arg1: i32, %arg2: i32) -> (i32, i32) {
    %c0_i32 = arith.constant 0 : i32
    return %arg0, %arg1 : i32, i32
  }
  func.func @transform_4(%arg0: i32, %arg1: i32, %arg2: i32) -> (i32, i32) {
    %c0_i32 = arith.constant 0 : i32
    return %arg0, %arg1 : i32, i32
  }
}

module attributes {stable_mosaic.version = 11 : i64} {
  func.func @_matmul_stats_kernel(%arg0: i32, %arg1: i32, %arg2: i32, %arg3: memref<128x384xbf16, #tpu.memory_space<vmem>>, %arg4: memref<384x128xbf16, #tpu.memory_space<vmem>>, %arg5: memref<128x128xbf16, #tpu.memory_space<vmem>>, %arg6: memref<8x128xf32, #tpu.memory_space<vmem>>, %arg7: memref<8x128xf32, #tpu.memory_space<vmem>>, %arg8: memref<128x128xf32, #tpu.memory_space<vmem>>) attributes {dimension_semantics = [#tpu.dimension_semantics<parallel>, #tpu.dimension_semantics<parallel>, #tpu.dimension_semantics<arbitrary>], iteration_bounds = array<i64: 1, 1, 1>, scalar_prefetch = 0 : i64, scratch_operands = 1 : i64, tpu.core_type = #tpu.core_type<tc>, window_params = [{transform_indices = @transform_0, window_bounds = array<i64: 128, 384>}, {transform_indices = @transform_1, window_bounds = array<i64: 384, 128>}, {transform_indices = @transform_2, window_bounds = array<i64: 128, 128>}, {transform_indices = @transform_3, window_bounds = array<i64: 8, 128>}, {transform_indices = @transform_4, window_bounds = array<i64: 8, 128>}]} {
    %c0_i32 = arith.constant 0 : i32
    %0 = arith.cmpi eq, %arg2, %c0_i32 : i32
    %1 = arith.extui %0 : i1 to i32
    %c0_i32_0 = arith.constant 0 : i32
    %2 = arith.cmpi ne, %1, %c0_i32_0 : i32
    scf.if %2 {
      %cst_10 = arith.constant 0.000000e+00 : f32
      %12 = vector.broadcast %cst_10 : f32 to vector<128x128xf32>
      %c0_11 = arith.constant 0 : index
      %c0_12 = arith.constant 0 : index
      %13 = vector.load %arg8[%c0_11, %c0_12] : memref<128x128xf32, #tpu.memory_space<vmem>>, vector<128x128xf32>
      tpu.vector_store %arg8[%c0_11, %c0_12], %12 {strides = array<i32>} : memref<128x128xf32, #tpu.memory_space<vmem>>, vector<128x128xf32>,
      %cst_13 = arith.constant 0.000000e+00 : f32
      %14 = vector.broadcast %cst_13 : f32 to vector<8x128xf32>
      %c0_14 = arith.constant 0 : index
      %c0_15 = arith.constant 0 : index
      %15 = vector.load %arg6[%c0_14, %c0_15] : memref<8x128xf32, #tpu.memory_space<vmem>>, vector<8x128xf32>
      tpu.vector_store %arg6[%c0_14, %c0_15], %14 {strides = array<i32>} : memref<8x128xf32, #tpu.memory_space<vmem>>, vector<8x128xf32>,
      %cst_16 = arith.constant 0.000000e+00 : f32
      %16 = vector.broadcast %cst_16 : f32 to vector<8x128xf32>
      %c0_17 = arith.constant 0 : index
      %c0_18 = arith.constant 0 : index
      %17 = vector.load %arg7[%c0_17, %c0_18] : memref<8x128xf32, #tpu.memory_space<vmem>>, vector<8x128xf32>
      tpu.vector_store %arg7[%c0_17, %c0_18], %16 {strides = array<i32>} : memref<8x128xf32, #tpu.memory_space<vmem>>, vector<8x128xf32>,
    } else {
    }
    %c0 = arith.constant 0 : index
    %c0_1 = arith.constant 0 : index
    %3 = vector.load %arg8[%c0, %c0_1] : memref<128x128xf32, #tpu.memory_space<vmem>>, vector<128x128xf32>
    %c0_2 = arith.constant 0 : index
    %c0_3 = arith.constant 0 : index
    %4 = vector.load %arg3[%c0_2, %c0_3] : memref<128x384xbf16, #tpu.memory_space<vmem>>, vector<128x384xbf16>
    %c0_4 = arith.constant 0 : index
    %c0_5 = arith.constant 0 : index
    %5 = vector.load %arg4[%c0_4, %c0_5] : memref<384x128xbf16, #tpu.memory_space<vmem>>, vector<384x128xbf16>
    %cst = arith.constant dense<0.000000e+00> : vector<128x128xf32>
    %6 = tpu.matmul %4, %5, %cst {dimension_numbers = #tpu.dot_dimension_numbers<[1], [0], [0], [1], [0, 0, 1, 1], [], []>} : vector<128x384xbf16>, vector<384x128xbf16>, vector<128x128xf32> -> vector<128x128xf32>
    %7 = arith.addf %3, %6 : vector<128x128xf32>
    %c0_6 = arith.constant 0 : index
    %c0_7 = arith.constant 0 : index
    %8 = vector.load %arg8[%c0_6, %c0_7] : memref<128x128xf32, #tpu.memory_space<vmem>>, vector<128x128xf32>
    tpu.vector_store %arg8[%c0_6, %c0_7], %7 {strides = array<i32>} : memref<128x128xf32, #tpu.memory_space<vmem>>, vector<128x128xf32>,
    %c0_i32_8 = arith.constant 0 : i32
    %9 = arith.cmpi eq, %arg2, %c0_i32_8 : i32
    %10 = arith.extui %9 : i1 to i32
    %c0_i32_9 = arith.constant 0 : i32
    %11 = arith.cmpi ne, %10, %c0_i32_9 : i32
    scf.if %11 {
      %c0_10 = arith.constant 0 : index
      %c0_11 = arith.constant 0 : index
      %12 = vector.load %arg8[%c0_10, %c0_11] : memref<128x128xf32, #tpu.memory_space<vmem>>, vector<128x128xf32>
      %13 = arith.truncf %12 : vector<128x128xf32> to vector<128x128xbf16>
      %c0_12 = arith.constant 0 : index
      %c0_13 = arith.constant 0 : index
      %14 = vector.load %arg5[%c0_12, %c0_13] : memref<128x128xbf16, #tpu.memory_space<vmem>>, vector<128x128xbf16>
      tpu.vector_store %arg5[%c0_12, %c0_13], %13 {strides = array<i32>} : memref<128x128xbf16, #tpu.memory_space<vmem>>, vector<128x128xbf16>,
      %c0_14 = arith.constant 0 : index
      %c0_15 = arith.constant 0 : index
      %15 = vector.load %arg6[%c0_14, %c0_15] : memref<8x128xf32, #tpu.memory_space<vmem>>, vector<8x128xf32>
      %cst_16 = arith.constant dense<0.000000e+00> : vector<128xf32>
      %16 = vector.multi_reduction <add>, %12, %cst_16 [0] : vector<128x128xf32> to vector<128xf32>
      %17 = vector.shape_cast %16 : vector<128xf32> to vector<1x128xf32>
      %18 = vector.broadcast %17 : vector<1x128xf32> to vector<8x128xf32>
      %19 = arith.addf %15, %18 : vector<8x128xf32>
      %c0_17 = arith.constant 0 : index
      %c0_18 = arith.constant 0 : index
      %20 = vector.load %arg6[%c0_17, %c0_18] : memref<8x128xf32, #tpu.memory_space<vmem>>, vector<8x128xf32>
      tpu.vector_store %arg6[%c0_17, %c0_18], %19 {strides = array<i32>} : memref<8x128xf32, #tpu.memory_space<vmem>>, vector<8x128xf32>,
      %c0_19 = arith.constant 0 : index
      %c0_20 = arith.constant 0 : index
      %21 = vector.load %arg7[%c0_19, %c0_20] : memref<8x128xf32, #tpu.memory_space<vmem>>, vector<8x128xf32>
      %22 = arith.mulf %12, %12 : vector<128x128xf32>
      %cst_21 = arith.constant dense<0.000000e+00> : vector<128xf32>
      %23 = vector.multi_reduction <add>, %22, %cst_21 [0] : vector<128x128xf32> to vector<128xf32>
      %24 = vector.shape_cast %23 : vector<128xf32> to vector<1x128xf32>
      %25 = vector.broadcast %24 : vector<1x128xf32> to vector<8x128xf32>
      %26 = arith.addf %21, %25 : vector<8x128xf32>
      %c0_22 = arith.constant 0 : index
      %c0_23 = arith.constant 0 : index
      %27 = vector.load %arg7[%c0_22, %c0_23] : memref<8x128xf32, #tpu.memory_space<vmem>>, vector<8x128xf32>
      tpu.vector_store %arg7[%c0_22, %c0_23], %26 {strides = array<i32>} : memref<8x128xf32, #tpu.memory_space<vmem>>, vector<8x128xf32>,
    } else {
    }
    return
  }
  func.func @transform_0(%arg0: i32, %arg1: i32, %arg2: i32) -> (i32, i32) {
    %c0_i32 = arith.constant 0 : i32
    return %arg0, %arg2 : i32, i32
  }
  func.func @transform_1(%arg0: i32, %arg1: i32, %arg2: i32) -> (i32, i32) {
    %c0_i32 = arith.constant 0 : i32
    return %arg2, %arg1 : i32, i32
  }
  func.func @transform_2(%arg0: i32, %arg1: i32, %arg2: i32) -> (i32, i32) {
    %c0_i32 = arith.constant 0 : i32
    return %arg0, %arg1 : i32, i32
  }
  func.func @transform_3(%arg0: i32, %arg1: i32, %arg2: i32) -> (i32, i32) {
    %c0_i32 = arith.constant 0 : i32
    return %arg0, %arg1 : i32, i32
  }
  func.func @transform_4(%arg0: i32, %arg1: i32, %arg2: i32) -> (i32, i32) {
    %c0_i32 = arith.constant 0 : i32
    return %arg0, %arg1 : i32, i32
  }
}

module attributes {stable_mosaic.version = 11 : i64} {
  func.func @_affine_add_kernel(%arg0: i32, %arg1: memref<128x128xbf16, #tpu.memory_space<vmem>>, %arg2: memref<8x128xf32, #tpu.memory_space<vmem>>, %arg3: memref<128x128xbf16, #tpu.memory_space<vmem>>, %arg4: memref<128x128xbf16, #tpu.memory_space<vmem>>) attributes {dimension_semantics = [#tpu.dimension_semantics<parallel>], iteration_bounds = array<i64: 1>, scalar_prefetch = 0 : i64, scratch_operands = 0 : i64, tpu.core_type = #tpu.core_type<tc>, window_params = [{transform_indices = @transform_0, window_bounds = array<i64: 128, 128>}, {pipeline_mode = #tpu.pipeline_mode<synchronous>, transform_indices = @transform_1, window_bounds = array<i64: 8, 128>}, {transform_indices = @transform_2, window_bounds = array<i64: 128, 128>}, {transform_indices = @transform_3, window_bounds = array<i64: 128, 128>}]} {
    %c0 = arith.constant 0 : index
    %c0_0 = arith.constant 0 : index
    %0 = vector.load %arg1[%c0, %c0_0] : memref<128x128xbf16, #tpu.memory_space<vmem>>, vector<128x128xbf16>
    %1 = arith.extf %0 : vector<128x128xbf16> to vector<128x128xf32>
    %c0_1 = arith.constant 0 : index
    %c0_2 = arith.constant 0 : index
    %2 = vector.load %arg2[%c0_1, %c0_2] : memref<8x128xf32, #tpu.memory_space<vmem>>, vector<8x128xf32>
    %3 = vector.extract_strided_slice %2 {offsets = [0, 0], sizes = [1, 128], strides = [1, 1]} : vector<8x128xf32> to vector<1x128xf32>
    %4 = vector.broadcast %3 : vector<1x128xf32> to vector<128x128xf32>
    %5 = arith.mulf %1, %4 : vector<128x128xf32>
    %6 = vector.extract_strided_slice %2 {offsets = [1, 0], sizes = [1, 128], strides = [1, 1]} : vector<8x128xf32> to vector<1x128xf32>
    %7 = vector.broadcast %6 : vector<1x128xf32> to vector<128x128xf32>
    %8 = arith.addf %5, %7 : vector<128x128xf32>
    %c0_3 = arith.constant 0 : index
    %c0_4 = arith.constant 0 : index
    %9 = vector.load %arg3[%c0_3, %c0_4] : memref<128x128xbf16, #tpu.memory_space<vmem>>, vector<128x128xbf16>
    %10 = arith.extf %9 : vector<128x128xbf16> to vector<128x128xf32>
    %11 = arith.addf %8, %10 : vector<128x128xf32>
    %12 = arith.truncf %11 : vector<128x128xf32> to vector<128x128xbf16>
    %c0_5 = arith.constant 0 : index
    %c0_6 = arith.constant 0 : index
    %13 = vector.load %arg4[%c0_5, %c0_6] : memref<128x128xbf16, #tpu.memory_space<vmem>>, vector<128x128xbf16>
    tpu.vector_store %arg4[%c0_5, %c0_6], %12 {strides = array<i32>} : memref<128x128xbf16, #tpu.memory_space<vmem>>, vector<128x128xbf16>,
    return
  }
  func.func @transform_0(%arg0: i32) -> (i32, i32) {
    %c0_i32 = arith.constant 0 : i32
    %c0_i32_0 = arith.constant 0 : i32
    return %arg0, %c0_i32 : i32, i32
  }
  func.func @transform_1(%arg0: i32) -> (i32, i32) {
    %c0_i32 = arith.constant 0 : i32
    %c0_i32_0 = arith.constant 0 : i32
    %c0_i32_1 = arith.constant 0 : i32
    return %c0_i32, %c0_i32_0 : i32, i32
  }
  func.func @transform_2(%arg0: i32) -> (i32, i32) {
    %c0_i32 = arith.constant 0 : i32
    %c0_i32_0 = arith.constant 0 : i32
    return %arg0, %c0_i32 : i32, i32
  }
  func.func @transform_3(%arg0: i32) -> (i32, i32) {
    %c0_i32 = arith.constant 0 : i32
    %c0_i32_0 = arith.constant 0 : i32
    return %arg0, %c0_i32 : i32, i32
  }
}

module attributes {stable_mosaic.version = 11 : i64} {
  func.func @_bias_tanh_kernel(%arg0: i32, %arg1: memref<512x128xbf16, #tpu.memory_space<vmem>>, %arg2: memref<8x128xf32, #tpu.memory_space<vmem>>, %arg3: memref<512x128xf32, #tpu.memory_space<vmem>>) attributes {dimension_semantics = [#tpu.dimension_semantics<parallel>], iteration_bounds = array<i64: 1>, scalar_prefetch = 0 : i64, scratch_operands = 0 : i64, tpu.core_type = #tpu.core_type<tc>, window_params = [{transform_indices = @transform_0, window_bounds = array<i64: 512, 128>}, {pipeline_mode = #tpu.pipeline_mode<synchronous>, transform_indices = @transform_1, window_bounds = array<i64: 8, 128>}, {transform_indices = @transform_2, window_bounds = array<i64: 512, 128>}]} {
    %c0 = arith.constant 0 : index
    %c0_0 = arith.constant 0 : index
    %0 = vector.load %arg1[%c0, %c0_0] : memref<512x128xbf16, #tpu.memory_space<vmem>>, vector<512x128xbf16>
    %1 = arith.extf %0 : vector<512x128xbf16> to vector<512x128xf32>
    %c0_1 = arith.constant 0 : index
    %c0_2 = arith.constant 0 : index
    %2 = vector.load %arg2[%c0_1, %c0_2] : memref<8x128xf32, #tpu.memory_space<vmem>>, vector<8x128xf32>
    %3 = vector.extract_strided_slice %2 {offsets = [0, 0], sizes = [1, 128], strides = [1, 1]} : vector<8x128xf32> to vector<1x128xf32>
    %4 = vector.broadcast %3 : vector<1x128xf32> to vector<512x128xf32>
    %5 = arith.addf %1, %4 : vector<512x128xf32>
    %6 = math.tanh %5 : vector<512x128xf32>
    %c0_3 = arith.constant 0 : index
    %c0_4 = arith.constant 0 : index
    %7 = vector.load %arg3[%c0_3, %c0_4] : memref<512x128xf32, #tpu.memory_space<vmem>>, vector<512x128xf32>
    tpu.vector_store %arg3[%c0_3, %c0_4], %6 {strides = array<i32>} : memref<512x128xf32, #tpu.memory_space<vmem>>, vector<512x128xf32>,
    return
  }
  func.func @transform_0(%arg0: i32) -> (i32, i32) {
    %c0_i32 = arith.constant 0 : i32
    %c0_i32_0 = arith.constant 0 : i32
    return %arg0, %c0_i32 : i32, i32
  }
  func.func @transform_1(%arg0: i32) -> (i32, i32) {
    %c0_i32 = arith.constant 0 : i32
    %c0_i32_0 = arith.constant 0 : i32
    %c0_i32_1 = arith.constant 0 : i32
    return %c0_i32, %c0_i32_0 : i32, i32
  }
  func.func @transform_2(%arg0: i32) -> (i32, i32) {
    %c0_i32 = arith.constant 0 : i32
    %c0_i32_0 = arith.constant 0 : i32
    return %arg0, %c0_i32 : i32, i32
  }
}

module attributes {stable_mosaic.version = 11 : i64} {
  func.func @_matmul_stats_kernel(%arg0: i32, %arg1: i32, %arg2: i32, %arg3: memref<512x512xbf16, #tpu.memory_space<vmem>>, %arg4: memref<512x128xbf16, #tpu.memory_space<vmem>>, %arg5: memref<512x128xbf16, #tpu.memory_space<vmem>>, %arg6: memref<8x128xf32, #tpu.memory_space<vmem>>, %arg7: memref<8x128xf32, #tpu.memory_space<vmem>>, %arg8: memref<512x128xf32, #tpu.memory_space<vmem>>) attributes {dimension_semantics = [#tpu.dimension_semantics<parallel>, #tpu.dimension_semantics<parallel>, #tpu.dimension_semantics<arbitrary>], iteration_bounds = array<i64: 1, 1, 1>, scalar_prefetch = 0 : i64, scratch_operands = 1 : i64, tpu.core_type = #tpu.core_type<tc>, window_params = [{transform_indices = @transform_0, window_bounds = array<i64: 512, 512>}, {transform_indices = @transform_1, window_bounds = array<i64: 512, 128>}, {transform_indices = @transform_2, window_bounds = array<i64: 512, 128>}, {transform_indices = @transform_3, window_bounds = array<i64: 8, 128>}, {transform_indices = @transform_4, window_bounds = array<i64: 8, 128>}]} {
    %c0_i32 = arith.constant 0 : i32
    %0 = arith.cmpi eq, %arg2, %c0_i32 : i32
    %1 = arith.extui %0 : i1 to i32
    %c0_i32_0 = arith.constant 0 : i32
    %2 = arith.cmpi ne, %1, %c0_i32_0 : i32
    scf.if %2 {
      %cst_10 = arith.constant 0.000000e+00 : f32
      %12 = vector.broadcast %cst_10 : f32 to vector<512x128xf32>
      %c0_11 = arith.constant 0 : index
      %c0_12 = arith.constant 0 : index
      %13 = vector.load %arg8[%c0_11, %c0_12] : memref<512x128xf32, #tpu.memory_space<vmem>>, vector<512x128xf32>
      tpu.vector_store %arg8[%c0_11, %c0_12], %12 {strides = array<i32>} : memref<512x128xf32, #tpu.memory_space<vmem>>, vector<512x128xf32>,
      %cst_13 = arith.constant 0.000000e+00 : f32
      %14 = vector.broadcast %cst_13 : f32 to vector<8x128xf32>
      %c0_14 = arith.constant 0 : index
      %c0_15 = arith.constant 0 : index
      %15 = vector.load %arg6[%c0_14, %c0_15] : memref<8x128xf32, #tpu.memory_space<vmem>>, vector<8x128xf32>
      tpu.vector_store %arg6[%c0_14, %c0_15], %14 {strides = array<i32>} : memref<8x128xf32, #tpu.memory_space<vmem>>, vector<8x128xf32>,
      %cst_16 = arith.constant 0.000000e+00 : f32
      %16 = vector.broadcast %cst_16 : f32 to vector<8x128xf32>
      %c0_17 = arith.constant 0 : index
      %c0_18 = arith.constant 0 : index
      %17 = vector.load %arg7[%c0_17, %c0_18] : memref<8x128xf32, #tpu.memory_space<vmem>>, vector<8x128xf32>
      tpu.vector_store %arg7[%c0_17, %c0_18], %16 {strides = array<i32>} : memref<8x128xf32, #tpu.memory_space<vmem>>, vector<8x128xf32>,
    } else {
    }
    %c0 = arith.constant 0 : index
    %c0_1 = arith.constant 0 : index
    %3 = vector.load %arg8[%c0, %c0_1] : memref<512x128xf32, #tpu.memory_space<vmem>>, vector<512x128xf32>
    %c0_2 = arith.constant 0 : index
    %c0_3 = arith.constant 0 : index
    %4 = vector.load %arg3[%c0_2, %c0_3] : memref<512x512xbf16, #tpu.memory_space<vmem>>, vector<512x512xbf16>
    %c0_4 = arith.constant 0 : index
    %c0_5 = arith.constant 0 : index
    %5 = vector.load %arg4[%c0_4, %c0_5] : memref<512x128xbf16, #tpu.memory_space<vmem>>, vector<512x128xbf16>
    %cst = arith.constant dense<0.000000e+00> : vector<512x128xf32>
    %6 = tpu.matmul %4, %5, %cst {dimension_numbers = #tpu.dot_dimension_numbers<[1], [0], [0], [1], [0, 0, 1, 1], [], []>} : vector<512x512xbf16>, vector<512x128xbf16>, vector<512x128xf32> -> vector<512x128xf32>
    %7 = arith.addf %3, %6 : vector<512x128xf32>
    %c0_6 = arith.constant 0 : index
    %c0_7 = arith.constant 0 : index
    %8 = vector.load %arg8[%c0_6, %c0_7] : memref<512x128xf32, #tpu.memory_space<vmem>>, vector<512x128xf32>
    tpu.vector_store %arg8[%c0_6, %c0_7], %7 {strides = array<i32>} : memref<512x128xf32, #tpu.memory_space<vmem>>, vector<512x128xf32>,
    %c0_i32_8 = arith.constant 0 : i32
    %9 = arith.cmpi eq, %arg2, %c0_i32_8 : i32
    %10 = arith.extui %9 : i1 to i32
    %c0_i32_9 = arith.constant 0 : i32
    %11 = arith.cmpi ne, %10, %c0_i32_9 : i32
    scf.if %11 {
      %c0_10 = arith.constant 0 : index
      %c0_11 = arith.constant 0 : index
      %12 = vector.load %arg8[%c0_10, %c0_11] : memref<512x128xf32, #tpu.memory_space<vmem>>, vector<512x128xf32>
      %13 = arith.truncf %12 : vector<512x128xf32> to vector<512x128xbf16>
      %c0_12 = arith.constant 0 : index
      %c0_13 = arith.constant 0 : index
      %14 = vector.load %arg5[%c0_12, %c0_13] : memref<512x128xbf16, #tpu.memory_space<vmem>>, vector<512x128xbf16>
      tpu.vector_store %arg5[%c0_12, %c0_13], %13 {strides = array<i32>} : memref<512x128xbf16, #tpu.memory_space<vmem>>, vector<512x128xbf16>,
      %c0_14 = arith.constant 0 : index
      %c0_15 = arith.constant 0 : index
      %15 = vector.load %arg6[%c0_14, %c0_15] : memref<8x128xf32, #tpu.memory_space<vmem>>, vector<8x128xf32>
      %cst_16 = arith.constant dense<0.000000e+00> : vector<128xf32>
      %16 = vector.multi_reduction <add>, %12, %cst_16 [0] : vector<512x128xf32> to vector<128xf32>
      %17 = vector.shape_cast %16 : vector<128xf32> to vector<1x128xf32>
      %18 = vector.broadcast %17 : vector<1x128xf32> to vector<8x128xf32>
      %19 = arith.addf %15, %18 : vector<8x128xf32>
      %c0_17 = arith.constant 0 : index
      %c0_18 = arith.constant 0 : index
      %20 = vector.load %arg6[%c0_17, %c0_18] : memref<8x128xf32, #tpu.memory_space<vmem>>, vector<8x128xf32>
      tpu.vector_store %arg6[%c0_17, %c0_18], %19 {strides = array<i32>} : memref<8x128xf32, #tpu.memory_space<vmem>>, vector<8x128xf32>,
      %c0_19 = arith.constant 0 : index
      %c0_20 = arith.constant 0 : index
      %21 = vector.load %arg7[%c0_19, %c0_20] : memref<8x128xf32, #tpu.memory_space<vmem>>, vector<8x128xf32>
      %22 = arith.mulf %12, %12 : vector<512x128xf32>
      %cst_21 = arith.constant dense<0.000000e+00> : vector<128xf32>
      %23 = vector.multi_reduction <add>, %22, %cst_21 [0] : vector<512x128xf32> to vector<128xf32>
      %24 = vector.shape_cast %23 : vector<128xf32> to vector<1x128xf32>
      %25 = vector.broadcast %24 : vector<1x128xf32> to vector<8x128xf32>
      %26 = arith.addf %21, %25 : vector<8x128xf32>
      %c0_22 = arith.constant 0 : index
      %c0_23 = arith.constant 0 : index
      %27 = vector.load %arg7[%c0_22, %c0_23] : memref<8x128xf32, #tpu.memory_space<vmem>>, vector<8x128xf32>
      tpu.vector_store %arg7[%c0_22, %c0_23], %26 {strides = array<i32>} : memref<8x128xf32, #tpu.memory_space<vmem>>, vector<8x128xf32>,
    } else {
    }
    return
  }
  func.func @transform_0(%arg0: i32, %arg1: i32, %arg2: i32) -> (i32, i32) {
    %c0_i32 = arith.constant 0 : i32
    return %arg0, %arg2 : i32, i32
  }
  func.func @transform_1(%arg0: i32, %arg1: i32, %arg2: i32) -> (i32, i32) {
    %c0_i32 = arith.constant 0 : i32
    return %arg2, %arg1 : i32, i32
  }
  func.func @transform_2(%arg0: i32, %arg1: i32, %arg2: i32) -> (i32, i32) {
    %c0_i32 = arith.constant 0 : i32
    return %arg0, %arg1 : i32, i32
  }
  func.func @transform_3(%arg0: i32, %arg1: i32, %arg2: i32) -> (i32, i32) {
    %c0_i32 = arith.constant 0 : i32
    return %arg0, %arg1 : i32, i32
  }
  func.func @transform_4(%arg0: i32, %arg1: i32, %arg2: i32) -> (i32, i32) {
    %c0_i32 = arith.constant 0 : i32
    return %arg0, %arg1 : i32, i32
  }
}

</mosaic_0001>

<bundles_post_ra>
// kernel: resnet_generator_forward.33
= control target key start
LH: loop header
LB: loop body
LE: loop exit
PB: predicated region body
PF: predicated region fallthrough
CT: control target
= control target key end

     0   :  { %v140_v0 = vlaneseq  ;;  %s1500_s0 = inlined_call_operand.vmem [shape: bf16[512,128], index: 0, kind: input, shape index: {}]   ;;  %s1501_s1 = inlined_call_operand.vmem [shape: f32[8,128], index: 1, kind: input, shape index: {}]   ;;  %s1502_s2 = inlined_call_operand.vmem [shape: bf16[512,128], index: 2, kind: output, shape index: {}]  }
   0x1   :  { %v793_v1 = vld [vmem:[%s1500_s0] sm:$0xff]   ;;  %v1080_v3 = vld [vmem:[%s1500_s0 + $0x8] sm:$0xff]   ;;  %v1081_v8 = vld [vmem:[%s1500_s0 + $0x10] sm:$0xff]  }
   0x2   :  { %v139_v2 = vld [vmem:[%s1501_s1] sm:$0xff]  ;;  %v794_v4 = vunpack.c.l.bf16 %v793_v1  ;;  %v795_v5 = vunpack.c.h.bf16 %v793_v1  ;;  %v141_v6 = vshrl.u32 %v140_v0, 7  ;;  %v798_v7 = vunpack.c.l.bf16 %v1080_v3  ;;  %v1082_v9 = vld [vmem:[%s1500_s0 + $0x18] sm:$0xff]   ;;  %v1084_v15 = vld [vmem:[%s1500_s0 + $0x28] sm:$0xff]  }
   0x3   :  { %v1083_v10 = vld [vmem:[%s1500_s0 + $0x20] sm:$0xff]   ;;  %v799_v11 = vunpack.c.h.bf16 %v1080_v3  ;;  %v802_v12 = vunpack.c.l.bf16 %v1081_v8  ;;  %v803_v13 = vunpack.c.h.bf16 %v1081_v8  ;;  %v806_v14 = vunpack.c.l.bf16 %v1082_v9  ;;  %v1085_v16 = vld [vmem:[%s1500_s0 + $0x30] sm:$0xff]   ;;  %v1184_v17 = vld [vmem:[%s1500_s0 + $0x38] sm:$0xff]  }
   0x4   :  { %v142_v18 = vsub.s32 0, %v141_v6  ;;  %v210_v19 = vsub.s32 1, %v141_v6  ;;  %v807_v20 = vunpack.c.h.bf16 %v1082_v9  ;;  %v810_v21 = vunpack.c.l.bf16 %v1083_v10  ;;  %v1189_v22 = vld [vmem:[%s1500_s0 + $0x40] sm:$0xff]   ;;  %v1194_v23 = vld [vmem:[%s1500_s0 + $0x48] sm:$0xff]  }
   0x5   :  { %v811_v24 = vunpack.c.h.bf16 %v1083_v10  ;;  %v814_v25 = vunpack.c.l.bf16 %v1084_v15  ;;  %v815_v26 = vunpack.c.h.bf16 %v1084_v15  ;;  %v818_v27 = vunpack.c.l.bf16 %v1085_v16 }
   0x6   :  { %v1196_v28 = vrot.slane %v139_v2, %v142_v18  ;;  %v1198_v29 = vrot.slane %v139_v2, %v210_v19  ;;  %v819_v30 = vunpack.c.h.bf16 %v1085_v16  ;;  %v822_v31 = vunpack.c.l.bf16 %v1184_v17 }
   0x7   :  { %v823_v32 = vunpack.c.h.bf16 %v1184_v17  ;;  %v826_v33 = vunpack.c.l.bf16 %v1189_v22  ;;  %v827_v34 = vunpack.c.h.bf16 %v1189_v22  ;;  %v830_v35 = vunpack.c.l.bf16 %v1194_v23 }
   0x8   :  { %v144_v36 = vmul.f32 %v794_v4, %v1196_v28  ;;  %v145_v37 = vmul.f32 %v795_v5, %v1196_v28  ;;  %v146_v38 = vmul.f32 %v798_v7, %v1196_v28  ;;  %v147_v39 = vmul.f32 %v799_v11, %v1196_v28 }
   0x9   :  { %v148_v40 = vmul.f32 %v802_v12, %v1196_v28  ;;  %v149_v41 = vmul.f32 %v803_v13, %v1196_v28  ;;  %v150_v42 = vmul.f32 %v806_v14, %v1196_v28  ;;  %v151_v43 = vmul.f32 %v807_v20, %v1196_v28 }
   0xa   :  { %v212_v44 = vadd.f32 %v1198_v29, %v144_v36  ;;  %v213_v45 = vadd.f32 %v1198_v29, %v145_v37  ;;  %v214_v46 = vadd.f32 %v1198_v29, %v146_v38  ;;  %v215_v47 = vadd.f32 %v1198_v29, %v147_v39  ;;  %v1090_v36 = vld [vmem:[%s1500_s0 + $0x58] sm:$0xff]  }
   0xb   :  { %v216_v48 = vadd.f32 %v1198_v29, %v148_v40  ;;  %v217_v49 = vadd.f32 %v1198_v29, %v149_v41  ;;  %v218_v50 = vadd.f32 %v1198_v29, %v150_v42  ;;  %v219_v51 = vadd.f32 %v1198_v29, %v151_v43  ;;  %v1091_v42 = vld [vmem:[%s1500_s0 + $0x60] sm:$0xff]  }
   0xc   :  { %v276_v52 = vmax.f32 %v212_v44, 0.0  ;;  %v277_v53 = vmax.f32 %v213_v45, 0.0  ;;  %v278_v54 = vmax.f32 %v214_v46, 0.0  ;;  %v279_v55 = vmax.f32 %v215_v47, 0.0 }
   0xd   :  { %v280_v56 = vmax.f32 %v216_v48, 0.0  ;;  %v281_v57 = vmax.f32 %v217_v49, 0.0  ;;  %v282_v58 = vmax.f32 %v218_v50, 0.0  ;;  %v283_v59 = vmax.f32 %v219_v51, 0.0 }
   0xe   :  { %v923_v60 = vpack.c.bf16 %v277_v53, %v276_v52  ;;  %v928_v61 = vpack.c.bf16 %v279_v55, %v278_v54  ;;  %v152_v62 = vmul.f32 %v810_v21, %v1196_v28  ;;  %v153_v63 = vmul.f32 %v811_v24, %v1196_v28  ;;  %v1092_v53 = vld [vmem:[%s1500_s0 + $0x68] sm:$0xff]  }
   0xf   :  { %v933_v0 = vpack.c.bf16 %v281_v57, %v280_v56  ;;  %v938_v1 = vpack.c.bf16 %v283_v59, %v282_v58  ;;  %v154_v2 = vmul.f32 %v814_v25, %v1196_v28  ;;  %v155_v3 = vmul.f32 %v815_v26, %v1196_v28  ;;  %v1089_v26 = vld [vmem:[%s1500_s0 + $0x50] sm:$0xff]  }
  0x10   :  { %924 = vst [vmem:[%s1502_s2] sm:$0xff] %v923_v60   ;;  %1111 = vst [vmem:[%s1502_s2 + $0x8] sm:$0xff] %v928_v61   ;;  %v220_v4 = vadd.f32 %v1198_v29, %v152_v62  ;;  %v221_v5 = vadd.f32 %v1198_v29, %v153_v63  ;;  %v156_v6 = vmul.f32 %v818_v27, %v1196_v28  ;;  %v831_v38 = vunpack.c.h.bf16 %v1194_v23 }
  0x11   :  { %v157_v7 = vmul.f32 %v819_v30, %v1196_v28  ;;  %1112 = vst [vmem:[%s1502_s2 + $0x10] sm:$0xff] %v933_v0   ;;  %1113 = vst [vmem:[%s1502_s2 + $0x18] sm:$0xff] %v938_v1   ;;  %v222_v8 = vadd.f32 %v1198_v29, %v154_v2  ;;  %v223_v9 = vadd.f32 %v1198_v29, %v155_v3  ;;  %v834_v40 = vunpack.c.l.bf16 %v1089_v26  ;;  %v1093_v2 = vld [vmem:[%s1500_s0 + $0x70] sm:$0xff]  }
  0x12   :  { %v158_v10 = vmul.f32 %v822_v31, %v1196_v28  ;;  %v159_v11 = vmul.f32 %v823_v32, %v1196_v28  ;;  %v284_v12 = vmax.f32 %v220_v4, 0.0  ;;  %v285_v13 = vmax.f32 %v221_v5, 0.0 }
  0x13   :  { %v224_v14 = vadd.f32 %v1198_v29, %v156_v6  ;;  %v225_v15 = vadd.f32 %v1198_v29, %v157_v7  ;;  %v286_v16 = vmax.f32 %v222_v8, 0.0  ;;  %v287_v17 = vmax.f32 %v223_v9, 0.0  ;;  %v1094_v7 = vld [vmem:[%s1500_s0 + $0x78] sm:$0xff]  }
  0x14   :  { %v226_v18 = vadd.f32 %v1198_v29, %v158_v10  ;;  %v227_v19 = vadd.f32 %v1198_v29, %v159_v11  ;;  %v943_v20 = vpack.c.bf16 %v285_v13, %v284_v12  ;;  %v160_v25 = vmul.f32 %v826_v33, %v1196_v28 }
  0x15   :  { %v288_v21 = vmax.f32 %v224_v14, 0.0  ;;  %v289_v24 = vmax.f32 %v225_v15, 0.0  ;;  %v948_v27 = vpack.c.bf16 %v287_v17, %v286_v16  ;;  %v161_v32 = vmul.f32 %v827_v34, %v1196_v28  ;;  %v1095_v16 = vld [vmem:[%s1500_s0 + $0x80] sm:$0xff]  }
  0x16   :  { %v290_v30 = vmax.f32 %v226_v18, 0.0  ;;  %v291_v31 = vmax.f32 %v227_v19, 0.0  ;;  %1114 = vst [vmem:[%s1502_s2 + $0x20] sm:$0xff] %v943_v20   ;;  %v228_v37 = vadd.f32 %v1198_v29, %v160_v25  ;;  %v162_v39 = vmul.f32 %v830_v35, %v1196_v28 }
  0x17   :  { %v953_v33 = vpack.c.bf16 %v289_v24, %v288_v21  ;;  %1115 = vst [vmem:[%s1502_s2 + $0x28] sm:$0xff] %v948_v27   ;;  %v229_v34 = vadd.f32 %v1198_v29, %v161_v32  ;;  %v835_v41 = vunpack.c.h.bf16 %v1089_v26  ;;  %v163_v23 = vmul.f32 %v831_v38, %v1196_v28 }
  0x18   :  { %v958_v22 = vpack.c.bf16 %v291_v31, %v290_v30  ;;  %v292_v43 = vmax.f32 %v228_v37, 0.0  ;;  %v230_v35 = vadd.f32 %v1198_v29, %v162_v39  ;;  %v838_v44 = vunpack.c.l.bf16 %v1090_v36 }
  0x19   :  { %1116 = vst [vmem:[%s1502_s2 + $0x30] sm:$0xff] %v953_v33   ;;  %v293_v45 = vmax.f32 %v229_v34, 0.0  ;;  %v164_v46 = vmul.f32 %v834_v40, %v1196_v28  ;;  %v165_v47 = vmul.f32 %v835_v41, %v1196_v28  ;;  %v839_v48 = vunpack.c.h.bf16 %v1090_v36  ;;  %v1096_v36 = vld [vmem:[%s1500_s0 + $0x88] sm:$0xff]  }
  0x1a   :  { %1117 = vst [vmem:[%s1502_s2 + $0x38] sm:$0xff] %v958_v22   ;;  %v231_v49 = vadd.f32 %v1198_v29, %v163_v23  ;;  %v294_v50 = vmax.f32 %v230_v35, 0.0  ;;  %v166_v51 = vmul.f32 %v838_v44, %v1196_v28  ;;  %v842_v52 = vunpack.c.l.bf16 %v1091_v42  ;;  %v1097_v44 = vld [vmem:[%s1500_s0 + $0x90] sm:$0xff]  }
  0x1b   :  { %v963_v54 = vpack.c.bf16 %v293_v45, %v292_v43  ;;  %v232_v55 = vadd.f32 %v1198_v29, %v164_v46  ;;  %v233_v56 = vadd.f32 %v1198_v29, %v165_v47  ;;  %v167_v57 = vmul.f32 %v839_v48, %v1196_v28 }
  0x1c   :  { %v295_v58 = vmax.f32 %v231_v49, 0.0  ;;  %v234_v59 = vadd.f32 %v1198_v29, %v166_v51  ;;  %v843_v60 = vunpack.c.h.bf16 %v1091_v42  ;;  %v168_v61 = vmul.f32 %v842_v52, %v1196_v28  ;;  %v1098_v49 = vld [vmem:[%s1500_s0 + $0x98] sm:$0xff]  }
  0x1d   :  { %1118 = vst [vmem:[%s1502_s2 + $0x40] sm:$0xff] %v963_v54   ;;  %v296_v62 = vmax.f32 %v232_v55, 0.0  ;;  %v297_v63 = vmax.f32 %v233_v56, 0.0  ;;  %v235_v0 = vadd.f32 %v1198_v29, %v167_v57  ;;  %v846_v1 = vunpack.c.l.bf16 %v1092_v53 }
  0x1e   :  { %v968_v3 = vpack.c.bf16 %v295_v58, %v294_v50  ;;  %v298_v4 = vmax.f32 %v234_v59, 0.0  ;;  %v169_v5 = vmul.f32 %v843_v60, %v1196_v28  ;;  %v236_v6 = vadd.f32 %v1198_v29, %v168_v61  ;;  %v1099_v58 = vld [vmem:[%s1500_s0 + $0xa0] sm:$0xff]  }
  0x1f   :  { %v973_v8 = vpack.c.bf16 %v297_v63, %v296_v62  ;;  %v299_v9 = vmax.f32 %v235_v0, 0.0  ;;  %v847_v10 = vunpack.c.h.bf16 %v1092_v53  ;;  %v170_v11 = vmul.f32 %v846_v1, %v1196_v28 }
  0x20   :  { %1119 = vst [vmem:[%s1502_s2 + $0x48] sm:$0xff] %v968_v3   ;;  %v237_v12 = vadd.f32 %v1198_v29, %v169_v5  ;;  %v300_v13 = vmax.f32 %v236_v6, 0.0  ;;  %v850_v14 = vunpack.c.l.bf16 %v1093_v2  ;;  %v851_v15 = vunpack.c.h.bf16 %v1093_v2 }
  0x21   :  { %1120 = vst [vmem:[%s1502_s2 + $0x50] sm:$0xff] %v973_v8   ;;  %v978_v17 = vpack.c.bf16 %v299_v9, %v298_v4  ;;  %v171_v18 = vmul.f32 %v847_v10, %v1196_v28  ;;  %v238_v19 = vadd.f32 %v1198_v29, %v170_v11  ;;  %v854_v20 = vunpack.c.l.bf16 %v1094_v7 }
  0x22   :  { %v301_v21 = vmax.f32 %v237_v12, 0.0  ;;  %v172_v24 = vmul.f32 %v850_v14, %v1196_v28  ;;  %v173_v25 = vmul.f32 %v851_v15, %v1196_v28  ;;  %v855_v26 = vunpack.c.h.bf16 %v1094_v7  ;;  %v1100_v7 = vld [vmem:[%s1500_s0 + $0xa8] sm:$0xff]  }
  0x23   :  { %1121 = vst [vmem:[%s1502_s2 + $0x58] sm:$0xff] %v978_v17   ;;  %v239_v27 = vadd.f32 %v1198_v29, %v171_v18  ;;  %v302_v30 = vmax.f32 %v238_v19, 0.0  ;;  %v174_v31 = vmul.f32 %v854_v20, %v1196_v28  ;;  %v858_v32 = vunpack.c.l.bf16 %v1095_v16  ;;  %v1101_v20 = vld [vmem:[%s1500_s0 + $0xb0] sm:$0xff]  }
  0x24   :  { %v983_v33 = vpack.c.bf16 %v301_v21, %v300_v13  ;;  %v240_v37 = vadd.f32 %v1198_v29, %v172_v24  ;;  %v241_v38 = vadd.f32 %v1198_v29, %v173_v25  ;;  %v175_v39 = vmul.f32 %v855_v26, %v1196_v28 }
  0x25   :  { %v303_v22 = vmax.f32 %v239_v27, 0.0  ;;  %v242_v34 = vadd.f32 %v1198_v29, %v174_v31  ;;  %v859_v40 = vunpack.c.h.bf16 %v1095_v16  ;;  %v176_v41 = vmul.f32 %v858_v32, %v1196_v28  ;;  %v1102_v27 = vld [vmem:[%s1500_s0 + $0xb8] sm:$0xff]  }
  0x26   :  { %1122 = vst [vmem:[%s1502_s2 + $0x60] sm:$0xff] %v983_v33   ;;  %v304_v42 = vmax.f32 %v240_v37, 0.0  ;;  %v305_v43 = vmax.f32 %v241_v38, 0.0  ;;  %v243_v23 = vadd.f32 %v1198_v29, %v175_v39  ;;  %v862_v35 = vunpack.c.l.bf16 %v1096_v36 }
  0x27   :  { %v988_v45 = vpack.c.bf16 %v303_v22, %v302_v30  ;;  %v306_v46 = vmax.f32 %v242_v34, 0.0  ;;  %v177_v47 = vmul.f32 %v859_v40, %v1196_v28  ;;  %v244_v48 = vadd.f32 %v1198_v29, %v176_v41  ;;  %v1103_v22 = vld [vmem:[%s1500_s0 + $0xc0] sm:$0xff]  }
  0x28   :  { %v993_v50 = vpack.c.bf16 %v305_v43, %v304_v42  ;;  %v307_v51 = vmax.f32 %v243_v23, 0.0  ;;  %v863_v52 = vunpack.c.h.bf16 %v1096_v36  ;;  %v178_v53 = vmul.f32 %v862_v35, %v1196_v28 }
  0x29   :  { %1123 = vst [vmem:[%s1502_s2 + $0x68] sm:$0xff] %v988_v45   ;;  %v245_v54 = vadd.f32 %v1198_v29, %v177_v47  ;;  %v308_v55 = vmax.f32 %v244_v48, 0.0  ;;  %v866_v56 = vunpack.c.l.bf16 %v1097_v44  ;;  %v867_v57 = vunpack.c.h.bf16 %v1097_v44 }
  0x2a   :  { %1124 = vst [vmem:[%s1502_s2 + $0x70] sm:$0xff] %v993_v50   ;;  %v998_v59 = vpack.c.bf16 %v307_v51, %v306_v46  ;;  %v179_v60 = vmul.f32 %v863_v52, %v1196_v28  ;;  %v246_v61 = vadd.f32 %v1198_v29, %v178_v53  ;;  %v870_v62 = vunpack.c.l.bf16 %v1098_v49 }
  0x2b   :  { %v309_v63 = vmax.f32 %v245_v54, 0.0  ;;  %v180_v0 = vmul.f32 %v866_v56, %v1196_v28  ;;  %v181_v1 = vmul.f32 %v867_v57, %v1196_v28  ;;  %v871_v2 = vunpack.c.h.bf16 %v1098_v49  ;;  %v1104_v49 = vld [vmem:[%s1500_s0 + $0xc8] sm:$0xff]  }
  0x2c   :  { %1125 = vst [vmem:[%s1502_s2 + $0x78] sm:$0xff] %v998_v59   ;;  %v247_v3 = vadd.f32 %v1198_v29, %v179_v60  ;;  %v310_v4 = vmax.f32 %v246_v61, 0.0  ;;  %v182_v5 = vmul.f32 %v870_v62, %v1196_v28  ;;  %v874_v6 = vunpack.c.l.bf16 %v1099_v58  ;;  %v1105_v62 = vld [vmem:[%s1500_s0 + $0xd0] sm:$0xff]  }
  0x2d   :  { %v1003_v8 = vpack.c.bf16 %v309_v63, %v308_v55  ;;  %v248_v9 = vadd.f32 %v1198_v29, %v180_v0  ;;  %v249_v10 = vadd.f32 %v1198_v29, %v181_v1  ;;  %v183_v11 = vmul.f32 %v871_v2, %v1196_v28 }
  0x2e   :  { %v311_v12 = vmax.f32 %v247_v3, 0.0  ;;  %v250_v13 = vadd.f32 %v1198_v29, %v182_v5  ;;  %v875_v14 = vunpack.c.h.bf16 %v1099_v58  ;;  %v184_v15 = vmul.f32 %v874_v6, %v1196_v28  ;;  %v1106_v3 = vld [vmem:[%s1500_s0 + $0xd8] sm:$0xff]  }
  0x2f   :  { %1126 = vst [vmem:[%s1502_s2 + $0x80] sm:$0xff] %v1003_v8   ;;  %v312_v16 = vmax.f32 %v248_v9, 0.0  ;;  %v313_v17 = vmax.f32 %v249_v10, 0.0  ;;  %v251_v18 = vadd.f32 %v1198_v29, %v183_v11  ;;  %v878_v19 = vunpack.c.l.bf16 %v1100_v7 }
  0x30   :  { %v1008_v21 = vpack.c.bf16 %v311_v12, %v310_v4  ;;  %v314_v24 = vmax.f32 %v250_v13, 0.0  ;;  %v185_v25 = vmul.f32 %v875_v14, %v1196_v28  ;;  %v252_v26 = vadd.f32 %v1198_v29, %v184_v15  ;;  %v1107_v12 = vld [vmem:[%s1500_s0 + $0xe0] sm:$0xff]  }
  0x31   :  { %v1013_v30 = vpack.c.bf16 %v313_v17, %v312_v16  ;;  %v315_v31 = vmax.f32 %v251_v18, 0.0  ;;  %v879_v32 = vunpack.c.h.bf16 %v1100_v7  ;;  %v186_v36 = vmul.f32 %v878_v19, %v1196_v28 }
  0x32   :  { %1127 = vst [vmem:[%s1502_s2 + $0x88] sm:$0xff] %v1008_v21   ;;  %v253_v33 = vadd.f32 %v1198_v29, %v185_v25  ;;  %v316_v37 = vmax.f32 %v252_v26, 0.0  ;;  %v882_v38 = vunpack.c.l.bf16 %v1101_v20  ;;  %v883_v39 = vunpack.c.h.bf16 %v1101_v20 }
  0x33   :  { %1128 = vst [vmem:[%s1502_s2 + $0x90] sm:$0xff] %v1013_v30   ;;  %v1018_v34 = vpack.c.bf16 %v315_v31, %v314_v24  ;;  %v187_v40 = vmul.f32 %v879_v32, %v1196_v28  ;;  %v254_v41 = vadd.f32 %v1198_v29, %v186_v36  ;;  %v886_v42 = vunpack.c.l.bf16 %v1102_v27 }
  0x34   :  { %v317_v43 = vmax.f32 %v253_v33, 0.0  ;;  %v188_v23 = vmul.f32 %v882_v38, %v1196_v28  ;;  %v189_v35 = vmul.f32 %v883_v39, %v1196_v28  ;;  %v887_v44 = vunpack.c.h.bf16 %v1102_v27  ;;  %v1108_v27 = vld [vmem:[%s1500_s0 + $0xe8] sm:$0xff]  }
  0x35   :  { %1129 = vst [vmem:[%s1502_s2 + $0x98] sm:$0xff] %v1018_v34   ;;  %v255_v45 = vadd.f32 %v1198_v29, %v187_v40  ;;  %v318_v46 = vmax.f32 %v254_v41, 0.0  ;;  %v190_v47 = vmul.f32 %v886_v42, %v1196_v28  ;;  %v890_v48 = vunpack.c.l.bf16 %v1103_v22  ;;  %v1109_v42 = vld [vmem:[%s1500_s0 + $0xf0] sm:$0xff]  }
  0x36   :  { %v1023_v50 = vpack.c.bf16 %v317_v43, %v316_v37  ;;  %v256_v51 = vadd.f32 %v1198_v29, %v188_v23  ;;  %v257_v52 = vadd.f32 %v1198_v29, %v189_v35  ;;  %v191_v53 = vmul.f32 %v887_v44, %v1196_v28 }
  0x37   :  { %v319_v54 = vmax.f32 %v255_v45, 0.0  ;;  %v258_v55 = vadd.f32 %v1198_v29, %v190_v47  ;;  %v891_v56 = vunpack.c.h.bf16 %v1103_v22  ;;  %v192_v57 = vmul.f32 %v890_v48, %v1196_v28  ;;  %v1110_v45 = vld [vmem:[%s1500_s0 + $0xf8] sm:$0xff]  }
  0x38   :  { %1130 = vst [vmem:[%s1502_s2 + $0xa0] sm:$0xff] %v1023_v50   ;;  %v320_v58 = vmax.f32 %v256_v51, 0.0  ;;  %v321_v59 = vmax.f32 %v257_v52, 0.0  ;;  %v259_v60 = vadd.f32 %v1198_v29, %v191_v53  ;;  %v894_v61 = vunpack.c.l.bf16 %v1104_v49 }
  0x39   :  { %v1028_v63 = vpack.c.bf16 %v319_v54, %v318_v46  ;;  %v322_v0 = vmax.f32 %v258_v55, 0.0  ;;  %v193_v1 = vmul.f32 %v891_v56, %v1196_v28  ;;  %v260_v2 = vadd.f32 %v1198_v29, %v192_v57 }
  0x3a   :  { %v1033_v4 = vpack.c.bf16 %v321_v59, %v320_v58  ;;  %v323_v5 = vmax.f32 %v259_v60, 0.0  ;;  %v895_v6 = vunpack.c.h.bf16 %v1104_v49  ;;  %v194_v7 = vmul.f32 %v894_v61, %v1196_v28 }
  0x3b   :  { %1131 = vst [vmem:[%s1502_s2 + $0xa8] sm:$0xff] %v1028_v63   ;;  %v261_v8 = vadd.f32 %v1198_v29, %v193_v1  ;;  %v324_v9 = vmax.f32 %v260_v2, 0.0  ;;  %v898_v10 = vunpack.c.l.bf16 %v1105_v62  ;;  %v899_v11 = vunpack.c.h.bf16 %v1105_v62 }
  0x3c   :  { %1132 = vst [vmem:[%s1502_s2 + $0xb0] sm:$0xff] %v1033_v4   ;;  %v1038_v13 = vpack.c.bf16 %v323_v5, %v322_v0  ;;  %v195_v14 = vmul.f32 %v895_v6, %v1196_v28  ;;  %v262_v15 = vadd.f32 %v1198_v29, %v194_v7  ;;  %v902_v16 = vunpack.c.l.bf16 %v1106_v3 }
  0x3d   :  { %v325_v17 = vmax.f32 %v261_v8, 0.0  ;;  %v196_v18 = vmul.f32 %v898_v10, %v1196_v28  ;;  %v197_v19 = vmul.f32 %v899_v11, %v1196_v28  ;;  %v903_v20 = vunpack.c.h.bf16 %v1106_v3 }
  0x3e   :  { %1133 = vst [vmem:[%s1502_s2 + $0xb8] sm:$0xff] %v1038_v13   ;;  %v263_v21 = vadd.f32 %v1198_v29, %v195_v14  ;;  %v326_v24 = vmax.f32 %v262_v15, 0.0  ;;  %v198_v25 = vmul.f32 %v902_v16, %v1196_v28  ;;  %v906_v26 = vunpack.c.l.bf16 %v1107_v12 }
  0x3f   :  { %v1043_v30 = vpack.c.bf16 %v325_v17, %v324_v9  ;;  %v264_v31 = vadd.f32 %v1198_v29, %v196_v18  ;;  %v265_v32 = vadd.f32 %v1198_v29, %v197_v19  ;;  %v199_v36 = vmul.f32 %v903_v20, %v1196_v28 }
  0x40   :  { %v327_v33 = vmax.f32 %v263_v21, 0.0  ;;  %v266_v37 = vadd.f32 %v1198_v29, %v198_v25  ;;  %v907_v38 = vunpack.c.h.bf16 %v1107_v12  ;;  %v200_v39 = vmul.f32 %v906_v26, %v1196_v28 }
  0x41   :  { %1134 = vst [vmem:[%s1502_s2 + $0xc0] sm:$0xff] %v1043_v30   ;;  %v328_v22 = vmax.f32 %v264_v31, 0.0  ;;  %v329_v34 = vmax.f32 %v265_v32, 0.0  ;;  %v267_v40 = vadd.f32 %v1198_v29, %v199_v36  ;;  %v910_v41 = vunpack.c.l.bf16 %v1108_v27 }
  0x42   :  { %v1048_v43 = vpack.c.bf16 %v327_v33, %v326_v24  ;;  %v330_v23 = vmax.f32 %v266_v37, 0.0  ;;  %v201_v35 = vmul.f32 %v907_v38, %v1196_v28  ;;  %v268_v44 = vadd.f32 %v1198_v29, %v200_v39 }
  0x43   :  { %v1053_v46 = vpack.c.bf16 %v329_v34, %v328_v22  ;;  %v331_v47 = vmax.f32 %v267_v40, 0.0  ;;  %v911_v48 = vunpack.c.h.bf16 %v1108_v27  ;;  %v202_v49 = vmul.f32 %v910_v41, %v1196_v28 }
  0x44   :  { %1135 = vst [vmem:[%s1502_s2 + $0xc8] sm:$0xff] %v1048_v43   ;;  %v269_v50 = vadd.f32 %v1198_v29, %v201_v35  ;;  %v332_v51 = vmax.f32 %v268_v44, 0.0  ;;  %v914_v52 = vunpack.c.l.bf16 %v1109_v42  ;;  %v915_v53 = vunpack.c.h.bf16 %v1109_v42 }
  0x45   :  { %1136 = vst [vmem:[%s1502_s2 + $0xd0] sm:$0xff] %v1053_v46   ;;  %v1058_v54 = vpack.c.bf16 %v331_v47, %v330_v23  ;;  %v203_v55 = vmul.f32 %v911_v48, %v1196_v28  ;;  %v270_v56 = vadd.f32 %v1198_v29, %v202_v49  ;;  %v918_v57 = vunpack.c.l.bf16 %v1110_v45 }
  0x46   :  { %v333_v58 = vmax.f32 %v269_v50, 0.0  ;;  %v204_v59 = vmul.f32 %v914_v52, %v1196_v28  ;;  %v205_v60 = vmul.f32 %v915_v53, %v1196_v28  ;;  %v919_v61 = vunpack.c.h.bf16 %v1110_v45 }
  0x47   :  { %1137 = vst [vmem:[%s1502_s2 + $0xd8] sm:$0xff] %v1058_v54   ;;  %v271_v62 = vadd.f32 %v1198_v29, %v203_v55  ;;  %v334_v63 = vmax.f32 %v270_v56, 0.0  ;;  %v206_v0 = vmul.f32 %v918_v57, %v1196_v28 }
  0x48   :  { %v1063_v1 = vpack.c.bf16 %v333_v58, %v332_v51  ;;  %v272_v2 = vadd.f32 %v1198_v29, %v204_v59  ;;  %v273_v3 = vadd.f32 %v1198_v29, %v205_v60  ;;  %v207_v4 = vmul.f32 %v919_v61, %v1196_v28 }
  0x49   :  { %v335_v5 = vmax.f32 %v271_v62, 0.0  ;;  %v274_v6 = vadd.f32 %v1198_v29, %v206_v0 }
  0x4a   :  { %1138 = vst [vmem:[%s1502_s2 + $0xe0] sm:$0xff] %v1063_v1   ;;  %v336_v7 = vmax.f32 %v272_v2, 0.0  ;;  %v337_v8 = vmax.f32 %v273_v3, 0.0  ;;  %v275_v9 = vadd.f32 %v1198_v29, %v207_v4 }
  0x4b   :  { %v1068_v10 = vpack.c.bf16 %v335_v5, %v334_v63  ;;  %v338_v11 = vmax.f32 %v274_v6, 0.0 }
  0x4c   :  { %v1073_v12 = vpack.c.bf16 %v337_v8, %v336_v7  ;;  %v339_v13 = vmax.f32 %v275_v9, 0.0 }
  0x4d   :  { %1139 = vst [vmem:[%s1502_s2 + $0xe8] sm:$0xff] %v1068_v10  }
  0x4e   :  { %1140 = vst [vmem:[%s1502_s2 + $0xf0] sm:$0xff] %v1073_v12   ;;  %v1078_v28 = vpack.c.bf16 %v339_v13, %v338_v11 }
  0x50   :  { %1141 = vst [vmem:[%s1502_s2 + $0xf8] sm:$0xff] %v1078_v28  }

// kernel: resnet_generator_forward.32
= control target key start
LH: loop header
LB: loop body
LE: loop exit
PB: predicated region body
PF: predicated region fallthrough
CT: control target
= control target key end

     0   :  { %v2230_v0 = vmov 0   ;;  %s2954_s1 = inlined_call_operand.vmem [shape: bf16[256,128], index: 1, kind: input, shape index: {}]   ;;  %s2955_s0 = inlined_call_operand.vmem [shape: bf16[512,256], index: 0, kind: input, shape index: {}]   ;;  %s2956_s2 = inlined_call_operand.vmem [shape: bf16[512,128], index: 2, kind: output, shape index: {0}]   ;;  %s2957_s3 = inlined_call_operand.vmem [shape: f32[8,128], index: 3, kind: output, shape index: {1}]   ;;  %s2958_s4 = inlined_call_operand.vmem [shape: f32[8,128], index: 4, kind: output, shape index: {2}]  }
   0x1   :  { %661 = vmatprep.subr.bf16.mxu0 %v2230_v0  ;;  %v2118_v1 = vld [vmem:[%s2954_s1 + $0x38] sm:$0xff]   ;;  %2084 = vmatprep.subr.bf16.mxu1 %v2230_v0  ;;  %v2119_v2 = vld [vmem:[%s2954_s1 + $0x30] sm:$0xff]   ;;  %v2120_v3 = vld [vmem:[%s2954_s1 + $0x28] sm:$0xff]  }
   0x2   :  { %662 = vmatpush1.bf16.msra.mxu0 %v2118_v1  ;;  %2100 = vmatpush1.bf16.msra.mxu1 %v2118_v1  ;;  %v2121_v4 = vld [vmem:[%s2954_s1 + $0x20] sm:$0xff]   ;;  %v2122_v5 = vld [vmem:[%s2954_s1 + $0x18] sm:$0xff]   ;;  %v2123_v7 = vld [vmem:[%s2954_s1 + $0x10] sm:$0xff]  }
   0x3   :  { %663 = vmatprep.subr.bf16.mxu0 %v2230_v0  ;;  %2085 = vmatprep.subr.bf16.mxu1 %v2230_v0  ;;  %v2136_v6 = vld [vmem:[%s2955_s0 + $0x4] ss:$8 sps:$4 sm:$0xff]   ;;  %v2126_v11 = vld [vmem:[%s2954_s1 + $0x78] sm:$0xff]   ;;  %v2127_v12 = vld [vmem:[%s2954_s1 + $0x70] sm:$0xff]  }
   0x4   :  { %693 = vmatprep.mubr.bf16.mxu0 %v2136_v6  ;;  %v2124_v8 = vld [vmem:[%s2954_s1 + $0x8] sm:$0xff]   ;;  %v2125_v9 = vld [vmem:[%s2954_s1] sm:$0xff]   ;;  %v2130_v15 = vld [vmem:[%s2954_s1 + $0x58] sm:$0xff]  }
   0x5   :  { %v2160_v10 = vld [vmem:[%s2955_s0 + $0x104] ss:$8 sps:$4 sm:$0xff]   ;;  %v2131_v16 = vld [vmem:[%s2954_s1 + $0x50] sm:$0xff]   ;;  %v2134_v19 = vld [vmem:[%s2955_s0] ss:$8 sps:$4 sm:$0xff]  }
   0x6   :  { %664 = vmatpush1.bf16.msra.mxu0 %v2119_v2  ;;  %2101 = vmatpush1.bf16.msra.mxu1 %v2119_v2  ;;  %v2128_v13 = vld [vmem:[%s2954_s1 + $0x68] sm:$0xff]   ;;  %v2129_v14 = vld [vmem:[%s2954_s1 + $0x60] sm:$0xff]   ;;  %v2137_v21 = vld [vmem:[%s2955_s0 + $0x14] ss:$8 sps:$4 sm:$0xff]  }
   0x7   :  { %665 = vmatprep.subr.bf16.mxu0 %v2230_v0  ;;  %2086 = vmatprep.subr.bf16.mxu1 %v2230_v0  ;;  %v2132_v17 = vld [vmem:[%s2954_s1 + $0x48] sm:$0xff]   ;;  %v2133_v18 = vld [vmem:[%s2954_s1 + $0x40] sm:$0xff]   ;;  %v2164_v22 = vld [vmem:[%s2955_s0 + $0x114] ss:$8 sps:$4 sm:$0xff]  }
   0x8   :  { %821 = vmatprep.mubr.bf16.mxu1 %v2160_v10  ;;  %v2158_v20 = vld [vmem:[%s2955_s0 + $0x100] ss:$8 sps:$4 sm:$0xff]   ;;  %v2139_v23 = vld [vmem:[%s2955_s0 + $0x10] ss:$8 sps:$4 sm:$0xff]   ;;  %v2140_v25 = vld [vmem:[%s2955_s0 + $0x24] ss:$8 sps:$4 sm:$0xff]  }
   0x9   :  { %v2166_v24 = vld [vmem:[%s2955_s0 + $0x110] ss:$8 sps:$4 sm:$0xff]   ;;  %v2170_v26 = vld [vmem:[%s2955_s0 + $0x124] ss:$8 sps:$4 sm:$0xff]   ;;  %v2142_v27 = vld [vmem:[%s2955_s0 + $0x20] ss:$8 sps:$4 sm:$0xff]  }
   0xa   :  { %666 = vmatpush1.bf16.msra.mxu0 %v2120_v3  ;;  %2102 = vmatpush1.bf16.msra.mxu1 %v2120_v3  ;;  %v2172_v28 = vld [vmem:[%s2955_s0 + $0x120] ss:$8 sps:$4 sm:$0xff]   ;;  %v2143_v29 = vld [vmem:[%s2955_s0 + $0x34] ss:$8 sps:$4 sm:$0xff]   ;;  %v2145_v31 = vld [vmem:[%s2955_s0 + $0x30] ss:$8 sps:$4 sm:$0xff]  }
   0xb   :  { %667 = vmatprep.subr.bf16.mxu0 %v2230_v0  ;;  %2087 = vmatprep.subr.bf16.mxu1 %v2230_v0  ;;  %v2176_v30 = vld [vmem:[%s2955_s0 + $0x134] ss:$8 sps:$4 sm:$0xff]   ;;  %v2178_v32 = vld [vmem:[%s2955_s0 + $0x130] ss:$8 sps:$4 sm:$0xff]   ;;  %v2146_v33 = vld [vmem:[%s2955_s0 + $0x44] ss:$8 sps:$4 sm:$0xff]  }
   0xc   :  { %v2182_v34 = vld [vmem:[%s2955_s0 + $0x144] ss:$8 sps:$4 sm:$0xff]   ;;  %v2148_v35 = vld [vmem:[%s2955_s0 + $0x40] ss:$8 sps:$4 sm:$0xff]   ;;  %v2149_v37 = vld [vmem:[%s2955_s0 + $0x54] ss:$8 sps:$4 sm:$0xff]  }
   0xd   :  { %v2184_v36 = vld [vmem:[%s2955_s0 + $0x140] ss:$8 sps:$4 sm:$0xff]   ;;  %v2188_v38 = vld [vmem:[%s2955_s0 + $0x154] ss:$8 sps:$4 sm:$0xff]   ;;  %v2151_v39 = vld [vmem:[%s2955_s0 + $0x50] ss:$8 sps:$4 sm:$0xff]  }
   0xe   :  { %668 = vmatpush1.bf16.msra.mxu0 %v2121_v4  ;;  %2103 = vmatpush1.bf16.msra.mxu1 %v2121_v4  ;;  %v2190_v40 = vld [vmem:[%s2955_s0 + $0x150] ss:$8 sps:$4 sm:$0xff]   ;;  %v2152_v41 = vld [vmem:[%s2955_s0 + $0x64] ss:$8 sps:$4 sm:$0xff]   ;;  %v2154_v43 = vld [vmem:[%s2955_s0 + $0x60] ss:$8 sps:$4 sm:$0xff]  }
   0xf   :  { %669 = vmatprep.subr.bf16.mxu0 %v2230_v0  ;;  %2088 = vmatprep.subr.bf16.mxu1 %v2230_v0  ;;  %v2194_v42 = vld [vmem:[%s2955_s0 + $0x164] ss:$8 sps:$4 sm:$0xff]   ;;  %v2196_v44 = vld [vmem:[%s2955_s0 + $0x160] ss:$8 sps:$4 sm:$0xff]   ;;  %v2155_v45 = vld [vmem:[%s2955_s0 + $0x74] ss:$8 sps:$4 sm:$0xff]  }
  0x10   :  { %v2200_v46 = vld [vmem:[%s2955_s0 + $0x174] ss:$8 sps:$4 sm:$0xff]   ;;  %v2157_v47 = vld [vmem:[%s2955_s0 + $0x70] ss:$8 sps:$4 sm:$0xff]   ;;  %v2161_v49 = vld [vmem:[%s2955_s0 + $0x84] ss:$8 sps:$4 sm:$0xff]  }
  0x11   :  { %v2202_v48 = vld [vmem:[%s2955_s0 + $0x170] ss:$8 sps:$4 sm:$0xff]   ;;  %v2206_v50 = vld [vmem:[%s2955_s0 + $0x184] ss:$8 sps:$4 sm:$0xff]   ;;  %v2163_v51 = vld [vmem:[%s2955_s0 + $0x80] ss:$8 sps:$4 sm:$0xff]  }
  0x12   :  { %670 = vmatpush1.bf16.msra.mxu0 %v2122_v5  ;;  %2104 = vmatpush1.bf16.msra.mxu1 %v2122_v5  ;;  %v2208_v52 = vld [vmem:[%s2955_s0 + $0x180] ss:$8 sps:$4 sm:$0xff]   ;;  %v2167_v53 = vld [vmem:[%s2955_s0 + $0x94] ss:$8 sps:$4 sm:$0xff]   ;;  %v2169_v55 = vld [vmem:[%s2955_s0 + $0x90] ss:$8 sps:$4 sm:$0xff]  }
  0x13   :  { %671 = vmatprep.subr.bf16.mxu0 %v2230_v0  ;;  %2089 = vmatprep.subr.bf16.mxu1 %v2230_v0  ;;  %v2209_v54 = vld [vmem:[%s2955_s0 + $0x194] ss:$8 sps:$4 sm:$0xff]   ;;  %v2211_v56 = vld [vmem:[%s2955_s0 + $0x190] ss:$8 sps:$4 sm:$0xff]   ;;  %v2173_v57 = vld [vmem:[%s2955_s0 + $0xa4] ss:$8 sps:$4 sm:$0xff]  }
  0x14   :  { %v2212_v58 = vld [vmem:[%s2955_s0 + $0x1a4] ss:$8 sps:$4 sm:$0xff]   ;;  %v2175_v59 = vld [vmem:[%s2955_s0 + $0xa0] ss:$8 sps:$4 sm:$0xff]   ;;  %v2179_v61 = vld [vmem:[%s2955_s0 + $0xb4] ss:$8 sps:$4 sm:$0xff]  }
  0x15   :  { %v2214_v60 = vld [vmem:[%s2955_s0 + $0x1a0] ss:$8 sps:$4 sm:$0xff]   ;;  %v2215_v62 = vld [vmem:[%s2955_s0 + $0x1b4] ss:$8 sps:$4 sm:$0xff]   ;;  %v2181_v63 = vld [vmem:[%s2955_s0 + $0xb0] ss:$8 sps:$4 sm:$0xff]  }
  0x16   :  { %672 = vmatpush1.bf16.msra.mxu0 %v2123_v7  ;;  %2105 = vmatpush1.bf16.msra.mxu1 %v2123_v7  ;;  %v2185_v1 = vld [vmem:[%s2955_s0 + $0xc4] ss:$8 sps:$4 sm:$0xff]   ;;  %v2187_v3 = vld [vmem:[%s2955_s0 + $0xc0] ss:$8 sps:$4 sm:$0xff]   ;;  %v2191_v5 = vld [vmem:[%s2955_s0 + $0xd4] ss:$8 sps:$4 sm:$0xff]  }
  0x17   :  { %673 = vmatprep.subr.bf16.mxu0 %v2230_v0  ;;  %2090 = vmatprep.subr.bf16.mxu1 %v2230_v0  ;;  %v2218_v2 = vld [vmem:[%s2955_s0 + $0x1c4] ss:$8 sps:$4 sm:$0xff]   ;;  %v2220_v4 = vld [vmem:[%s2955_s0 + $0x1c0] ss:$8 sps:$4 sm:$0xff]   ;;  %v2221_v6 = vld [vmem:[%s2955_s0 + $0x1d4] ss:$8 sps:$4 sm:$0xff]  }
  0x18   :  { %v2193_v7 = vld [vmem:[%s2955_s0 + $0xd0] ss:$8 sps:$4 sm:$0xff]   ;;  %v2224_v10 = vld [vmem:[%s2955_s0 + $0x1e4] ss:$8 sps:$4 sm:$0xff]  }
  0x1a   :  { %674 = vmatpush1.bf16.msra.mxu0 %v2124_v8  ;;  %2106 = vmatpush1.bf16.msra.mxu1 %v2124_v8  ;;  %v2223_v8 = vld [vmem:[%s2955_s0 + $0x1d0] ss:$8 sps:$4 sm:$0xff]  }
  0x1b   :  { %675 = vmatprep.subr.bf16.mxu0 %v2230_v0  ;;  %2091 = vmatprep.subr.bf16.mxu1 %v2230_v0 }
  0x1e   :  { %676 = vmatpush1.bf16.msra.mxu0 %v2125_v9  ;;  %2107 = vmatpush1.bf16.msra.mxu1 %v2125_v9  ;;  %v2197_v9 = vld [vmem:[%s2955_s0 + $0xe4] ss:$8 sps:$4 sm:$0xff]  }
  0x1f   :  { %677 = vmatprep.subr.bf16.mxu0 %v2230_v0  ;;  %2092 = vmatprep.subr.bf16.mxu1 %v2230_v0 }
  0x22   :  { %678 = vmatpush2.bf16.msra.mxu0 %v2126_v11  ;;  %2108 = vmatpush2.bf16.msra.mxu1 %v2126_v11  ;;  %v2199_v11 = vld [vmem:[%s2955_s0 + $0xe0] ss:$8 sps:$4 sm:$0xff]  }
  0x23   :  { %679 = vmatprep.subr.bf16.mxu0 %v2230_v0  ;;  %2093 = vmatprep.subr.bf16.mxu1 %v2230_v0 }
  0x26   :  { %680 = vmatpush2.bf16.msra.mxu0 %v2127_v12  ;;  %2109 = vmatpush2.bf16.msra.mxu1 %v2127_v12  ;;  %v2226_v12 = vld [vmem:[%s2955_s0 + $0x1e0] ss:$8 sps:$4 sm:$0xff]  }
  0x27   :  { %681 = vmatprep.subr.bf16.mxu0 %v2230_v0  ;;  %2094 = vmatprep.subr.bf16.mxu1 %v2230_v0 }
  0x2a   :  { %682 = vmatpush2.bf16.msra.mxu0 %v2128_v13  ;;  %2110 = vmatpush2.bf16.msra.mxu1 %v2128_v13  ;;  %v2203_v13 = vld [vmem:[%s2955_s0 + $0xf4] ss:$8 sps:$4 sm:$0xff]  }
  0x2b   :  { %683 = vmatprep.subr.bf16.mxu0 %v2230_v0  ;;  %2095 = vmatprep.subr.bf16.mxu1 %v2230_v0 }
  0x2e   :  { %684 = vmatpush2.bf16.msra.mxu0 %v2129_v14  ;;  %2111 = vmatpush2.bf16.msra.mxu1 %v2129_v14  ;;  %v2227_v14 = vld [vmem:[%s2955_s0 + $0x1f4] ss:$8 sps:$4 sm:$0xff]  }
  0x2f   :  { %685 = vmatprep.subr.bf16.mxu0 %v2230_v0  ;;  %2096 = vmatprep.subr.bf16.mxu1 %v2230_v0 }
  0x32   :  { %686 = vmatpush2.bf16.msra.mxu0 %v2130_v15  ;;  %2112 = vmatpush2.bf16.msra.mxu1 %v2130_v15  ;;  %v2205_v15 = vld [vmem:[%s2955_s0 + $0xf0] ss:$8 sps:$4 sm:$0xff]  }
  0x33   :  { %687 = vmatprep.subr.bf16.mxu0 %v2230_v0  ;;  %2097 = vmatprep.subr.bf16.mxu1 %v2230_v0 }
  0x36   :  { %688 = vmatpush2.bf16.msra.mxu0 %v2131_v16  ;;  %2113 = vmatpush2.bf16.msra.mxu1 %v2131_v16  ;;  %v2229_v16 = vld [vmem:[%s2955_s0 + $0x1f0] ss:$8 sps:$4 sm:$0xff]  }
  0x37   :  { %689 = vmatprep.subr.bf16.mxu0 %v2230_v0  ;;  %2098 = vmatprep.subr.bf16.mxu1 %v2230_v0 }
  0x3a   :  { %690 = vmatpush2.bf16.msra.mxu0 %v2132_v17  ;;  %2114 = vmatpush2.bf16.msra.mxu1 %v2132_v17 }
  0x3b   :  { %691 = vmatprep.subr.bf16.mxu0 %v2230_v0  ;;  %2099 = vmatprep.subr.bf16.mxu1 %v2230_v0  ;;  %v2217_v0 = vld [vmem:[%s2955_s0 + $0x1b0] ss:$8 sps:$4 sm:$0xff]  }
  0x3e   :  { %692 = vmatpush2.bf16.msra.mxu0 %v2133_v18  ;;  %2115 = vmatpush2.bf16.msra.mxu1 %v2133_v18 }
  0x41   :  { %694 = vmatmul.mubr.bf16.vlgmr.msra.gmra.mxu0 %v2134_v19  ;;  %822 = vmatmul.mubr.bf16.vlgmr.msra.gmra.mxu1 %v2158_v20 }
  0x42   :  { %701 = vmatprep.mubr.bf16.mxu0 %v2137_v21  ;;  %829 = vmatprep.mubr.bf16.mxu1 %v2164_v22 }
  0x49   :  { %702 = vmatmul.mubr.bf16.gmra.mxu0 %v2139_v23  ;;  %830 = vmatmul.mubr.bf16.gmra.mxu1 %v2166_v24 }
  0x4a   :  { %709 = vmatprep.mubr.bf16.mxu0 %v2140_v25  ;;  %837 = vmatprep.mubr.bf16.mxu1 %v2170_v26 }
  0x51   :  { %710 = vmatmul.mubr.bf16.gmra.mxu0 %v2142_v27  ;;  %838 = vmatmul.mubr.bf16.gmra.mxu1 %v2172_v28 }
  0x52   :  { %717 = vmatprep.mubr.bf16.mxu0 %v2143_v29  ;;  %845 = vmatprep.mubr.bf16.mxu1 %v2176_v30 }
  0x59   :  { %718 = vmatmul.mubr.bf16.gmra.mxu0 %v2145_v31  ;;  %846 = vmatmul.mubr.bf16.gmra.mxu1 %v2178_v32 }
  0x5a   :  { %725 = vmatprep.mubr.bf16.mxu0 %v2146_v33  ;;  %853 = vmatprep.mubr.bf16.mxu1 %v2182_v34 }
  0x61   :  { %726 = vmatmul.mubr.bf16.gmra.mxu0 %v2148_v35  ;;  %854 = vmatmul.mubr.bf16.gmra.mxu1 %v2184_v36 }
  0x62   :  { %733 = vmatprep.mubr.bf16.mxu0 %v2149_v37  ;;  %861 = vmatprep.mubr.bf16.mxu1 %v2188_v38 }
  0x69   :  { %734 = vmatmul.mubr.bf16.gmra.mxu0 %v2151_v39  ;;  %862 = vmatmul.mubr.bf16.gmra.mxu1 %v2190_v40 }
  0x6a   :  { %741 = vmatprep.mubr.bf16.mxu0 %v2152_v41  ;;  %869 = vmatprep.mubr.bf16.mxu1 %v2194_v42 }
  0x71   :  { %742 = vmatmul.mubr.bf16.gmra.mxu0 %v2154_v43  ;;  %870 = vmatmul.mubr.bf16.gmra.mxu1 %v2196_v44 }
  0x72   :  { %749 = vmatprep.mubr.bf16.mxu0 %v2155_v45  ;;  %877 = vmatprep.mubr.bf16.mxu1 %v2200_v46 }
  0x79   :  { %750 = vmatmul.mubr.bf16.gmra.mxu0 %v2157_v47  ;;  %878 = vmatmul.mubr.bf16.gmra.mxu1 %v2202_v48 }
  0x7a   :  { %757 = vmatprep.mubr.bf16.mxu0 %v2161_v49  ;;  %885 = vmatprep.mubr.bf16.mxu1 %v2206_v50 }
  0x81   :  { %758 = vmatmul.mubr.bf16.gmra.mxu0 %v2163_v51  ;;  %886 = vmatmul.mubr.bf16.gmra.mxu1 %v2208_v52 }
  0x82   :  { %765 = vmatprep.mubr.bf16.mxu0 %v2167_v53  ;;  %893 = vmatprep.mubr.bf16.mxu1 %v2209_v54 }
  0x89   :  { %766 = vmatmul.mubr.bf16.gmra.mxu0 %v2169_v55  ;;  %894 = vmatmul.mubr.bf16.gmra.mxu1 %v2211_v56 }
  0x8a   :  { %773 = vmatprep.mubr.bf16.mxu0 %v2173_v57  ;;  %901 = vmatprep.mubr.bf16.mxu1 %v2212_v58 }
  0x91   :  { %774 = vmatmul.mubr.bf16.gmra.mxu0 %v2175_v59  ;;  %902 = vmatmul.mubr.bf16.gmra.mxu1 %v2214_v60 }
  0x92   :  { %781 = vmatprep.mubr.bf16.mxu0 %v2179_v61  ;;  %909 = vmatprep.mubr.bf16.mxu1 %v2215_v62 }
  0x99   :  { %782 = vmatmul.mubr.bf16.gmra.mxu0 %v2181_v63  ;;  %910 = vmatmul.mubr.bf16.gmra.mxu1 %v2217_v0 }
  0x9a   :  { %789 = vmatprep.mubr.bf16.mxu0 %v2185_v1  ;;  %917 = vmatprep.mubr.bf16.mxu1 %v2218_v2 }
  0xa1   :  { %790 = vmatmul.mubr.bf16.gmra.mxu0 %v2187_v3  ;;  %918 = vmatmul.mubr.bf16.gmra.mxu1 %v2220_v4 }
  0xa2   :  { %797 = vmatprep.mubr.bf16.mxu0 %v2191_v5  ;;  %925 = vmatprep.mubr.bf16.mxu1 %v2221_v6 }
  0xa9   :  { %798 = vmatmul.mubr.bf16.gmra.mxu0 %v2193_v7  ;;  %926 = vmatmul.mubr.bf16.gmra.mxu1 %v2223_v8 }
  0xaa   :  { %805 = vmatprep.mubr.bf16.mxu0 %v2197_v9  ;;  %933 = vmatprep.mubr.bf16.mxu1 %v2224_v10 }
  0xb1   :  { %806 = vmatmul.mubr.bf16.gmra.mxu0 %v2199_v11  ;;  %934 = vmatmul.mubr.bf16.gmra.mxu1 %v2226_v12 }
  0xb2   :  { %813 = vmatprep.mubr.bf16.mxu0 %v2203_v13  ;;  %941 = vmatprep.mubr.bf16.mxu1 %v2227_v14 }
  0xb9   :  { %814 = vmatmul.mubr.bf16.gmra.mxu0 %v2205_v15  ;;  %942 = vmatmul.mubr.bf16.gmra.mxu1 %v2229_v16 }
 0x101   :  { %v2528_v17 = vpop.f32.mrf.mxu0  ;;  %v2530_v18 = vpop.f32.mrf.mxu1 }
 0x103   :  { %v697_v19 = vpop.f32.mrf.mxu0  ;;  %v825_v20 = vpop.f32.mrf.mxu1 }
 0x105   :  { %v2532_v21 = vpop.f32.mrf.mxu0  ;;  %v2534_v22 = vpop.f32.mrf.mxu1 }
 0x106   :  { %v1896_v23 = vpack.c.bf16 %v2532_v21, %v2528_v17  ;;  %v1976_v24 = vpack.c.bf16 %v2534_v22, %v2530_v18 }
 0x107   :  { %v700_v25 = vpop.f32.mrf.mxu0  ;;  %v828_v26 = vpop.f32.mrf.mxu1 }
 0x108   :  { %1897 = vst [vmem:[%s2956_s2] sm:$0xff] %v1896_v23   ;;  %2068 = vst [vmem:[%s2956_s2 + $0x80] sm:$0xff] %v1976_v24  }
 0x109   :  { %v2546_v27 = vpop.f32.mrf.mxu0  ;;  %v2548_v28 = vpop.f32.mrf.mxu1 }
 0x10b   :  { %v705_v29 = vpop.f32.mrf.mxu0  ;;  %v833_v30 = vpop.f32.mrf.mxu1 }
 0x10d   :  { %v2550_v31 = vpop.f32.mrf.mxu0  ;;  %v2552_v32 = vpop.f32.mrf.mxu1 }
 0x10e   :  { %v1901_v33 = vpack.c.bf16 %v2550_v31, %v2546_v27  ;;  %v1981_v34 = vpack.c.bf16 %v2552_v32, %v2548_v28 }
 0x10f   :  { %v708_v35 = vpop.f32.mrf.mxu0  ;;  %v836_v36 = vpop.f32.mrf.mxu1 }
 0x110   :  { %2053 = vst [vmem:[%s2956_s2 + $0x8] sm:$0xff] %v1901_v33   ;;  %2069 = vst [vmem:[%s2956_s2 + $0x88] sm:$0xff] %v1981_v34  }
 0x111   :  { %v2564_v37 = vpop.f32.mrf.mxu0  ;;  %v2566_v38 = vpop.f32.mrf.mxu1 }
 0x113   :  { %v713_v39 = vpop.f32.mrf.mxu0  ;;  %v841_v40 = vpop.f32.mrf.mxu1 }
 0x115   :  { %v2568_v41 = vpop.f32.mrf.mxu0  ;;  %v2570_v42 = vpop.f32.mrf.mxu1 }
 0x116   :  { %v1906_v43 = vpack.c.bf16 %v2568_v41, %v2564_v37  ;;  %v1986_v44 = vpack.c.bf16 %v2570_v42, %v2566_v38 }
 0x117   :  { %v716_v45 = vpop.f32.mrf.mxu0  ;;  %v844_v46 = vpop.f32.mrf.mxu1 }
 0x118   :  { %2054 = vst [vmem:[%s2956_s2 + $0x10] sm:$0xff] %v1906_v43   ;;  %2070 = vst [vmem:[%s2956_s2 + $0x90] sm:$0xff] %v1986_v44   ;;  %v1539_v43 = vmul.f32 %v2532_v21, %v2532_v21  ;;  %v1538_v46 = vmul.f32 %v2528_v17, %v2528_v17 }
 0x119   :  { %v2582_v47 = vpop.f32.mrf.mxu0  ;;  %v2584_v48 = vpop.f32.mrf.mxu1 }
 0x11b   :  { %v721_v49 = vpop.f32.mrf.mxu0  ;;  %v849_v50 = vpop.f32.mrf.mxu1 }
 0x11c   :  { %v1540_v49 = vmul.f32 %v2546_v27, %v2546_v27 }
 0x11d   :  { %v2586_v51 = vpop.f32.mrf.mxu0  ;;  %v2588_v52 = vpop.f32.mrf.mxu1 }
 0x11e   :  { %v1911_v53 = vpack.c.bf16 %v2586_v51, %v2582_v47  ;;  %v1991_v54 = vpack.c.bf16 %v2588_v52, %v2584_v48 }
 0x11f   :  { %v724_v55 = vpop.f32.mrf.mxu0  ;;  %v852_v56 = vpop.f32.mrf.mxu1 }
 0x120   :  { %2055 = vst [vmem:[%s2956_s2 + $0x18] sm:$0xff] %v1911_v53   ;;  %2071 = vst [vmem:[%s2956_s2 + $0x98] sm:$0xff] %v1991_v54   ;;  %v1466_v54 = vadd.f32 %v2532_v21, %v2528_v17  ;;  %v1602_v55 = vadd.f32 %v1539_v43, %v1538_v46  ;;  %v1541_v56 = vmul.f32 %v2550_v31, %v2550_v31 }
 0x121   :  { %v2600_v57 = vpop.f32.mrf.mxu0  ;;  %v2602_v58 = vpop.f32.mrf.mxu1 }
 0x123   :  { %v729_v59 = vpop.f32.mrf.mxu0  ;;  %v857_v60 = vpop.f32.mrf.mxu1 }
 0x125   :  { %v2604_v61 = vpop.f32.mrf.mxu0  ;;  %v2606_v62 = vpop.f32.mrf.mxu1 }
 0x126   :  { %v1916_v63 = vpack.c.bf16 %v2604_v61, %v2600_v57  ;;  %v1996_v0 = vpack.c.bf16 %v2606_v62, %v2602_v58 }
 0x127   :  { %v732_v1 = vpop.f32.mrf.mxu0  ;;  %v860_v2 = vpop.f32.mrf.mxu1 }
 0x128   :  { %2056 = vst [vmem:[%s2956_s2 + $0x20] sm:$0xff] %v1916_v63   ;;  %2072 = vst [vmem:[%s2956_s2 + $0xa0] sm:$0xff] %v1996_v0   ;;  %v1467_v63 = vadd.f32 %v1466_v54, %v2546_v27  ;;  %v1603_v0 = vadd.f32 %v1602_v55, %v1540_v49  ;;  %v1542_v1 = vmul.f32 %v2564_v37, %v2564_v37 }
 0x129   :  { %v2618_v3 = vpop.f32.mrf.mxu0  ;;  %v2620_v4 = vpop.f32.mrf.mxu1  ;;  %v1543_v27 = vmul.f32 %v2568_v41, %v2568_v41 }
 0x12b   :  { %v737_v5 = vpop.f32.mrf.mxu0  ;;  %v865_v6 = vpop.f32.mrf.mxu1 }
 0x12c   :  { %v1468_v6 = vadd.f32 %v1467_v63, %v2550_v31 }
 0x12d   :  { %v2622_v7 = vpop.f32.mrf.mxu0  ;;  %v2624_v8 = vpop.f32.mrf.mxu1 }
 0x12e   :  { %v1921_v9 = vpack.c.bf16 %v2622_v7, %v2618_v3  ;;  %v2001_v10 = vpack.c.bf16 %v2624_v8, %v2620_v4 }
 0x12f   :  { %v740_v11 = vpop.f32.mrf.mxu0  ;;  %v868_v12 = vpop.f32.mrf.mxu1 }
 0x130   :  { %2057 = vst [vmem:[%s2956_s2 + $0x28] sm:$0xff] %v1921_v9   ;;  %2073 = vst [vmem:[%s2956_s2 + $0xa8] sm:$0xff] %v2001_v10   ;;  %v1604_v9 = vadd.f32 %v1603_v0, %v1541_v56  ;;  %v1469_v12 = vadd.f32 %v1468_v6, %v2564_v37  ;;  %v1545_v37 = vmul.f32 %v2586_v51, %v2586_v51 }
 0x131   :  { %v2636_v13 = vpop.f32.mrf.mxu0  ;;  %v2638_v14 = vpop.f32.mrf.mxu1 }
 0x132   :  { %v1605_v31 = vadd.f32 %v1604_v9, %v1542_v1 }
 0x133   :  { %v745_v15 = vpop.f32.mrf.mxu0  ;;  %v873_v16 = vpop.f32.mrf.mxu1 }
 0x134   :  { %v1544_v15 = vmul.f32 %v2582_v47, %v2582_v47 }
 0x135   :  { %v2640_v19 = vpop.f32.mrf.mxu0  ;;  %v2642_v20 = vpop.f32.mrf.mxu1 }
 0x136   :  { %v1926_v23 = vpack.c.bf16 %v2640_v19, %v2636_v13  ;;  %v2006_v24 = vpack.c.bf16 %v2642_v20, %v2638_v14 }
 0x137   :  { %v748_v25 = vpop.f32.mrf.mxu0  ;;  %v876_v26 = vpop.f32.mrf.mxu1 }
 0x138   :  { %2058 = vst [vmem:[%s2956_s2 + $0x30] sm:$0xff] %v1926_v23   ;;  %2074 = vst [vmem:[%s2956_s2 + $0xb0] sm:$0xff] %v2006_v24   ;;  %v1470_v24 = vadd.f32 %v1469_v12, %v2568_v41  ;;  %v1606_v25 = vadd.f32 %v1605_v31, %v1543_v27  ;;  %v1550_v27 = vmul.f32 %v2636_v13, %v2636_v13 }
 0x139   :  { %v2654_v29 = vpop.f32.mrf.mxu0  ;;  %v2656_v30 = vpop.f32.mrf.mxu1 }
 0x13b   :  { %v753_v33 = vpop.f32.mrf.mxu0  ;;  %v881_v34 = vpop.f32.mrf.mxu1 }
 0x13c   :  { %v1471_v34 = vadd.f32 %v1470_v24, %v2582_v47  ;;  %v1547_v47 = vmul.f32 %v2604_v61, %v2604_v61 }
 0x13d   :  { %v2658_v35 = vpop.f32.mrf.mxu0  ;;  %v2660_v36 = vpop.f32.mrf.mxu1 }
 0x13e   :  { %v1931_v39 = vpack.c.bf16 %v2658_v35, %v2654_v29  ;;  %v2011_v40 = vpack.c.bf16 %v2660_v36, %v2656_v30 }
 0x13f   :  { %v756_v44 = vpop.f32.mrf.mxu0  ;;  %v884_v45 = vpop.f32.mrf.mxu1 }
 0x140   :  { %2059 = vst [vmem:[%s2956_s2 + $0x38] sm:$0xff] %v1931_v39   ;;  %2075 = vst [vmem:[%s2956_s2 + $0xb8] sm:$0xff] %v2011_v40   ;;  %v1607_v39 = vadd.f32 %v1606_v25, %v1544_v15  ;;  %v1546_v40 = vmul.f32 %v2600_v57, %v2600_v57  ;;  %v1472_v45 = vadd.f32 %v1471_v34, %v2586_v51 }
 0x141   :  { %v2678_v50 = vpop.f32.mrf.mxu0  ;;  %v2680_v53 = vpop.f32.mrf.mxu1 }
 0x142   :  { %v1608_v49 = vadd.f32 %v1607_v39, %v1545_v37  ;;  %v1473_v56 = vadd.f32 %v1472_v45, %v2600_v57  ;;  %v1549_v57 = vmul.f32 %v2622_v7, %v2622_v7 }
 0x143   :  { %v761_v59 = vpop.f32.mrf.mxu0  ;;  %v889_v60 = vpop.f32.mrf.mxu1 }
 0x144   :  { %v1609_v51 = vadd.f32 %v1608_v49, %v1546_v40  ;;  %v1548_v59 = vmul.f32 %v2618_v3, %v2618_v3  ;;  %v1474_v0 = vadd.f32 %v1473_v56, %v2604_v61 }
 0x145   :  { %v2689_v2 = vpop.f32.mrf.mxu0  ;;  %v2691_v5 = vpop.f32.mrf.mxu1 }
 0x146   :  { %v1936_v17 = vpack.c.bf16 %v2689_v2, %v2678_v50  ;;  %v2016_v21 = vpack.c.bf16 %v2691_v5, %v2680_v53  ;;  %v1610_v1 = vadd.f32 %v1609_v51, %v1547_v47  ;;  %v1554_v47 = vmul.f32 %v2678_v50, %v2678_v50 }
 0x147   :  { %v764_v10 = vpop.f32.mrf.mxu0  ;;  %v892_v11 = vpop.f32.mrf.mxu1 }
 0x148   :  { %2060 = vst [vmem:[%s2956_s2 + $0x40] sm:$0xff] %v1936_v17   ;;  %2076 = vst [vmem:[%s2956_s2 + $0xc0] sm:$0xff] %v2016_v21   ;;  %v1475_v21 = vadd.f32 %v1474_v0, %v2618_v3  ;;  %v1611_v9 = vadd.f32 %v1610_v1, %v1548_v59  ;;  %v1551_v3 = vmul.f32 %v2640_v19, %v2640_v19 }
 0x149   :  { %v2709_v16 = vpop.f32.mrf.mxu0  ;;  %v2711_v23 = vpop.f32.mrf.mxu1  ;;  %v1555_v0 = vmul.f32 %v2689_v2, %v2689_v2 }
 0x14a   :  { %v1476_v12 = vadd.f32 %v1475_v21, %v2622_v7  ;;  %v1612_v15 = vadd.f32 %v1611_v9, %v1549_v57 }
 0x14b   :  { %v769_v26 = vpop.f32.mrf.mxu0  ;;  %v897_v33 = vpop.f32.mrf.mxu1 }
 0x14c   :  { %v1477_v37 = vadd.f32 %v1476_v12, %v2636_v13  ;;  %v1613_v7 = vadd.f32 %v1612_v15, %v1550_v27  ;;  %v1552_v26 = vmul.f32 %v2654_v29, %v2654_v29  ;;  %v1553_v13 = vmul.f32 %v2658_v35, %v2658_v35 }
 0x14d   :  { %v2719_v43 = vpop.f32.mrf.mxu0  ;;  %v2721_v44 = vpop.f32.mrf.mxu1 }
 0x14e   :  { %v1941_v41 = vpack.c.bf16 %v2719_v43, %v2709_v16  ;;  %v2021_v46 = vpack.c.bf16 %v2721_v44, %v2711_v23  ;;  %v1478_v39 = vadd.f32 %v1477_v37, %v2640_v19  ;;  %v1614_v40 = vadd.f32 %v1613_v7, %v1551_v3 }
 0x14f   :  { %v772_v54 = vpop.f32.mrf.mxu0  ;;  %v900_v55 = vpop.f32.mrf.mxu1 }
 0x150   :  { %2061 = vst [vmem:[%s2956_s2 + $0x48] sm:$0xff] %v1941_v41   ;;  %2077 = vst [vmem:[%s2956_s2 + $0xc8] sm:$0xff] %v2021_v46   ;;  %v1479_v46 = vadd.f32 %v1478_v39, %v2654_v29  ;;  %v1615_v49 = vadd.f32 %v1614_v40, %v1552_v26 }
 0x151   :  { %v2739_v60 = vpop.f32.mrf.mxu0  ;;  %v2741_v63 = vpop.f32.mrf.mxu1 }
 0x152   :  { %v1480_v56 = vadd.f32 %v1479_v46, %v2658_v35  ;;  %v1616_v59 = vadd.f32 %v1615_v49, %v1553_v13  ;;  %v1558_v3 = vmul.f32 %v2739_v60, %v2739_v60 }
 0x153   :  { %v777_v6 = vpop.f32.mrf.mxu0  ;;  %v905_v17 = vpop.f32.mrf.mxu1 }
 0x154   :  { %v1481_v29 = vadd.f32 %v1480_v56, %v2678_v50  ;;  %v1617_v35 = vadd.f32 %v1616_v59, %v1554_v47  ;;  %v1556_v6 = vmul.f32 %v2709_v16, %v2709_v16  ;;  %v1557_v50 = vmul.f32 %v2719_v43, %v2719_v43 }
 0x155   :  { %v2749_v10 = vpop.f32.mrf.mxu0  ;;  %v2751_v11 = vpop.f32.mrf.mxu1 }
 0x156   :  { %v1946_v61 = vpack.c.bf16 %v2749_v10, %v2739_v60  ;;  %v2026_v31 = vpack.c.bf16 %v2751_v11, %v2741_v63  ;;  %v1482_v9 = vadd.f32 %v1481_v29, %v2689_v2  ;;  %v1618_v27 = vadd.f32 %v1617_v35, %v1555_v0 }
 0x157   :  { %v780_v24 = vpop.f32.mrf.mxu0  ;;  %v908_v25 = vpop.f32.mrf.mxu1  ;;  %v1559_v39 = vmul.f32 %v2749_v10, %v2749_v10 }
 0x158   :  { %2062 = vst [vmem:[%s2956_s2 + $0x50] sm:$0xff] %v1946_v61   ;;  %2078 = vst [vmem:[%s2956_s2 + $0xd0] sm:$0xff] %v2026_v31   ;;  %v1483_v31 = vadd.f32 %v1482_v9, %v2709_v16  ;;  %v1619_v15 = vadd.f32 %v1618_v27, %v1556_v6 }
 0x159   :  { %v783_v33 = vpop.f32.mrf.mxu0  ;;  %v2769_v34 = vpop.f32.mrf.mxu1 }
 0x15a   :  { %v1484_v37 = vadd.f32 %v1483_v31, %v2719_v43  ;;  %v1620_v26 = vadd.f32 %v1619_v15, %v1557_v50 }
 0x15b   :  { %v785_v45 = vpop.f32.mrf.mxu0  ;;  %v913_v41 = vpop.f32.mrf.mxu1 }
 0x15c   :  { %v1485_v16 = vadd.f32 %v1484_v37, %v2739_v60  ;;  %v1621_v43 = vadd.f32 %v1620_v26, %v1558_v3  ;;  %v1560_v45 = vmul.f32 %v783_v33, %v783_v33 }
 0x15d   :  { %v786_v54 = vpop.f32.mrf.mxu0  ;;  %v2777_v55 = vpop.f32.mrf.mxu1 }
 0x15e   :  { %v1951_v51 = vpack.c.bf16 %v786_v54, %v783_v33  ;;  %v2031_v19 = vpack.c.bf16 %v2777_v55, %v2769_v34  ;;  %v1486_v49 = vadd.f32 %v1485_v16, %v2749_v10  ;;  %v1622_v47 = vadd.f32 %v1621_v43, %v1559_v39 }
 0x15f   :  { %v788_v1 = vpop.f32.mrf.mxu0  ;;  %v916_v57 = vpop.f32.mrf.mxu1  ;;  %v1561_v56 = vmul.f32 %v786_v54, %v786_v54 }
 0x160   :  { %2063 = vst [vmem:[%s2956_s2 + $0x58] sm:$0xff] %v1951_v51   ;;  %2079 = vst [vmem:[%s2956_s2 + $0xd8] sm:$0xff] %v2031_v19   ;;  %v1487_v60 = vadd.f32 %v1486_v49, %v783_v33  ;;  %v1623_v59 = vadd.f32 %v1622_v47, %v1560_v45 }
 0x161   :  { %v791_v17 = vpop.f32.mrf.mxu0  ;;  %v2793_v21 = vpop.f32.mrf.mxu1 }
 0x162   :  { %v1562_v0 = vmul.f32 %v791_v17, %v791_v17  ;;  %v1488_v29 = vadd.f32 %v1487_v60, %v786_v54  ;;  %v1624_v9 = vadd.f32 %v1623_v59, %v1561_v56 }
 0x163   :  { %v793_v12 = vpop.f32.mrf.mxu0  ;;  %v921_v61 = vpop.f32.mrf.mxu1 }
 0x164   :  { %v1489_v10 = vadd.f32 %v1488_v29, %v791_v17  ;;  %v1625_v33 = vadd.f32 %v1624_v9, %v1562_v0 }
 0x165   :  { %v794_v24 = vpop.f32.mrf.mxu0  ;;  %v2801_v25 = vpop.f32.mrf.mxu1 }
 0x166   :  { %v1956_v7 = vpack.c.bf16 %v794_v24, %v791_v17  ;;  %v2036_v2 = vpack.c.bf16 %v2801_v25, %v2793_v21  ;;  %v1563_v27 = vmul.f32 %v794_v24, %v794_v24  ;;  %v1490_v15 = vadd.f32 %v1489_v10, %v794_v24 }
 0x167   :  { %v796_v40 = vpop.f32.mrf.mxu0  ;;  %v924_v13 = vpop.f32.mrf.mxu1 }
 0x168   :  { %2064 = vst [vmem:[%s2956_s2 + $0x60] sm:$0xff] %v1956_v7   ;;  %2080 = vst [vmem:[%s2956_s2 + $0xe0] sm:$0xff] %v2036_v2   ;;  %v1626_v3 = vadd.f32 %v1625_v33, %v1563_v27 }
 0x169   :  { %v799_v41 = vpop.f32.mrf.mxu0  ;;  %v2815_v46 = vpop.f32.mrf.mxu1 }
 0x16a   :  { %v1564_v61 = vmul.f32 %v799_v41, %v799_v41  ;;  %v1491_v26 = vadd.f32 %v1490_v15, %v799_v41 }
 0x16b   :  { %v801_v51 = vpop.f32.mrf.mxu0  ;;  %v929_v19 = vpop.f32.mrf.mxu1 }
 0x16c   :  { %v1627_v17 = vadd.f32 %v1626_v3, %v1564_v61  ;;  %v1570_v3 = vmul.f32 %v2530_v18, %v2530_v18 }
 0x16d   :  { %v802_v1 = vpop.f32.mrf.mxu0  ;;  %v2818_v57 = vpop.f32.mrf.mxu1 }
 0x16e   :  { %v1961_v35 = vpack.c.bf16 %v802_v1, %v799_v41  ;;  %v2041_v6 = vpack.c.bf16 %v2818_v57, %v2815_v46  ;;  %v1565_v37 = vmul.f32 %v802_v1, %v802_v1  ;;  %v1492_v16 = vadd.f32 %v1491_v26, %v802_v1 }
 0x16f   :  { %v804_v50 = vpop.f32.mrf.mxu0  ;;  %v932_v12 = vpop.f32.mrf.mxu1 }
 0x170   :  { %2065 = vst [vmem:[%s2956_s2 + $0x68] sm:$0xff] %v1961_v35   ;;  %2081 = vst [vmem:[%s2956_s2 + $0xe8] sm:$0xff] %v2041_v6   ;;  %v1628_v49 = vadd.f32 %v1627_v17, %v1565_v37 }
 0x171   :  { %v807_v54 = vpop.f32.mrf.mxu0  ;;  %v2828_v31 = vpop.f32.mrf.mxu1 }
 0x172   :  { %v1566_v39 = vmul.f32 %v807_v54, %v807_v54  ;;  %v1493_v24 = vadd.f32 %v1492_v16, %v807_v54 }
 0x173   :  { %v809_v7 = vpop.f32.mrf.mxu0  ;;  %v937_v2 = vpop.f32.mrf.mxu1 }
 0x174   :  { %v1629_v41 = vadd.f32 %v1628_v49, %v1566_v39  ;;  %v1571_v2 = vmul.f32 %v2534_v22, %v2534_v22  ;;  %v1572_v39 = vmul.f32 %v2548_v28, %v2548_v28  ;;  %v1574_v49 = vmul.f32 %v2566_v38, %v2566_v38 }
 0x175   :  { %v810_v40 = vpop.f32.mrf.mxu0  ;;  %v2830_v13 = vpop.f32.mrf.mxu1 }
 0x176   :  { %v1966_v43 = vpack.c.bf16 %v810_v40, %v807_v54  ;;  %v2046_v45 = vpack.c.bf16 %v2830_v13, %v2828_v31  ;;  %v1567_v47 = vmul.f32 %v810_v40, %v810_v40  ;;  %v1494_v59 = vadd.f32 %v1493_v24, %v810_v40 }
 0x177   :  { %v812_v56 = vpop.f32.mrf.mxu0  ;;  %v940_v51 = vpop.f32.mrf.mxu1 }
 0x178   :  { %2066 = vst [vmem:[%s2956_s2 + $0x70] sm:$0xff] %v1966_v43   ;;  %2082 = vst [vmem:[%s2956_s2 + $0xf0] sm:$0xff] %v2046_v45   ;;  %v1630_v1 = vadd.f32 %v1629_v41, %v1567_v47 }
 0x179   :  { %v815_v19 = vpop.f32.mrf.mxu0  ;;  %v2840_v60 = vpop.f32.mrf.mxu1 }
 0x17a   :  { %v1568_v0 = vmul.f32 %v815_v19, %v815_v19  ;;  %v1495_v6 = vadd.f32 %v1494_v59, %v815_v19 }
 0x17b   :  { %v817_v29 = vpop.f32.mrf.mxu0  ;;  %v945_v35 = vpop.f32.mrf.mxu1 }
 0x17c   :  { %v1631_v9 = vadd.f32 %v1630_v1, %v1568_v0 }
 0x17d   :  { %v818_v27 = vpop.f32.mrf.mxu0  ;;  %v2842_v50 = vpop.f32.mrf.mxu1 }
 0x17e   :  { %v1971_v12 = vpack.c.bf16 %v818_v27, %v815_v19  ;;  %v1496_v10 = vadd.f32 %v1495_v6, %v818_v27  ;;  %v1569_v33 = vmul.f32 %v818_v27, %v818_v27  ;;  %v2051_v61 = vpack.c.bf16 %v2842_v50, %v2840_v60 }
 0x17f   :  { %v820_v54 = vpop.f32.mrf.mxu0  ;;  %v948_v15 = vpop.f32.mrf.mxu1 }
 0x180   :  { %2067 = vst [vmem:[%s2956_s2 + $0x78] sm:$0xff] %v1971_v12   ;;  %v1497_v37 = vadd.f32 %v1496_v10, %v2530_v18  ;;  %v1632_v7 = vadd.f32 %v1631_v9, %v1569_v33  ;;  %2083 = vst [vmem:[%s2956_s2 + $0xf8] sm:$0xff] %v2051_v61   ;;  %v1573_v18 = vmul.f32 %v2552_v32, %v2552_v32 }
 0x182   :  { %v1498_v26 = vadd.f32 %v1497_v37, %v2534_v22  ;;  %v1633_v17 = vadd.f32 %v1632_v7, %v1570_v3  ;;  %v1575_v22 = vmul.f32 %v2570_v42, %v2570_v42 }
 0x184   :  { %v1499_v40 = vadd.f32 %v1498_v26, %v2548_v28  ;;  %v1634_v16 = vadd.f32 %v1633_v17, %v1571_v2  ;;  %v1576_v28 = vmul.f32 %v2584_v48, %v2584_v48 }
 0x186   :  { %v1500_v43 = vadd.f32 %v1499_v40, %v2552_v32  ;;  %v1635_v45 = vadd.f32 %v1634_v16, %v1572_v39  ;;  %v1577_v32 = vmul.f32 %v2588_v52, %v2588_v52  ;;  %v1587_v39 = vmul.f32 %v2691_v5, %v2691_v5 }
 0x188   :  { %v1501_v47 = vadd.f32 %v1500_v43, %v2566_v38  ;;  %v1636_v56 = vadd.f32 %v1635_v45, %v1573_v18  ;;  %v1578_v38 = vmul.f32 %v2602_v58, %v2602_v58  ;;  %v1588_v18 = vmul.f32 %v2711_v23, %v2711_v23 }
 0x189   :  { %v1589_v45 = vmul.f32 %v2721_v44, %v2721_v44 }
 0x18a   :  { %v1502_v51 = vadd.f32 %v1501_v47, %v2570_v42  ;;  %v1637_v24 = vadd.f32 %v1636_v56, %v1574_v49  ;;  %v1579_v42 = vmul.f32 %v2606_v62, %v2606_v62  ;;  %v1590_v47 = vmul.f32 %v2741_v63, %v2741_v63 }
 0x18c   :  { %v1503_v41 = vadd.f32 %v1502_v51, %v2584_v48  ;;  %v1638_v19 = vadd.f32 %v1637_v24, %v1575_v22  ;;  %v1580_v48 = vmul.f32 %v2620_v4, %v2620_v4  ;;  %v1591_v22 = vmul.f32 %v2751_v11, %v2751_v11 }
 0x18d   :  { %v1592_v24 = vmul.f32 %v2769_v34, %v2769_v34 }
 0x18e   :  { %v1504_v59 = vadd.f32 %v1503_v41, %v2588_v52  ;;  %v1639_v0 = vadd.f32 %v1638_v19, %v1576_v28  ;;  %v1581_v52 = vmul.f32 %v2624_v8, %v2624_v8  ;;  %v1593_v41 = vmul.f32 %v2777_v55, %v2777_v55 }
 0x190   :  { %v1640_v1 = vadd.f32 %v1639_v0, %v1577_v32  ;;  %v1505_v29 = vadd.f32 %v1504_v59, %v2602_v58  ;;  %v1582_v58 = vmul.f32 %v2638_v14, %v2638_v14  ;;  %v1594_v32 = vmul.f32 %v2793_v21, %v2793_v21 }
 0x191   :  { %v1595_v0 = vmul.f32 %v2801_v25, %v2801_v25 }
 0x192   :  { %v1506_v35 = vadd.f32 %v1505_v29, %v2606_v62  ;;  %v1641_v6 = vadd.f32 %v1640_v1, %v1578_v38  ;;  %v1583_v62 = vmul.f32 %v2642_v20, %v2642_v20  ;;  %v1596_v1 = vmul.f32 %v2815_v46, %v2815_v46 }
 0x194   :  { %v1507_v9 = vadd.f32 %v1506_v35, %v2620_v4  ;;  %v1642_v27 = vadd.f32 %v1641_v6, %v1579_v42  ;;  %v1584_v4 = vmul.f32 %v2656_v30, %v2656_v30  ;;  %v1597_v42 = vmul.f32 %v2818_v57, %v2818_v57 }
 0x195   :  { %v1598_v6 = vmul.f32 %v2828_v31, %v2828_v31 }
 0x196   :  { %v1508_v12 = vadd.f32 %v1507_v9, %v2624_v8  ;;  %v1643_v10 = vadd.f32 %v1642_v27, %v1580_v48  ;;  %v1585_v8 = vmul.f32 %v2660_v36, %v2660_v36  ;;  %v1599_v9 = vmul.f32 %v2830_v13, %v2830_v13 }
 0x198   :  { %v1509_v33 = vadd.f32 %v1508_v12, %v2638_v14  ;;  %v1644_v61 = vadd.f32 %v1643_v10, %v1581_v52  ;;  %v1586_v14 = vmul.f32 %v2680_v53, %v2680_v53  ;;  %v1600_v52 = vmul.f32 %v2840_v60, %v2840_v60 }
 0x199   :  { %v1601_v10 = vmul.f32 %v2842_v50, %v2842_v50 }
 0x19a   :  { %v1510_v54 = vadd.f32 %v1509_v33, %v2642_v20  ;;  %v1645_v15 = vadd.f32 %v1644_v61, %v1582_v58 }
 0x19c   :  { %v1511_v3 = vadd.f32 %v1510_v54, %v2656_v30  ;;  %v1646_v37 = vadd.f32 %v1645_v15, %v1583_v62 }
 0x19e   :  { %v1512_v7 = vadd.f32 %v1511_v3, %v2660_v36  ;;  %v1647_v2 = vadd.f32 %v1646_v37, %v1584_v4 }
 0x1a0   :  { %v1513_v26 = vadd.f32 %v1512_v7, %v2680_v53  ;;  %v1648_v17 = vadd.f32 %v1647_v2, %v1585_v8 }
 0x1a2   :  { %v1514_v20 = vadd.f32 %v1513_v26, %v2691_v5  ;;  %v1649_v40 = vadd.f32 %v1648_v17, %v1586_v14 }
 0x1a4   :  { %v1650_v30 = vadd.f32 %v1649_v40, %v1587_v39  ;;  %v1515_v16 = vadd.f32 %v1514_v20, %v2711_v23 }
 0x1a6   :  { %v1651_v36 = vadd.f32 %v1650_v30, %v1588_v18  ;;  %v1516_v43 = vadd.f32 %v1515_v16, %v2721_v44 }
 0x1a8   :  { %v1652_v53 = vadd.f32 %v1651_v36, %v1589_v45  ;;  %v1517_v49 = vadd.f32 %v1516_v43, %v2741_v63 }
 0x1aa   :  { %v1653_v5 = vadd.f32 %v1652_v53, %v1590_v47  ;;  %v1518_v56 = vadd.f32 %v1517_v49, %v2751_v11 }
 0x1ac   :  { %v1654_v51 = vadd.f32 %v1653_v5, %v1591_v22  ;;  %v1519_v23 = vadd.f32 %v1518_v56, %v2769_v34 }
 0x1ae   :  { %v1655_v28 = vadd.f32 %v1654_v51, %v1592_v24  ;;  %v1520_v44 = vadd.f32 %v1519_v23, %v2777_v55 }
 0x1b0   :  { %v1656_v19 = vadd.f32 %v1655_v28, %v1593_v41  ;;  %v1521_v63 = vadd.f32 %v1520_v44, %v2793_v21 }
 0x1b2   :  { %v1657_v59 = vadd.f32 %v1656_v19, %v1594_v32  ;;  %v1522_v11 = vadd.f32 %v1521_v63, %v2801_v25 }
 0x1b4   :  { %v1658_v38 = vadd.f32 %v1657_v59, %v1595_v0  ;;  %v1523_v34 = vadd.f32 %v1522_v11, %v2815_v46 }
 0x1b6   :  { %v1659_v29 = vadd.f32 %v1658_v38, %v1596_v1  ;;  %v1524_v55 = vadd.f32 %v1523_v34, %v2818_v57 }
 0x1b8   :  { %v1660_v35 = vadd.f32 %v1659_v29, %v1597_v42  ;;  %v1525_v21 = vadd.f32 %v1524_v55, %v2828_v31 }
 0x1ba   :  { %v1661_v48 = vadd.f32 %v1660_v35, %v1598_v6  ;;  %v1526_v25 = vadd.f32 %v1525_v21, %v2830_v13 }
 0x1bc   :  { %v1662_v27 = vadd.f32 %v1661_v48, %v1599_v9  ;;  %v1527_v46 = vadd.f32 %v1526_v25, %v2840_v60 }
 0x1be   :  { %v1663_v12 = vadd.f32 %v1662_v27, %v1600_v52  ;;  %v1528_v57 = vadd.f32 %v1527_v46, %v2842_v50 }
 0x1c0   :  { %v1529_v58 = vrot.slane %v1528_v57, 4  ;;  %v1664_v31 = vadd.f32 %v1663_v12, %v1601_v10 }
 0x1c2   :  { %v1530_v33 = vadd.f32 %v1529_v58, %v1528_v57  ;;  %v1665_v61 = vrot.slane %v1664_v31, 4 }
 0x1c4   :  { %v1531_v62 = vrot.slane %v1530_v33, 2  ;;  %v1666_v54 = vadd.f32 %v1665_v61, %v1664_v31 }
 0x1c6   :  { %v1532_v15 = vadd.f32 %v1531_v62, %v1530_v33  ;;  %v1667_v13 = vrot.slane %v1666_v54, 2 }
 0x1c8   :  { %v1533_v4 = vrot.slane %v1532_v15, 1  ;;  %v1668_v3 = vadd.f32 %v1667_v13, %v1666_v54 }
 0x1ca   :  { %v1534_v37 = vadd.f32 %v1533_v4, %v1532_v15  ;;  %v1669_v8 = vrot.slane %v1668_v3, 1 }
 0x1cc   :  { %v1670_v7 = vadd.f32 %v1669_v8, %v1668_v3  ;;  %1536 = vst [vmem:[%s2957_s3] sm:$0xff] %v1534_v37 }
 0x1ce   :  { %1672 = vst [vmem:[%s2958_s4] sm:$0xff] %v1670_v7 }

// kernel: resnet_generator_forward.34
= control target key start
LH: loop header
LB: loop body
LE: loop exit
PB: predicated region body
PF: predicated region fallthrough
CT: control target
= control target key end

     0   :  { %s764_s1 = inlined_call_operand.vmem [shape: bf16[128,128], index: 1, kind: input, shape index: {}]   ;;  %s765_s0 = inlined_call_operand.vmem [shape: bf16[128,128], index: 0, kind: input, shape index: {}]   ;;  %s766_s2 = inlined_call_operand.vmem [shape: bf16[128,128], index: 2, kind: output, shape index: {0}]   ;;  %s767_s3 = inlined_call_operand.vmem [shape: f32[8,128], index: 3, kind: output, shape index: {1}]   ;;  %s768_s4 = inlined_call_operand.vmem [shape: f32[8,128], index: 4, kind: output, shape index: {2}]  }
   0x1   :  { %v645_v0 = vld [vmem:[%s764_s1 + $0x38] sm:$0xff]   ;;  %v646_v1 = vld [vmem:[%s764_s1 + $0x30] sm:$0xff]   ;;  %v647_v2 = vld [vmem:[%s764_s1 + $0x28] sm:$0xff]  }
   0x2   :  { %596 = vmatprep.subr.bf16.mxu0 %v645_v0  ;;  %628 = vmatprep.subr.bf16.mxu1 %v645_v0  ;;  %v648_v3 = vld [vmem:[%s764_s1 + $0x20] sm:$0xff]   ;;  %v649_v5 = vld [vmem:[%s764_s1 + $0x18] sm:$0xff]   ;;  %v650_v7 = vld [vmem:[%s764_s1 + $0x10] sm:$0xff]  }
   0x3   :  { %597 = vmatpush3.bf16.msra.mxu0 %v645_v0  ;;  %636 = vmatpush3.bf16.msra.mxu1 %v645_v0  ;;  %v653_v4 = vld [vmem:[%s765_s0] sm:$0xff]   ;;  %v651_v8 = vld [vmem:[%s764_s1 + $0x8] sm:$0xff]   ;;  %v655_v12 = vld [vmem:[%s765_s0 + $0x10] sm:$0xff]  }
   0x4   :  { %598 = vmatprep.subr.bf16.mxu0 %v646_v1  ;;  %629 = vmatprep.subr.bf16.mxu1 %v646_v1  ;;  %v657_v6 = vld [vmem:[%s765_s0 + $0x20] sm:$0xff]   ;;  %v654_v10 = vld [vmem:[%s765_s0 + $0x8] sm:$0xff]   ;;  %v659_v13 = vld [vmem:[%s765_s0 + $0x30] sm:$0xff]  }
   0x5   :  { %612 = vmatprep.mubr.bf16.mxu0 %v653_v4  ;;  %620 = vmatprep.mubr.bf16.mxu1 %v657_v6  ;;  %v652_v9 = vld [vmem:[%s764_s1] sm:$0xff]   ;;  %v658_v11 = vld [vmem:[%s765_s0 + $0x28] sm:$0xff]   ;;  %v656_v14 = vld [vmem:[%s765_s0 + $0x18] sm:$0xff]  }
   0x6   :  { %v660_v15 = vld [vmem:[%s765_s0 + $0x38] sm:$0xff]  }
   0x7   :  { %599 = vmatpush3.bf16.msra.mxu0 %v646_v1  ;;  %637 = vmatpush3.bf16.msra.mxu1 %v646_v1 }
   0x8   :  { %600 = vmatprep.subr.bf16.mxu0 %v647_v2  ;;  %630 = vmatprep.subr.bf16.mxu1 %v647_v2 }
   0xb   :  { %601 = vmatpush3.bf16.msra.mxu0 %v647_v2  ;;  %638 = vmatpush3.bf16.msra.mxu1 %v647_v2 }
   0xc   :  { %602 = vmatprep.subr.bf16.mxu0 %v648_v3  ;;  %631 = vmatprep.subr.bf16.mxu1 %v648_v3 }
   0xf   :  { %603 = vmatpush3.bf16.msra.mxu0 %v648_v3  ;;  %639 = vmatpush3.bf16.msra.mxu1 %v648_v3 }
  0x10   :  { %604 = vmatprep.subr.bf16.mxu0 %v649_v5  ;;  %632 = vmatprep.subr.bf16.mxu1 %v649_v5 }
  0x13   :  { %605 = vmatpush3.bf16.msra.mxu0 %v649_v5  ;;  %640 = vmatpush3.bf16.msra.mxu1 %v649_v5 }
  0x14   :  { %606 = vmatprep.subr.bf16.mxu0 %v650_v7  ;;  %633 = vmatprep.subr.bf16.mxu1 %v650_v7 }
  0x17   :  { %607 = vmatpush3.bf16.msra.mxu0 %v650_v7  ;;  %641 = vmatpush3.bf16.msra.mxu1 %v650_v7 }
  0x18   :  { %608 = vmatprep.subr.bf16.mxu0 %v651_v8  ;;  %634 = vmatprep.subr.bf16.mxu1 %v651_v8 }
  0x1b   :  { %609 = vmatpush3.bf16.msra.mxu0 %v651_v8  ;;  %642 = vmatpush3.bf16.msra.mxu1 %v651_v8 }
  0x1c   :  { %610 = vmatprep.subr.bf16.mxu0 %v652_v9  ;;  %635 = vmatprep.subr.bf16.mxu1 %v652_v9 }
  0x1f   :  { %611 = vmatpush3.bf16.msra.mxu0 %v652_v9  ;;  %643 = vmatpush3.bf16.msra.mxu1 %v652_v9 }
  0x22   :  { %613 = vmatmul.mubr.bf16.vlgmr.msra.gmra.mxu0 %v654_v10  ;;  %621 = vmatmul.mubr.bf16.vlgmr.msra.gmra.mxu1 %v658_v11 }
  0x23   :  { %616 = vmatprep.mubr.bf16.mxu0 %v655_v12  ;;  %624 = vmatprep.mubr.bf16.mxu1 %v659_v13 }
  0x2a   :  { %617 = vmatmul.mubr.bf16.gmra.mxu0 %v656_v14  ;;  %625 = vmatmul.mubr.bf16.gmra.mxu1 %v660_v15 }
  0xe2   :  { %v614_v16 = vpop.f32.mrf.mxu0  ;;  %v622_v17 = vpop.f32.mrf.mxu1 }
  0xe3   :  { %v436_v33 = vmul.f32 %v614_v16, %v614_v16  ;;  %v444_v3 = vmul.f32 %v622_v17, %v622_v17 }
  0xe4   :  { %v215_v18 = vpop.f32.mrf.mxu0  ;;  %v247_v19 = vpop.f32.mrf.mxu1 }
  0xe5   :  { %v434_v24 = vmul.f32 %v215_v18, %v215_v18  ;;  %v442_v61 = vmul.f32 %v247_v19, %v247_v19 }
  0xe6   :  { %v615_v20 = vpop.f32.mrf.mxu0  ;;  %v623_v21 = vpop.f32.mrf.mxu1 }
  0xe7   :  { %v541_v22 = vpack.c.bf16 %v615_v20, %v614_v16  ;;  %v561_v23 = vpack.c.bf16 %v623_v21, %v622_v17  ;;  %v437_v38 = vmul.f32 %v615_v20, %v615_v20  ;;  %v445_v6 = vmul.f32 %v623_v21, %v623_v21 }
  0xe8   :  { %v218_v25 = vpop.f32.mrf.mxu0  ;;  %v250_v26 = vpop.f32.mrf.mxu1 }
  0xe9   :  { %573 = vst [vmem:[%s766_s2 + $0x8] sm:$0xff] %v541_v22   ;;  %v536_v27 = vpack.c.bf16 %v218_v25, %v215_v18  ;;  %v410_v28 = vadd.f32 %v218_v25, %v215_v18  ;;  %v435_v29 = vmul.f32 %v218_v25, %v218_v25  ;;  %577 = vst [vmem:[%s766_s2 + $0x28] sm:$0xff] %v561_v23  }
  0xea   :  { %v556_v30 = vpack.c.bf16 %v250_v26, %v247_v19  ;;  %v618_v31 = vpop.f32.mrf.mxu0  ;;  %v626_v32 = vpop.f32.mrf.mxu1  ;;  %v443_v1 = vmul.f32 %v250_v26, %v250_v26 }
  0xeb   :  { %537 = vst [vmem:[%s766_s2] sm:$0xff] %v536_v27   ;;  %v411_v34 = vadd.f32 %v614_v16, %v410_v28  ;;  %v450_v35 = vadd.f32 %v435_v29, %v434_v24  ;;  %v440_v55 = vmul.f32 %v618_v31, %v618_v31  ;;  %v448_v15 = vmul.f32 %v626_v32, %v626_v32 }
  0xec   :  { %576 = vst [vmem:[%s766_s2 + $0x20] sm:$0xff] %v556_v30   ;;  %v231_v36 = vpop.f32.mrf.mxu0  ;;  %v263_v37 = vpop.f32.mrf.mxu1 }
  0xed   :  { %v451_v39 = vadd.f32 %v450_v35, %v436_v33  ;;  %v412_v40 = vadd.f32 %v615_v20, %v411_v34  ;;  %v438_v44 = vmul.f32 %v231_v36, %v231_v36  ;;  %v446_v10 = vmul.f32 %v263_v37, %v263_v37 }
  0xee   :  { %v619_v41 = vpop.f32.mrf.mxu0  ;;  %v627_v42 = vpop.f32.mrf.mxu1 }
  0xef   :  { %v413_v43 = vadd.f32 %v412_v40, %v231_v36  ;;  %v452_v45 = vadd.f32 %v451_v39, %v437_v38  ;;  %v551_v46 = vpack.c.bf16 %v619_v41, %v618_v31  ;;  %v571_v48 = vpack.c.bf16 %v627_v42, %v626_v32 }
  0xf0   :  { %v234_v47 = vpop.f32.mrf.mxu0  ;;  %v266_v49 = vpop.f32.mrf.mxu1  ;;  %v441_v58 = vmul.f32 %v619_v41, %v619_v41  ;;  %v449_v20 = vmul.f32 %v627_v42, %v627_v42 }
  0xf1   :  { %v453_v50 = vadd.f32 %v452_v45, %v438_v44  ;;  %575 = vst [vmem:[%s766_s2 + $0x18] sm:$0xff] %v551_v46   ;;  %v546_v51 = vpack.c.bf16 %v234_v47, %v231_v36  ;;  %v414_v52 = vadd.f32 %v413_v43, %v234_v47  ;;  %v439_v53 = vmul.f32 %v234_v47, %v234_v47 }
  0xf2   :  { %579 = vst [vmem:[%s766_s2 + $0x38] sm:$0xff] %v571_v48   ;;  %v566_v54 = vpack.c.bf16 %v266_v49, %v263_v37  ;;  %v447_v14 = vmul.f32 %v266_v49, %v266_v49 }
  0xf3   :  { %574 = vst [vmem:[%s766_s2 + $0x10] sm:$0xff] %v546_v51   ;;  %v415_v56 = vadd.f32 %v618_v31, %v414_v52  ;;  %v454_v57 = vadd.f32 %v453_v50, %v439_v53 }
  0xf4   :  { %578 = vst [vmem:[%s766_s2 + $0x30] sm:$0xff] %v566_v54  }
  0xf5   :  { %v416_v59 = vadd.f32 %v619_v41, %v415_v56  ;;  %v455_v60 = vadd.f32 %v454_v57, %v440_v55 }
  0xf7   :  { %v456_v62 = vadd.f32 %v455_v60, %v441_v58  ;;  %v417_v63 = vadd.f32 %v416_v59, %v247_v19 }
  0xf9   :  { %v418_v0 = vadd.f32 %v417_v63, %v250_v26  ;;  %v457_v2 = vadd.f32 %v456_v62, %v442_v61 }
  0xfb   :  { %v419_v4 = vadd.f32 %v622_v17, %v418_v0  ;;  %v458_v5 = vadd.f32 %v457_v2, %v443_v1 }
  0xfd   :  { %v459_v7 = vadd.f32 %v458_v5, %v444_v3  ;;  %v420_v8 = vadd.f32 %v623_v21, %v419_v4 }
  0xff   :  { %v421_v9 = vadd.f32 %v420_v8, %v263_v37  ;;  %v460_v11 = vadd.f32 %v459_v7, %v445_v6 }
 0x101   :  { %v461_v12 = vadd.f32 %v460_v11, %v446_v10  ;;  %v422_v13 = vadd.f32 %v421_v9, %v266_v49 }
 0x103   :  { %v423_v16 = vadd.f32 %v626_v32, %v422_v13  ;;  %v462_v18 = vadd.f32 %v461_v12, %v447_v14 }
 0x105   :  { %v424_v19 = vadd.f32 %v627_v42, %v423_v16  ;;  %v463_v22 = vadd.f32 %v462_v18, %v448_v15 }
 0x107   :  { %v425_v23 = vrot.slane %v424_v19, 4  ;;  %v464_v24 = vadd.f32 %v463_v22, %v449_v20 }
 0x109   :  { %v426_v25 = vadd.f32 %v425_v23, %v424_v19  ;;  %v465_v17 = vrot.slane %v464_v24, 4 }
 0x10b   :  { %v427_v26 = vrot.slane %v426_v25, 2  ;;  %v466_v27 = vadd.f32 %v465_v17, %v464_v24 }
 0x10d   :  { %v428_v28 = vadd.f32 %v427_v26, %v426_v25  ;;  %v467_v21 = vrot.slane %v466_v27, 2 }
 0x10f   :  { %v429_v29 = vrot.slane %v428_v28, 1  ;;  %v468_v30 = vadd.f32 %v467_v21, %v466_v27 }
 0x111   :  { %v430_v31 = vadd.f32 %v429_v29, %v428_v28  ;;  %v469_v33 = vrot.slane %v468_v30, 1 }
 0x113   :  { %v470_v34 = vadd.f32 %v469_v33, %v468_v30  ;;  %432 = vst [vmem:[%s767_s3] sm:$0xff] %v430_v31 }
 0x115   :  { %472 = vst [vmem:[%s768_s4] sm:$0xff] %v470_v34 }

// kernel: resnet_generator_forward.35
= control target key start
LH: loop header
LB: loop body
LE: loop exit
PB: predicated region body
PF: predicated region fallthrough
CT: control target
= control target key end

     0   :  { %v44_v0 = vlaneseq  ;;  %s368_s0 = inlined_call_operand.vmem [shape: bf16[128,128], index: 0, kind: input, shape index: {}]   ;;  %s369_s1 = inlined_call_operand.vmem [shape: f32[8,128], index: 1, kind: input, shape index: {}]   ;;  %s370_s2 = inlined_call_operand.vmem [shape: bf16[128,128], index: 2, kind: output, shape index: {}]  }
   0x1   :  { %v217_v1 = vld [vmem:[%s368_s0] sm:$0xff]   ;;  %v288_v2 = vld [vmem:[%s368_s0 + $0x8] sm:$0xff]   ;;  %v289_v4 = vld [vmem:[%s368_s0 + $0x10] sm:$0xff]  }
   0x2   :  { %v45_v3 = vshrl.u32 %v44_v0, 7  ;;  %v290_v5 = vld [vmem:[%s368_s0 + $0x18] sm:$0xff]   ;;  %v291_v6 = vld [vmem:[%s368_s0 + $0x20] sm:$0xff]   ;;  %v218_v7 = vunpack.c.l.bf16 %v217_v1  ;;  %v219_v8 = vunpack.c.h.bf16 %v217_v1  ;;  %v222_v10 = vunpack.c.l.bf16 %v288_v2  ;;  %v292_v12 = vld [vmem:[%s368_s0 + $0x28] sm:$0xff]  }
   0x3   :  { %v43_v9 = vld [vmem:[%s369_s1] sm:$0xff]  ;;  %v223_v11 = vunpack.c.h.bf16 %v288_v2  ;;  %v226_v15 = vunpack.c.l.bf16 %v289_v4  ;;  %v227_v16 = vunpack.c.h.bf16 %v289_v4  ;;  %v293_v17 = vld [vmem:[%s368_s0 + $0x30] sm:$0xff]   ;;  %v294_v18 = vld [vmem:[%s368_s0 + $0x38] sm:$0xff]   ;;  %v230_v19 = vunpack.c.l.bf16 %v290_v5 }
   0x4   :  { %v46_v13 = vsub.s32 0, %v45_v3  ;;  %v66_v14 = vsub.s32 1, %v45_v3  ;;  %v231_v20 = vunpack.c.h.bf16 %v290_v5  ;;  %v234_v21 = vunpack.c.l.bf16 %v291_v6 }
   0x5   :  { %v235_v22 = vunpack.c.h.bf16 %v291_v6  ;;  %v238_v25 = vunpack.c.l.bf16 %v292_v12  ;;  %v239_v26 = vunpack.c.h.bf16 %v292_v12  ;;  %v242_v27 = vunpack.c.l.bf16 %v293_v17 }
   0x6   :  { %v47_v23 = vrot.slane %v43_v9, %v46_v13  ;;  %v67_v24 = vrot.slane %v43_v9, %v66_v14  ;;  %v243_v28 = vunpack.c.h.bf16 %v293_v17  ;;  %v246_v29 = vunpack.c.l.bf16 %v294_v18 }
   0x7   :  { %v247_v30 = vunpack.c.h.bf16 %v294_v18 }
   0x8   :  { %v48_v31 = vmul.f32 %v218_v7, %v47_v23  ;;  %v49_v32 = vmul.f32 %v219_v8, %v47_v23  ;;  %v50_v33 = vmul.f32 %v222_v10, %v47_v23  ;;  %v51_v34 = vmul.f32 %v223_v11, %v47_v23 }
   0x9   :  { %v52_v35 = vmul.f32 %v226_v15, %v47_v23  ;;  %v53_v36 = vmul.f32 %v227_v16, %v47_v23  ;;  %v54_v37 = vmul.f32 %v230_v19, %v47_v23  ;;  %v55_v38 = vmul.f32 %v231_v20, %v47_v23 }
   0xa   :  { %v68_v39 = vadd.f32 %v67_v24, %v48_v31  ;;  %v69_v40 = vadd.f32 %v67_v24, %v49_v32  ;;  %v70_v41 = vadd.f32 %v67_v24, %v50_v33  ;;  %v71_v42 = vadd.f32 %v67_v24, %v51_v34 }
   0xb   :  { %v72_v43 = vadd.f32 %v67_v24, %v52_v35  ;;  %v73_v44 = vadd.f32 %v67_v24, %v53_v36  ;;  %v74_v45 = vadd.f32 %v67_v24, %v54_v37  ;;  %v75_v46 = vadd.f32 %v67_v24, %v55_v38 }
   0xc   :  { %v84_v47 = vmax.f32 %v68_v39, 0.0  ;;  %v85_v48 = vmax.f32 %v69_v40, 0.0  ;;  %v86_v49 = vmax.f32 %v70_v41, 0.0  ;;  %v87_v50 = vmax.f32 %v71_v42, 0.0 }
   0xd   :  { %v88_v51 = vmax.f32 %v72_v43, 0.0  ;;  %v89_v52 = vmax.f32 %v73_v44, 0.0  ;;  %v90_v53 = vmax.f32 %v74_v45, 0.0  ;;  %v91_v54 = vmax.f32 %v75_v46, 0.0 }
   0xe   :  { %v251_v55 = vpack.c.bf16 %v85_v48, %v84_v47  ;;  %v256_v56 = vpack.c.bf16 %v87_v50, %v86_v49  ;;  %v56_v57 = vmul.f32 %v234_v21, %v47_v23  ;;  %v57_v58 = vmul.f32 %v235_v22, %v47_v23 }
   0xf   :  { %v261_v59 = vpack.c.bf16 %v89_v52, %v88_v51  ;;  %v266_v60 = vpack.c.bf16 %v91_v54, %v90_v53  ;;  %v58_v61 = vmul.f32 %v238_v25, %v47_v23  ;;  %v59_v62 = vmul.f32 %v239_v26, %v47_v23 }
  0x10   :  { %252 = vst [vmem:[%s370_s2] sm:$0xff] %v251_v55   ;;  %295 = vst [vmem:[%s370_s2 + $0x8] sm:$0xff] %v256_v56   ;;  %v76_v63 = vadd.f32 %v67_v24, %v56_v57  ;;  %v77_v0 = vadd.f32 %v67_v24, %v57_v58  ;;  %v60_v1 = vmul.f32 %v242_v27, %v47_v23 }
  0x11   :  { %v61_v2 = vmul.f32 %v243_v28, %v47_v23  ;;  %296 = vst [vmem:[%s370_s2 + $0x10] sm:$0xff] %v261_v59   ;;  %297 = vst [vmem:[%s370_s2 + $0x18] sm:$0xff] %v266_v60   ;;  %v78_v3 = vadd.f32 %v67_v24, %v58_v61  ;;  %v79_v4 = vadd.f32 %v67_v24, %v59_v62 }
  0x12   :  { %v62_v5 = vmul.f32 %v246_v29, %v47_v23  ;;  %v63_v6 = vmul.f32 %v247_v30, %v47_v23  ;;  %v92_v7 = vmax.f32 %v76_v63, 0.0  ;;  %v93_v8 = vmax.f32 %v77_v0, 0.0 }
  0x13   :  { %v80_v9 = vadd.f32 %v67_v24, %v60_v1  ;;  %v81_v10 = vadd.f32 %v67_v24, %v61_v2  ;;  %v94_v11 = vmax.f32 %v78_v3, 0.0  ;;  %v95_v12 = vmax.f32 %v79_v4, 0.0 }
  0x14   :  { %v82_v13 = vadd.f32 %v67_v24, %v62_v5  ;;  %v83_v14 = vadd.f32 %v67_v24, %v63_v6  ;;  %v271_v15 = vpack.c.bf16 %v93_v8, %v92_v7 }
  0x15   :  { %v96_v16 = vmax.f32 %v80_v9, 0.0  ;;  %v97_v17 = vmax.f32 %v81_v10, 0.0  ;;  %v276_v18 = vpack.c.bf16 %v95_v12, %v94_v11 }
  0x16   :  { %v98_v19 = vmax.f32 %v82_v13, 0.0  ;;  %v99_v20 = vmax.f32 %v83_v14, 0.0  ;;  %298 = vst [vmem:[%s370_s2 + $0x20] sm:$0xff] %v271_v15  }
  0x17   :  { %v281_v21 = vpack.c.bf16 %v97_v17, %v96_v16  ;;  %299 = vst [vmem:[%s370_s2 + $0x28] sm:$0xff] %v276_v18  }
  0x18   :  { %v286_v22 = vpack.c.bf16 %v99_v20, %v98_v19 }
  0x19   :  { %300 = vst [vmem:[%s370_s2 + $0x30] sm:$0xff] %v281_v21  }
  0x1a   :  { %301 = vst [vmem:[%s370_s2 + $0x38] sm:$0xff] %v286_v22  }

// kernel: resnet_generator_forward.36
= control target key start
LH: loop header
LB: loop body
LE: loop exit
PB: predicated region body
PF: predicated region fallthrough
CT: control target
= control target key end

     0   :  { %s988_s1 = inlined_call_operand.vmem [shape: bf16[256,128], index: 1, kind: input, shape index: {}]   ;;  %s989_s0 = inlined_call_operand.vmem [shape: bf16[128,256], index: 0, kind: input, shape index: {}]   ;;  %s990_s2 = inlined_call_operand.vmem [shape: bf16[128,128], index: 2, kind: output, shape index: {0}]   ;;  %s991_s3 = inlined_call_operand.vmem [shape: f32[8,128], index: 3, kind: output, shape index: {1}]   ;;  %s992_s4 = inlined_call_operand.vmem [shape: f32[8,128], index: 4, kind: output, shape index: {2}]  }
   0x1   :  { %v773_v0 = vld [vmem:[%s988_s1 + $0x78] sm:$0xff]   ;;  %v775_v2 = vld [vmem:[%s988_s1 + $0x70] sm:$0xff]   ;;  %v777_v4 = vld [vmem:[%s988_s1 + $0x68] sm:$0xff]  }
   0x2   :  { %v774_v1 = vld [vmem:[%s988_s1 + $0x38] sm:$0xff]   ;;  %692 = vmatprep.subr.bf16.mxu0 %v773_v0  ;;  %756 = vmatprep.subr.bf16.mxu1 %v773_v0  ;;  %v776_v3 = vld [vmem:[%s988_s1 + $0x30] sm:$0xff]   ;;  %v778_v5 = vld [vmem:[%s988_s1 + $0x28] sm:$0xff]  }
   0x3   :  { %693 = vmatpush3.bf16.msra.mxu0 %v774_v1  ;;  %764 = vmatpush3.bf16.msra.mxu1 %v774_v1  ;;  %v779_v6 = vld [vmem:[%s988_s1 + $0x60] sm:$0xff]   ;;  %v781_v8 = vld [vmem:[%s988_s1 + $0x58] sm:$0xff]   ;;  %v783_v10 = vld [vmem:[%s988_s1 + $0x50] sm:$0xff]  }
   0x4   :  { %694 = vmatprep.subr.bf16.mxu0 %v775_v2  ;;  %757 = vmatprep.subr.bf16.mxu1 %v775_v2  ;;  %v780_v7 = vld [vmem:[%s988_s1 + $0x20] sm:$0xff]   ;;  %v782_v9 = vld [vmem:[%s988_s1 + $0x18] sm:$0xff]   ;;  %v784_v12 = vld [vmem:[%s988_s1 + $0x10] sm:$0xff]  }
   0x5   :  { %v791_v11 = vld [vmem:[%s989_s0 + $0x4] ss:$8 sps:$4 sm:$0xff]   ;;  %v789_v18 = vld [vmem:[%s989_s0] ss:$8 sps:$4 sm:$0xff]   ;;  %v792_v20 = vld [vmem:[%s989_s0 + $0x14] ss:$8 sps:$4 sm:$0xff]  }
   0x6   :  { %v797_v13 = vld [vmem:[%s989_s0 + $0x44] ss:$8 sps:$4 sm:$0xff]   ;;  %309 = vmatprep.mubr.bf16.mxu0 %v791_v11  ;;  %v795_v19 = vld [vmem:[%s989_s0 + $0x40] ss:$8 sps:$4 sm:$0xff]   ;;  %v801_v21 = vld [vmem:[%s989_s0 + $0x54] ss:$8 sps:$4 sm:$0xff]  }
   0x7   :  { %695 = vmatpush3.bf16.msra.mxu0 %v776_v3  ;;  %765 = vmatpush3.bf16.msra.mxu1 %v776_v3  ;;  %v785_v14 = vld [vmem:[%s988_s1 + $0x48] sm:$0xff]   ;;  %v787_v16 = vld [vmem:[%s988_s1 + $0x40] sm:$0xff]   ;;  %v794_v22 = vld [vmem:[%s989_s0 + $0x10] ss:$8 sps:$4 sm:$0xff]  }
   0x8   :  { %696 = vmatprep.subr.bf16.mxu0 %v777_v4  ;;  %758 = vmatprep.subr.bf16.mxu1 %v777_v4  ;;  %v786_v15 = vld [vmem:[%s988_s1 + $0x8] sm:$0xff]   ;;  %v788_v17 = vld [vmem:[%s988_s1] sm:$0xff]   ;;  %v803_v23 = vld [vmem:[%s989_s0 + $0x50] ss:$8 sps:$4 sm:$0xff]  }
   0x9   :  { %341 = vmatprep.mubr.bf16.mxu1 %v797_v13  ;;  %v798_v24 = vld [vmem:[%s989_s0 + $0x24] ss:$8 sps:$4 sm:$0xff]   ;;  %v800_v26 = vld [vmem:[%s989_s0 + $0x20] ss:$8 sps:$4 sm:$0xff]   ;;  %v804_v28 = vld [vmem:[%s989_s0 + $0x34] ss:$8 sps:$4 sm:$0xff]  }
   0xa   :  { %v807_v25 = vld [vmem:[%s989_s0 + $0x64] ss:$8 sps:$4 sm:$0xff]   ;;  %v809_v27 = vld [vmem:[%s989_s0 + $0x60] ss:$8 sps:$4 sm:$0xff]   ;;  %v810_v29 = vld [vmem:[%s989_s0 + $0x74] ss:$8 sps:$4 sm:$0xff]  }
   0xb   :  { %697 = vmatpush3.bf16.msra.mxu0 %v778_v5  ;;  %766 = vmatpush3.bf16.msra.mxu1 %v778_v5  ;;  %v806_v30 = vld [vmem:[%s989_s0 + $0x30] ss:$8 sps:$4 sm:$0xff]  }
   0xc   :  { %698 = vmatprep.subr.bf16.mxu0 %v779_v6  ;;  %759 = vmatprep.subr.bf16.mxu1 %v779_v6  ;;  %v812_v31 = vld [vmem:[%s989_s0 + $0x70] ss:$8 sps:$4 sm:$0xff]  }
   0xf   :  { %699 = vmatpush3.bf16.msra.mxu0 %v780_v7  ;;  %767 = vmatpush3.bf16.msra.mxu1 %v780_v7 }
  0x10   :  { %700 = vmatprep.subr.bf16.mxu0 %v781_v8  ;;  %760 = vmatprep.subr.bf16.mxu1 %v781_v8 }
  0x13   :  { %701 = vmatpush3.bf16.msra.mxu0 %v782_v9  ;;  %768 = vmatpush3.bf16.msra.mxu1 %v782_v9 }
  0x14   :  { %702 = vmatprep.subr.bf16.mxu0 %v783_v10  ;;  %761 = vmatprep.subr.bf16.mxu1 %v783_v10 }
  0x17   :  { %703 = vmatpush3.bf16.msra.mxu0 %v784_v12  ;;  %769 = vmatpush3.bf16.msra.mxu1 %v784_v12 }
  0x18   :  { %704 = vmatprep.subr.bf16.mxu0 %v785_v14  ;;  %762 = vmatprep.subr.bf16.mxu1 %v785_v14 }
  0x1b   :  { %705 = vmatpush3.bf16.msra.mxu0 %v786_v15  ;;  %770 = vmatpush3.bf16.msra.mxu1 %v786_v15 }
  0x1c   :  { %706 = vmatprep.subr.bf16.mxu0 %v787_v16  ;;  %763 = vmatprep.subr.bf16.mxu1 %v787_v16 }
  0x1f   :  { %707 = vmatpush3.bf16.msra.mxu0 %v788_v17  ;;  %771 = vmatpush3.bf16.msra.mxu1 %v788_v17 }
  0x22   :  { %310 = vmatmul.mubr.bf16.vlgmr.msra.gmra.mxu0 %v789_v18  ;;  %342 = vmatmul.mubr.bf16.vlgmr.msra.gmra.mxu1 %v795_v19 }
  0x23   :  { %317 = vmatprep.mubr.bf16.mxu0 %v792_v20  ;;  %349 = vmatprep.mubr.bf16.mxu1 %v801_v21 }
  0x2a   :  { %318 = vmatmul.mubr.bf16.gmra.mxu0 %v794_v22  ;;  %350 = vmatmul.mubr.bf16.gmra.mxu1 %v803_v23 }
  0x2b   :  { %325 = vmatprep.mubr.bf16.mxu0 %v798_v24  ;;  %357 = vmatprep.mubr.bf16.mxu1 %v807_v25 }
  0x32   :  { %326 = vmatmul.mubr.bf16.gmra.mxu0 %v800_v26  ;;  %358 = vmatmul.mubr.bf16.gmra.mxu1 %v809_v27 }
  0x33   :  { %333 = vmatprep.mubr.bf16.mxu0 %v804_v28  ;;  %365 = vmatprep.mubr.bf16.mxu1 %v810_v29 }
  0x3a   :  { %334 = vmatmul.mubr.bf16.gmra.mxu0 %v806_v30  ;;  %366 = vmatmul.mubr.bf16.gmra.mxu1 %v812_v31 }
  0xe2   :  { %v708_v32 = vpop.f32.mrf.mxu0  ;;  %v732_v33 = vpop.f32.mrf.mxu1 }
  0xe4   :  { %v709_v34 = vpop.f32.mrf.mxu0  ;;  %v733_v35 = vpop.f32.mrf.mxu1 }
  0xe5   :  { %v934_v38 = vadd.f32 %v733_v35, %v732_v33  ;;  %v710_v41 = vadd.f32 %v709_v34, %v708_v32 }
  0xe6   :  { %v711_v36 = vpop.f32.mrf.mxu0  ;;  %v735_v37 = vpop.f32.mrf.mxu1 }
  0xe7   :  { %v530_v1 = vmul.f32 %v710_v41, %v710_v41 }
  0xe8   :  { %v712_v39 = vpop.f32.mrf.mxu0  ;;  %v736_v40 = vpop.f32.mrf.mxu1 }
  0xe9   :  { %v713_v42 = vadd.f32 %v712_v39, %v711_v36  ;;  %v936_v43 = vadd.f32 %v736_v40, %v735_v37 }
  0xea   :  { %v714_v44 = vpop.f32.mrf.mxu0  ;;  %v738_v45 = vpop.f32.mrf.mxu1 }
  0xeb   :  { %v648_v46 = vpack.c.bf16 %v713_v42, %v710_v41  ;;  %v668_v47 = vpack.c.bf16 %v936_v43, %v934_v38  ;;  %v531_v62 = vmul.f32 %v713_v42, %v713_v42  ;;  %v506_v6 = vadd.f32 %v713_v42, %v710_v41 }
  0xec   :  { %v715_v48 = vpop.f32.mrf.mxu0  ;;  %v739_v49 = vpop.f32.mrf.mxu1 }
  0xed   :  { %649 = vst [vmem:[%s990_s2] sm:$0xff] %v648_v46   ;;  %688 = vst [vmem:[%s990_s2 + $0x20] sm:$0xff] %v668_v47   ;;  %v946_v52 = vadd.f32 %v739_v49, %v738_v45  ;;  %v716_v55 = vadd.f32 %v715_v48, %v714_v44  ;;  %v546_v8 = vadd.f32 %v531_v62, %v530_v1 }
  0xee   :  { %v717_v50 = vpop.f32.mrf.mxu0  ;;  %v741_v51 = vpop.f32.mrf.mxu1  ;;  %v538_v47 = vmul.f32 %v934_v38, %v934_v38 }
  0xef   :  { %v532_v2 = vmul.f32 %v716_v55, %v716_v55  ;;  %v507_v12 = vadd.f32 %v716_v55, %v506_v6 }
  0xf0   :  { %v718_v53 = vpop.f32.mrf.mxu0  ;;  %v742_v54 = vpop.f32.mrf.mxu1 }
  0xf1   :  { %v719_v56 = vadd.f32 %v718_v53, %v717_v50  ;;  %v948_v57 = vadd.f32 %v742_v54, %v741_v51  ;;  %v547_v15 = vadd.f32 %v546_v8, %v532_v2  ;;  %v539_v50 = vmul.f32 %v936_v43, %v936_v43 }
  0xf2   :  { %v720_v58 = vpop.f32.mrf.mxu0  ;;  %v744_v59 = vpop.f32.mrf.mxu1  ;;  %v540_v54 = vmul.f32 %v946_v52, %v946_v52 }
  0xf3   :  { %v653_v60 = vpack.c.bf16 %v719_v56, %v716_v55  ;;  %v673_v61 = vpack.c.bf16 %v948_v57, %v946_v52  ;;  %v533_v9 = vmul.f32 %v719_v56, %v719_v56  ;;  %v508_v19 = vadd.f32 %v719_v56, %v507_v12 }
  0xf4   :  { %v721_v63 = vpop.f32.mrf.mxu0  ;;  %v745_v0 = vpop.f32.mrf.mxu1 }
  0xf5   :  { %685 = vst [vmem:[%s990_s2 + $0x8] sm:$0xff] %v653_v60   ;;  %689 = vst [vmem:[%s990_s2 + $0x28] sm:$0xff] %v673_v61   ;;  %v722_v3 = vadd.f32 %v721_v63, %v720_v58  ;;  %v746_v7 = vadd.f32 %v745_v0, %v744_v59  ;;  %v548_v22 = vadd.f32 %v547_v15, %v533_v9 }
  0xf6   :  { %v723_v4 = vpop.f32.mrf.mxu0  ;;  %v747_v5 = vpop.f32.mrf.mxu1 }
  0xf7   :  { %v534_v16 = vmul.f32 %v722_v3, %v722_v3  ;;  %v509_v26 = vadd.f32 %v722_v3, %v508_v19  ;;  %v542_v60 = vmul.f32 %v746_v7, %v746_v7 }
  0xf8   :  { %v724_v10 = vpop.f32.mrf.mxu0  ;;  %v748_v11 = vpop.f32.mrf.mxu1 }
  0xf9   :  { %v725_v13 = vadd.f32 %v724_v10, %v723_v4  ;;  %v749_v14 = vadd.f32 %v748_v11, %v747_v5  ;;  %v549_v28 = vadd.f32 %v548_v22, %v534_v16 }
  0xfa   :  { %v726_v17 = vpop.f32.mrf.mxu0  ;;  %v750_v18 = vpop.f32.mrf.mxu1 }
  0xfb   :  { %v658_v20 = vpack.c.bf16 %v725_v13, %v722_v3  ;;  %v678_v21 = vpack.c.bf16 %v749_v14, %v746_v7  ;;  %v535_v23 = vmul.f32 %v725_v13, %v725_v13  ;;  %v510_v31 = vadd.f32 %v725_v13, %v509_v26 }
  0xfc   :  { %v727_v24 = vpop.f32.mrf.mxu0  ;;  %v751_v25 = vpop.f32.mrf.mxu1  ;;  %v543_v0 = vmul.f32 %v749_v14, %v749_v14 }
  0xfd   :  { %686 = vst [vmem:[%s990_s2 + $0x10] sm:$0xff] %v658_v20   ;;  %v728_v27 = vadd.f32 %v727_v24, %v726_v17  ;;  %690 = vst [vmem:[%s990_s2 + $0x30] sm:$0xff] %v678_v21   ;;  %v752_v33 = vadd.f32 %v751_v25, %v750_v18  ;;  %v550_v34 = vadd.f32 %v549_v28, %v535_v23 }
  0xfe   :  { %v729_v29 = vpop.f32.mrf.mxu0  ;;  %v753_v30 = vpop.f32.mrf.mxu1 }
  0xff   :  { %v536_v32 = vmul.f32 %v728_v27, %v728_v27  ;;  %v511_v37 = vadd.f32 %v728_v27, %v510_v31  ;;  %v544_v3 = vmul.f32 %v752_v33, %v752_v33 }
 0x100   :  { %v730_v35 = vpop.f32.mrf.mxu0  ;;  %v754_v36 = vpop.f32.mrf.mxu1 }
 0x101   :  { %v731_v39 = vadd.f32 %v730_v35, %v729_v29  ;;  %v755_v40 = vadd.f32 %v754_v36, %v753_v30  ;;  %v551_v41 = vadd.f32 %v550_v34, %v536_v32 }
 0x103   :  { %v663_v42 = vpack.c.bf16 %v731_v39, %v728_v27  ;;  %v512_v44 = vadd.f32 %v731_v39, %v511_v37  ;;  %v537_v45 = vmul.f32 %v731_v39, %v731_v39  ;;  %v683_v46 = vpack.c.bf16 %v755_v40, %v752_v33 }
 0x104   :  { %v545_v6 = vmul.f32 %v755_v40, %v755_v40 }
 0x105   :  { %687 = vst [vmem:[%s990_s2 + $0x18] sm:$0xff] %v663_v42   ;;  %v513_v48 = vadd.f32 %v934_v38, %v512_v44  ;;  %v552_v49 = vadd.f32 %v551_v41, %v537_v45  ;;  %691 = vst [vmem:[%s990_s2 + $0x38] sm:$0xff] %v683_v46   ;;  %v541_v38 = vmul.f32 %v948_v57, %v948_v57 }
 0x107   :  { %v514_v51 = vadd.f32 %v936_v43, %v513_v48  ;;  %v553_v53 = vadd.f32 %v552_v49, %v538_v47 }
 0x109   :  { %v554_v55 = vadd.f32 %v553_v53, %v539_v50  ;;  %v515_v56 = vadd.f32 %v946_v52, %v514_v51 }
 0x10b   :  { %v516_v58 = vadd.f32 %v948_v57, %v515_v56  ;;  %v555_v59 = vadd.f32 %v554_v55, %v540_v54 }
 0x10d   :  { %v517_v61 = vadd.f32 %v746_v7, %v516_v58  ;;  %v556_v62 = vadd.f32 %v555_v59, %v541_v38 }
 0x10f   :  { %v518_v63 = vadd.f32 %v749_v14, %v517_v61  ;;  %v557_v1 = vadd.f32 %v556_v62, %v542_v60 }
 0x111   :  { %v558_v43 = vadd.f32 %v557_v1, %v543_v0  ;;  %v519_v2 = vadd.f32 %v752_v33, %v518_v63 }
 0x113   :  { %v559_v4 = vadd.f32 %v558_v43, %v544_v3  ;;  %v520_v5 = vadd.f32 %v755_v40, %v519_v2 }
 0x115   :  { %v521_v8 = vrot.slane %v520_v5, 4  ;;  %v560_v52 = vadd.f32 %v559_v4, %v545_v6 }
 0x117   :  { %v522_v9 = vadd.f32 %v521_v8, %v520_v5  ;;  %v561_v10 = vrot.slane %v560_v52, 4 }
 0x119   :  { %v523_v11 = vrot.slane %v522_v9, 2  ;;  %v562_v12 = vadd.f32 %v561_v10, %v560_v52 }
 0x11b   :  { %v524_v57 = vadd.f32 %v523_v11, %v522_v9  ;;  %v563_v13 = vrot.slane %v562_v12, 2 }
 0x11d   :  { %v525_v15 = vrot.slane %v524_v57, 1  ;;  %v564_v7 = vadd.f32 %v563_v13, %v562_v12 }
 0x11f   :  { %v526_v16 = vadd.f32 %v525_v15, %v524_v57  ;;  %v565_v17 = vrot.slane %v564_v7, 1 }
 0x121   :  { %v566_v14 = vadd.f32 %v565_v17, %v564_v7  ;;  %528 = vst [vmem:[%s991_s3] sm:$0xff] %v526_v16 }
 0x123   :  { %568 = vst [vmem:[%s992_s4] sm:$0xff] %v566_v14 }

// kernel: resnet_generator_forward.41
= control target key start
LH: loop header
LB: loop body
LE: loop exit
PB: predicated region body
PF: predicated region fallthrough
CT: control target
= control target key end

     0   :  { %v47_v0 = vlaneseq  ;;  %s511_s0 = inlined_call_operand.vmem [shape: bf16[128,128], index: 0, kind: input, shape index: {}]   ;;  %s512_s1 = inlined_call_operand.vmem [shape: f32[8,128], index: 1, kind: input, shape index: {}]   ;;  %s513_s2 = inlined_call_operand.vmem [shape: bf16[128,128], index: 2, kind: input, shape index: {}]   ;;  %s514_s3 = inlined_call_operand.vmem [shape: bf16[128,128], index: 3, kind: output, shape index: {}]  }
   0x1   :  { %v252_v1 = vld [vmem:[%s511_s0] sm:$0xff]   ;;  %v355_v8 = vld [vmem:[%s511_s0 + $0x8] sm:$0xff]   ;;  %v356_v10 = vld [vmem:[%s511_s0 + $0x10] sm:$0xff]  }
   0x2   :  { %v46_v2 = vld [vmem:[%s512_s1] sm:$0xff]  ;;  %v253_v4 = vunpack.c.l.bf16 %v252_v1  ;;  %v254_v5 = vunpack.c.h.bf16 %v252_v1  ;;  %v48_v6 = vshrl.u32 %v47_v0, 7  ;;  %v362_v9 = vld [vmem:[%s513_s2 + $0x8] sm:$0xff]   ;;  %v257_v12 = vunpack.c.l.bf16 %v355_v8  ;;  %v363_v15 = vld [vmem:[%s513_s2 + $0x10] sm:$0xff]  }
   0x3   :  { %v284_v3 = vld [vmem:[%s513_s2] sm:$0xff]   ;;  %v258_v13 = vunpack.c.h.bf16 %v355_v8  ;;  %v289_v14 = vunpack.c.l.bf16 %v362_v9  ;;  %v357_v16 = vld [vmem:[%s511_s0 + $0x18] sm:$0xff]   ;;  %v290_v20 = vunpack.c.h.bf16 %v362_v9  ;;  %v261_v21 = vunpack.c.l.bf16 %v356_v10  ;;  %v359_v56 = vld [vmem:[%s511_s0 + $0x28] sm:$0xff]  }
   0x4   :  { %v285_v7 = vunpack.c.l.bf16 %v284_v3  ;;  %v286_v11 = vunpack.c.h.bf16 %v284_v3  ;;  %v364_v17 = vld [vmem:[%s513_s2 + $0x18] sm:$0xff]   ;;  %v49_v18 = vsub.s32 0, %v48_v6  ;;  %v69_v19 = vsub.s32 1, %v48_v6  ;;  %v358_v22 = vld [vmem:[%s511_s0 + $0x20] sm:$0xff]   ;;  %v366_v61 = vld [vmem:[%s513_s2 + $0x28] sm:$0xff]  }
   0x5   :  { %v429_v23 = vld [vmem:[%s513_s2 + $0x20] sm:$0xff]   ;;  %v262_v24 = vunpack.c.h.bf16 %v356_v10  ;;  %v293_v25 = vunpack.c.l.bf16 %v363_v15  ;;  %v294_v26 = vunpack.c.h.bf16 %v363_v15  ;;  %v265_v27 = vunpack.c.l.bf16 %v357_v16 }
   0x6   :  { %v431_v28 = vrot.slane %v46_v2, %v49_v18  ;;  %v433_v29 = vrot.slane %v46_v2, %v69_v19  ;;  %v266_v30 = vunpack.c.h.bf16 %v357_v16  ;;  %v297_v31 = vunpack.c.l.bf16 %v364_v17  ;;  %v360_v2 = vld [vmem:[%s511_s0 + $0x30] sm:$0xff]   ;;  %v361_v16 = vld [vmem:[%s511_s0 + $0x38] sm:$0xff]  }
   0x7   :  { %v298_v32 = vunpack.c.h.bf16 %v364_v17  ;;  %v269_v33 = vunpack.c.l.bf16 %v358_v22  ;;  %v270_v34 = vunpack.c.h.bf16 %v358_v22  ;;  %v301_v35 = vunpack.c.l.bf16 %v429_v23 }
   0x8   :  { %v51_v36 = vmul.f32 %v253_v4, %v431_v28  ;;  %v52_v37 = vmul.f32 %v254_v5, %v431_v28  ;;  %v53_v38 = vmul.f32 %v257_v12, %v431_v28  ;;  %v54_v39 = vmul.f32 %v258_v13, %v431_v28 }
   0x9   :  { %v55_v40 = vmul.f32 %v261_v21, %v431_v28  ;;  %v56_v41 = vmul.f32 %v262_v24, %v431_v28  ;;  %v57_v42 = vmul.f32 %v265_v27, %v431_v28  ;;  %v58_v43 = vmul.f32 %v266_v30, %v431_v28  ;;  %v368_v21 = vld [vmem:[%s513_s2 + $0x38] sm:$0xff]  }
   0xa   :  { %v71_v44 = vadd.f32 %v433_v29, %v51_v36  ;;  %v72_v45 = vadd.f32 %v433_v29, %v52_v37  ;;  %v73_v46 = vadd.f32 %v433_v29, %v53_v38  ;;  %v74_v47 = vadd.f32 %v433_v29, %v54_v39 }
   0xb   :  { %v75_v48 = vadd.f32 %v433_v29, %v55_v40  ;;  %v76_v49 = vadd.f32 %v433_v29, %v56_v41  ;;  %v77_v50 = vadd.f32 %v433_v29, %v57_v42  ;;  %v78_v51 = vadd.f32 %v433_v29, %v58_v43 }
   0xc   :  { %v119_v52 = vadd.f32 %v285_v7, %v71_v44  ;;  %v120_v53 = vadd.f32 %v286_v11, %v72_v45  ;;  %v121_v54 = vadd.f32 %v289_v14, %v73_v46  ;;  %v122_v55 = vadd.f32 %v290_v20, %v74_v47  ;;  %v367_v7 = vld [vmem:[%s513_s2 + $0x30] sm:$0xff]  }
   0xd   :  { %v123_v57 = vadd.f32 %v293_v25, %v75_v48  ;;  %v124_v58 = vadd.f32 %v294_v26, %v76_v49  ;;  %v125_v59 = vadd.f32 %v297_v31, %v77_v50  ;;  %v126_v60 = vadd.f32 %v298_v32, %v78_v51 }
   0xe   :  { %v318_v62 = vpack.c.bf16 %v120_v53, %v119_v52  ;;  %v323_v63 = vpack.c.bf16 %v122_v55, %v121_v54  ;;  %v59_v0 = vmul.f32 %v269_v33, %v431_v28  ;;  %v60_v1 = vmul.f32 %v270_v34, %v431_v28 }
   0xf   :  { %v328_v3 = vpack.c.bf16 %v124_v58, %v123_v57  ;;  %v333_v4 = vpack.c.bf16 %v126_v60, %v125_v59  ;;  %v302_v5 = vunpack.c.h.bf16 %v429_v23  ;;  %v273_v6 = vunpack.c.l.bf16 %v359_v56 }
  0x10   :  { %319 = vst [vmem:[%s514_s3] sm:$0xff] %v318_v62   ;;  %369 = vst [vmem:[%s514_s3 + $0x8] sm:$0xff] %v323_v63   ;;  %v79_v8 = vadd.f32 %v433_v29, %v59_v0  ;;  %v80_v9 = vadd.f32 %v433_v29, %v60_v1  ;;  %v274_v10 = vunpack.c.h.bf16 %v359_v56  ;;  %v305_v11 = vunpack.c.l.bf16 %v366_v61 }
  0x11   :  { %370 = vst [vmem:[%s514_s3 + $0x10] sm:$0xff] %v328_v3   ;;  %371 = vst [vmem:[%s514_s3 + $0x18] sm:$0xff] %v333_v4   ;;  %v61_v12 = vmul.f32 %v273_v6, %v431_v28  ;;  %v306_v13 = vunpack.c.h.bf16 %v366_v61  ;;  %v277_v14 = vunpack.c.l.bf16 %v360_v2  ;;  %v278_v15 = vunpack.c.h.bf16 %v360_v2 }
  0x12   :  { %v127_v17 = vadd.f32 %v301_v35, %v79_v8  ;;  %v128_v18 = vadd.f32 %v302_v5, %v80_v9  ;;  %v62_v19 = vmul.f32 %v274_v10, %v431_v28  ;;  %v309_v20 = vunpack.c.l.bf16 %v367_v7 }
  0x13   :  { %v81_v22 = vadd.f32 %v433_v29, %v61_v12  ;;  %v63_v23 = vmul.f32 %v277_v14, %v431_v28  ;;  %v64_v24 = vmul.f32 %v278_v15, %v431_v28  ;;  %v310_v25 = vunpack.c.h.bf16 %v367_v7 }
  0x14   :  { %v338_v26 = vpack.c.bf16 %v128_v18, %v127_v17  ;;  %v82_v27 = vadd.f32 %v433_v29, %v62_v19  ;;  %v281_v30 = vunpack.c.l.bf16 %v361_v16  ;;  %v282_v31 = vunpack.c.h.bf16 %v361_v16 }
  0x15   :  { %v129_v32 = vadd.f32 %v305_v11, %v81_v22  ;;  %v83_v33 = vadd.f32 %v433_v29, %v63_v23  ;;  %v84_v34 = vadd.f32 %v433_v29, %v64_v24  ;;  %v313_v35 = vunpack.c.l.bf16 %v368_v21 }
  0x16   :  { %372 = vst [vmem:[%s514_s3 + $0x20] sm:$0xff] %v338_v26   ;;  %v130_v36 = vadd.f32 %v306_v13, %v82_v27  ;;  %v65_v37 = vmul.f32 %v281_v30, %v431_v28  ;;  %v66_v38 = vmul.f32 %v282_v31, %v431_v28  ;;  %v314_v39 = vunpack.c.h.bf16 %v368_v21 }
  0x17   :  { %v131_v40 = vadd.f32 %v309_v20, %v83_v33  ;;  %v132_v41 = vadd.f32 %v310_v25, %v84_v34 }
  0x18   :  { %v343_v42 = vpack.c.bf16 %v130_v36, %v129_v32  ;;  %v85_v43 = vadd.f32 %v433_v29, %v65_v37  ;;  %v86_v44 = vadd.f32 %v433_v29, %v66_v38 }
  0x19   :  { %v348_v45 = vpack.c.bf16 %v132_v41, %v131_v40 }
  0x1a   :  { %373 = vst [vmem:[%s514_s3 + $0x28] sm:$0xff] %v343_v42   ;;  %v133_v46 = vadd.f32 %v313_v35, %v85_v43  ;;  %v134_v47 = vadd.f32 %v314_v39, %v86_v44 }
  0x1b   :  { %374 = vst [vmem:[%s514_s3 + $0x30] sm:$0xff] %v348_v45  }
  0x1c   :  { %v353_v28 = vpack.c.bf16 %v134_v47, %v133_v46 }
  0x1e   :  { %375 = vst [vmem:[%s514_s3 + $0x38] sm:$0xff] %v353_v28  }

// kernel: resnet_generator_forward.38
= control target key start
LH: loop header
LB: loop body
LE: loop exit
PB: predicated region body
PF: predicated region fallthrough
CT: control target
= control target key end

     0   :  { %s1301_s1 = inlined_call_operand.vmem [shape: bf16[384,128], index: 1, kind: input, shape index: {}]   ;;  %s1302_s0 = inlined_call_operand.vmem [shape: bf16[128,384], index: 0, kind: input, shape index: {}]   ;;  %s1303_s2 = inlined_call_operand.vmem [shape: bf16[128,128], index: 2, kind: output, shape index: {0}]   ;;  %s1304_s3 = inlined_call_operand.vmem [shape: f32[8,128], index: 3, kind: output, shape index: {1}]   ;;  %s1305_s4 = inlined_call_operand.vmem [shape: f32[8,128], index: 4, kind: output, shape index: {2}]  }
   0x1   :  { %v1046_v0 = vld [vmem:[%s1301_s1 + $0x78] sm:$0xff]   ;;  %v1049_v3 = vld [vmem:[%s1301_s1 + $0x70] sm:$0xff]   ;;  %v1052_v6 = vld [vmem:[%s1301_s1 + $0x68] sm:$0xff]  }
   0x2   :  { %v1047_v1 = vld [vmem:[%s1301_s1 + $0x38] sm:$0xff]   ;;  %933 = vmatprep.subr.bf16.mxu0 %v1046_v0  ;;  %v1050_v4 = vld [vmem:[%s1301_s1 + $0x30] sm:$0xff]   ;;  %v1053_v7 = vld [vmem:[%s1301_s1 + $0x28] sm:$0xff]  }
   0x3   :  { %v1048_v2 = vld [vmem:[%s1301_s1 + $0xb8] sm:$0xff]   ;;  %934 = vmatpush3.bf16.msra.mxu0 %v1047_v1  ;;  %v1051_v5 = vld [vmem:[%s1301_s1 + $0xb0] sm:$0xff]   ;;  %v1054_v8 = vld [vmem:[%s1301_s1 + $0xa8] sm:$0xff]  }
   0x4   :  { %1013 = vmatprep.subr.bf16.mxu1 %v1048_v2  ;;  %935 = vmatprep.subr.bf16.mxu0 %v1049_v3  ;;  %v1055_v9 = vld [vmem:[%s1301_s1 + $0x60] sm:$0xff]   ;;  %v1058_v12 = vld [vmem:[%s1301_s1 + $0x58] sm:$0xff]   ;;  %v1061_v15 = vld [vmem:[%s1301_s1 + $0x50] sm:$0xff]  }
   0x5   :  { %1014 = vmatpush3.bf16.msra.mxu1 %v1048_v2  ;;  %v1056_v10 = vld [vmem:[%s1301_s1 + $0x20] sm:$0xff]   ;;  %v1060_v13 = vld [vmem:[%s1301_s1 + $0x98] sm:$0xff]   ;;  %v1063_v16 = vld [vmem:[%s1301_s1 + $0x90] sm:$0xff]  }
   0x6   :  { %1015 = vmatprep.subr.bf16.mxu1 %v1051_v5  ;;  %v1057_v11 = vld [vmem:[%s1301_s1 + $0xa0] sm:$0xff]   ;;  %v1059_v14 = vld [vmem:[%s1301_s1 + $0x18] sm:$0xff]   ;;  %v1062_v17 = vld [vmem:[%s1301_s1 + $0x10] sm:$0xff]  }
   0x7   :  { %936 = vmatpush3.bf16.msra.mxu0 %v1050_v4  ;;  %v1064_v18 = vld [vmem:[%s1301_s1 + $0x48] sm:$0xff]   ;;  %v1067_v21 = vld [vmem:[%s1301_s1 + $0x40] sm:$0xff]   ;;  %v1082_v32 = vld [vmem:[%s1302_s0 + $0x50] ss:$12 sps:$4 sm:$0xff]  }
   0x8   :  { %937 = vmatprep.subr.bf16.mxu0 %v1052_v6  ;;  %v1065_v19 = vld [vmem:[%s1301_s1 + $0x8] sm:$0xff]   ;;  %v1069_v22 = vld [vmem:[%s1301_s1 + $0x80] sm:$0xff]   ;;  %v1080_v34 = vld [vmem:[%s1302_s0 + $0x30] ss:$12 sps:$4 sm:$0xff]  }
   0x9   :  { %1016 = vmatpush3.bf16.msra.mxu1 %v1051_v5  ;;  %v1066_v20 = vld [vmem:[%s1301_s1 + $0x88] sm:$0xff]   ;;  %v1072_v23 = vld [vmem:[%s1302_s0 + $0x4] ss:$12 sps:$4 sm:$0xff]   ;;  %v1078_v31 = vld [vmem:[%s1302_s0 + $0x34] ss:$12 sps:$4 sm:$0xff]  }
   0xa   :  { %1017 = vmatprep.subr.bf16.mxu1 %v1054_v8  ;;  %v1073_v24 = vld [vmem:[%s1302_s0 + $0x8] ss:$12 sps:$4 sm:$0xff]   ;;  %v1068_v25 = vld [vmem:[%s1301_s1] sm:$0xff]   ;;  %437 = vmatprep.mubr.bf16.mxu0 %v1072_v23  ;;  %v1083_v35 = vld [vmem:[%s1302_s0 + $0x4c] ss:$12 sps:$4 sm:$0xff]  }
   0xb   :  { %938 = vmatpush3.bf16.msra.mxu0 %v1053_v7  ;;  %1029 = vmatprep.mubr.bf16.mxu1 %v1073_v24  ;;  %v1070_v26 = vld [vmem:[%s1302_s0] ss:$12 sps:$4 sm:$0xff]   ;;  %v1075_v27 = vld [vmem:[%s1302_s0 + $0x1c] ss:$12 sps:$4 sm:$0xff]   ;;  %v1081_v29 = vld [vmem:[%s1302_s0 + $0x38] ss:$12 sps:$4 sm:$0xff]  }
   0xc   :  { %939 = vmatprep.subr.bf16.mxu0 %v1055_v9  ;;  %v1074_v28 = vld [vmem:[%s1302_s0 + $0x20] ss:$12 sps:$4 sm:$0xff]   ;;  %v1077_v30 = vld [vmem:[%s1302_s0 + $0x18] ss:$12 sps:$4 sm:$0xff]   ;;  %v1089_v33 = vld [vmem:[%s1302_s0 + $0x68] ss:$12 sps:$4 sm:$0xff]  }
   0xd   :  { %1018 = vmatpush3.bf16.msra.mxu1 %v1054_v8  ;;  %v1090_v36 = vld [vmem:[%s1302_s0 + $0x80] ss:$12 sps:$4 sm:$0xff]   ;;  %v1096_v37 = vld [vmem:[%s1302_s0 + $0x98] ss:$12 sps:$4 sm:$0xff]   ;;  %v1085_v38 = vld [vmem:[%s1302_s0 + $0x48] ss:$12 sps:$4 sm:$0xff]  }
   0xe   :  { %1019 = vmatprep.subr.bf16.mxu1 %v1057_v11  ;;  %v1086_v39 = vld [vmem:[%s1302_s0 + $0x64] ss:$12 sps:$4 sm:$0xff]   ;;  %v1088_v41 = vld [vmem:[%s1302_s0 + $0x60] ss:$12 sps:$4 sm:$0xff]   ;;  %v1091_v42 = vld [vmem:[%s1302_s0 + $0x7c] ss:$12 sps:$4 sm:$0xff]  }
   0xf   :  { %940 = vmatpush3.bf16.msra.mxu0 %v1056_v10  ;;  %v1098_v40 = vld [vmem:[%s1302_s0 + $0xb0] ss:$12 sps:$4 sm:$0xff]   ;;  %v1093_v43 = vld [vmem:[%s1302_s0 + $0x78] ss:$12 sps:$4 sm:$0xff]   ;;  %v1094_v44 = vld [vmem:[%s1302_s0 + $0x94] ss:$12 sps:$4 sm:$0xff]  }
  0x10   :  { %941 = vmatprep.subr.bf16.mxu0 %v1058_v12  ;;  %v1097_v45 = vld [vmem:[%s1302_s0 + $0x90] ss:$12 sps:$4 sm:$0xff]   ;;  %v1099_v46 = vld [vmem:[%s1302_s0 + $0xac] ss:$12 sps:$4 sm:$0xff]   ;;  %v1101_v47 = vld [vmem:[%s1302_s0 + $0xa8] ss:$12 sps:$4 sm:$0xff]  }
  0x11   :  { %1020 = vmatpush3.bf16.msra.mxu1 %v1057_v11 }
  0x12   :  { %1021 = vmatprep.subr.bf16.mxu1 %v1060_v13 }
  0x13   :  { %942 = vmatpush3.bf16.msra.mxu0 %v1059_v14 }
  0x14   :  { %943 = vmatprep.subr.bf16.mxu0 %v1061_v15 }
  0x15   :  { %1022 = vmatpush3.bf16.msra.mxu1 %v1060_v13 }
  0x16   :  { %1023 = vmatprep.subr.bf16.mxu1 %v1063_v16 }
  0x17   :  { %944 = vmatpush3.bf16.msra.mxu0 %v1062_v17 }
  0x18   :  { %945 = vmatprep.subr.bf16.mxu0 %v1064_v18 }
  0x19   :  { %1024 = vmatpush3.bf16.msra.mxu1 %v1063_v16 }
  0x1a   :  { %1025 = vmatprep.subr.bf16.mxu1 %v1066_v20 }
  0x1b   :  { %946 = vmatpush3.bf16.msra.mxu0 %v1065_v19 }
  0x1c   :  { %947 = vmatprep.subr.bf16.mxu0 %v1067_v21 }
  0x1d   :  { %1026 = vmatpush3.bf16.msra.mxu1 %v1066_v20 }
  0x1e   :  { %1027 = vmatprep.subr.bf16.mxu1 %v1069_v22 }
  0x1f   :  { %948 = vmatpush3.bf16.msra.mxu0 %v1068_v25 }
  0x21   :  { %1028 = vmatpush3.bf16.msra.mxu1 %v1069_v22 }
  0x22   :  { %438 = vmatmul.mubr.bf16.vlgmr.msra.gmra.mxu0 %v1070_v26 }
  0x23   :  { %445 = vmatprep.mubr.bf16.mxu0 %v1075_v27 }
  0x24   :  { %1030 = vmatmul.mubr.bf16.vlgmr.msra.gmra.mxu1 %v1074_v28 }
  0x25   :  { %1033 = vmatprep.mubr.bf16.mxu1 %v1081_v29 }
  0x2a   :  { %446 = vmatmul.mubr.bf16.gmra.mxu0 %v1077_v30 }
  0x2b   :  { %453 = vmatprep.mubr.bf16.mxu0 %v1078_v31 }
  0x2c   :  { %1034 = vmatmul.mubr.bf16.gmra.mxu1 %v1082_v32 }
  0x2d   :  { %1037 = vmatprep.mubr.bf16.mxu1 %v1089_v33 }
  0x32   :  { %454 = vmatmul.mubr.bf16.gmra.mxu0 %v1080_v34 }
  0x33   :  { %461 = vmatprep.mubr.bf16.mxu0 %v1083_v35 }
  0x34   :  { %1038 = vmatmul.mubr.bf16.gmra.mxu1 %v1090_v36 }
  0x35   :  { %1041 = vmatprep.mubr.bf16.mxu1 %v1096_v37 }
  0x3a   :  { %462 = vmatmul.mubr.bf16.gmra.mxu0 %v1085_v38 }
  0x3b   :  { %469 = vmatprep.mubr.bf16.mxu0 %v1086_v39 }
  0x3c   :  { %1042 = vmatmul.mubr.bf16.gmra.mxu1 %v1098_v40 }
  0x42   :  { %470 = vmatmul.mubr.bf16.gmra.mxu0 %v1088_v41 }
  0x43   :  { %477 = vmatprep.mubr.bf16.mxu0 %v1091_v42 }
  0x4a   :  { %478 = vmatmul.mubr.bf16.gmra.mxu0 %v1093_v43 }
  0x4b   :  { %485 = vmatprep.mubr.bf16.mxu0 %v1094_v44 }
  0x52   :  { %486 = vmatmul.mubr.bf16.gmra.mxu0 %v1097_v45 }
  0x53   :  { %493 = vmatprep.mubr.bf16.mxu0 %v1099_v46 }
  0x5a   :  { %494 = vmatmul.mubr.bf16.gmra.mxu0 %v1101_v47 }
  0xe2   :  { %v949_v48 = vpop.f32.mrf.mxu0 }
  0xe4   :  { %v950_v49 = vpop.f32.mrf.mxu0  ;;  %v1031_v50 = vpop.f32.mrf.mxu1 }
  0xe5   :  { %v951_v53 = vadd.f32 %v950_v49, %v949_v48 }
  0xe6   :  { %v952_v51 = vpop.f32.mrf.mxu0  ;;  %v536_v52 = vpop.f32.mrf.mxu1 }
  0xe7   :  { %v537_v59 = vadd.f32 %v951_v53, %v536_v52 }
  0xe8   :  { %v953_v54 = vpop.f32.mrf.mxu0  ;;  %v1032_v55 = vpop.f32.mrf.mxu1 }
  0xe9   :  { %v954_v56 = vadd.f32 %v953_v54, %v952_v51  ;;  %v755_v36 = vmul.f32 %v537_v59, %v537_v59 }
  0xea   :  { %v955_v57 = vpop.f32.mrf.mxu0  ;;  %v539_v58 = vpop.f32.mrf.mxu1 }
  0xeb   :  { %v540_v60 = vadd.f32 %v954_v56, %v539_v58 }
  0xec   :  { %v956_v61 = vpop.f32.mrf.mxu0  ;;  %v1035_v62 = vpop.f32.mrf.mxu1 }
  0xed   :  { %v889_v63 = vpack.c.bf16 %v540_v60, %v537_v59  ;;  %v957_v1 = vadd.f32 %v956_v61, %v955_v57  ;;  %v756_v33 = vmul.f32 %v540_v60, %v540_v60  ;;  %v731_v40 = vadd.f32 %v540_v60, %v537_v59 }
  0xee   :  { %v958_v0 = vpop.f32.mrf.mxu0  ;;  %v552_v3 = vpop.f32.mrf.mxu1 }
  0xef   :  { %890 = vst [vmem:[%s1303_s2] sm:$0xff] %v889_v63   ;;  %v545_v6 = vadd.f32 %v1031_v50, %v957_v1  ;;  %v771_v42 = vadd.f32 %v756_v33, %v755_v36 }
  0xf0   :  { %v959_v2 = vpop.f32.mrf.mxu0  ;;  %v1036_v9 = vpop.f32.mrf.mxu1 }
  0xf1   :  { %v960_v4 = vadd.f32 %v959_v2, %v958_v0  ;;  %v757_v37 = vmul.f32 %v545_v6, %v545_v6  ;;  %v732_v45 = vadd.f32 %v731_v40, %v545_v6 }
  0xf2   :  { %v961_v5 = vpop.f32.mrf.mxu0  ;;  %v555_v14 = vpop.f32.mrf.mxu1 }
  0xf3   :  { %v548_v7 = vadd.f32 %v1032_v55, %v960_v4  ;;  %v772_v48 = vadd.f32 %v771_v42, %v757_v37 }
  0xf4   :  { %v962_v8 = vpop.f32.mrf.mxu0  ;;  %v1039_v20 = vpop.f32.mrf.mxu1 }
  0xf5   :  { %v894_v10 = vpack.c.bf16 %v548_v7, %v545_v6  ;;  %v963_v12 = vadd.f32 %v962_v8, %v961_v5  ;;  %v758_v43 = vmul.f32 %v548_v7, %v548_v7  ;;  %v733_v51 = vadd.f32 %v732_v45, %v548_v7 }
  0xf6   :  { %v964_v11 = vpop.f32.mrf.mxu0  ;;  %v568_v25 = vpop.f32.mrf.mxu1 }
  0xf7   :  { %926 = vst [vmem:[%s1303_s2 + $0x8] sm:$0xff] %v894_v10   ;;  %v553_v17 = vadd.f32 %v963_v12, %v552_v3  ;;  %v773_v53 = vadd.f32 %v772_v48, %v758_v43 }
  0xf8   :  { %v965_v13 = vpop.f32.mrf.mxu0  ;;  %v1040_v31 = vpop.f32.mrf.mxu1 }
  0xf9   :  { %v966_v15 = vadd.f32 %v965_v13, %v964_v11  ;;  %v759_v49 = vmul.f32 %v553_v17, %v553_v17  ;;  %v734_v57 = vadd.f32 %v733_v51, %v553_v17 }
  0xfa   :  { %v967_v16 = vpop.f32.mrf.mxu0  ;;  %v571_v39 = vpop.f32.mrf.mxu1 }
  0xfb   :  { %v556_v18 = vadd.f32 %v966_v15, %v555_v14  ;;  %v774_v59 = vadd.f32 %v773_v53, %v759_v49 }
  0xfc   :  { %v968_v19 = vpop.f32.mrf.mxu0  ;;  %v1043_v56 = vpop.f32.mrf.mxu1 }
  0xfd   :  { %v899_v21 = vpack.c.bf16 %v556_v18, %v553_v17  ;;  %v969_v23 = vadd.f32 %v968_v19, %v967_v16  ;;  %v760_v54 = vmul.f32 %v556_v18, %v556_v18 }
  0xfe   :  { %v970_v22 = vpop.f32.mrf.mxu0  ;;  %v584_v3 = vpop.f32.mrf.mxu1 }
  0xff   :  { %927 = vst [vmem:[%s1303_s2 + $0x10] sm:$0xff] %v899_v21   ;;  %v561_v28 = vadd.f32 %v1035_v62, %v969_v23  ;;  %v735_v62 = vadd.f32 %v734_v57, %v556_v18  ;;  %v775_v0 = vadd.f32 %v774_v59, %v760_v54 }
 0x100   :  { %v971_v24 = vpop.f32.mrf.mxu0  ;;  %v1044_v16 = vpop.f32.mrf.mxu1 }
 0x101   :  { %v972_v26 = vadd.f32 %v971_v24, %v970_v22  ;;  %v761_v60 = vmul.f32 %v561_v28, %v561_v28  ;;  %v736_v4 = vadd.f32 %v735_v62, %v561_v28 }
 0x102   :  { %v973_v27 = vpop.f32.mrf.mxu0 }
 0x103   :  { %v564_v29 = vadd.f32 %v1036_v9, %v972_v26  ;;  %v776_v7 = vadd.f32 %v775_v0, %v761_v60 }
 0x104   :  { %v974_v30 = vpop.f32.mrf.mxu0 }
 0x105   :  { %v904_v32 = vpack.c.bf16 %v564_v29, %v561_v28  ;;  %v975_v35 = vadd.f32 %v974_v30, %v973_v27  ;;  %v762_v1 = vmul.f32 %v564_v29, %v564_v29  ;;  %v737_v10 = vadd.f32 %v736_v4, %v564_v29 }
 0x106   :  { %v976_v34 = vpop.f32.mrf.mxu0 }
 0x107   :  { %928 = vst [vmem:[%s1303_s2 + $0x18] sm:$0xff] %v904_v32   ;;  %v569_v46 = vadd.f32 %v975_v35, %v568_v25  ;;  %v777_v13 = vadd.f32 %v776_v7, %v762_v1  ;;  %v587_v25 = vpop.f32.mrf.mxu1 }
 0x108   :  { %v977_v38 = vpop.f32.mrf.mxu0 }
 0x109   :  { %v978_v41 = vadd.f32 %v977_v38, %v976_v34  ;;  %v763_v8 = vmul.f32 %v569_v46, %v569_v46  ;;  %v738_v17 = vadd.f32 %v737_v10, %v569_v46 }
 0x10a   :  { %v979_v44 = vpop.f32.mrf.mxu0 }
 0x10b   :  { %v572_v47 = vadd.f32 %v978_v41, %v571_v39  ;;  %v778_v18 = vadd.f32 %v777_v13, %v763_v8 }
 0x10c   :  { %v980_v50 = vpop.f32.mrf.mxu0 }
 0x10d   :  { %v909_v52 = vpack.c.bf16 %v572_v47, %v569_v46  ;;  %v981_v58 = vadd.f32 %v980_v50, %v979_v44  ;;  %v764_v14 = vmul.f32 %v572_v47, %v572_v47 }
 0x10e   :  { %v982_v55 = vpop.f32.mrf.mxu0 }
 0x10f   :  { %929 = vst [vmem:[%s1303_s2 + $0x20] sm:$0xff] %v909_v52   ;;  %v577_v5 = vadd.f32 %v1039_v20, %v981_v58  ;;  %v739_v20 = vadd.f32 %v738_v17, %v572_v47  ;;  %v779_v24 = vadd.f32 %v778_v18, %v764_v14 }
 0x110   :  { %v983_v61 = vpop.f32.mrf.mxu0 }
 0x111   :  { %v984_v63 = vadd.f32 %v983_v61, %v982_v55  ;;  %v765_v19 = vmul.f32 %v577_v5, %v577_v5  ;;  %v740_v27 = vadd.f32 %v739_v20, %v577_v5 }
 0x112   :  { %v985_v2 = vpop.f32.mrf.mxu0 }
 0x113   :  { %v580_v6 = vadd.f32 %v1040_v31, %v984_v63  ;;  %v780_v30 = vadd.f32 %v779_v24, %v765_v19 }
 0x114   :  { %v986_v9 = vpop.f32.mrf.mxu0 }
 0x115   :  { %v914_v11 = vpack.c.bf16 %v580_v6, %v577_v5  ;;  %v987_v12 = vadd.f32 %v986_v9, %v985_v2  ;;  %v766_v28 = vmul.f32 %v580_v6, %v580_v6  ;;  %v741_v32 = vadd.f32 %v740_v27, %v580_v6 }
 0x116   :  { %v988_v15 = vpop.f32.mrf.mxu0 }
 0x117   :  { %930 = vst [vmem:[%s1303_s2 + $0x28] sm:$0xff] %v914_v11   ;;  %v585_v22 = vadd.f32 %v987_v12, %v584_v3  ;;  %v781_v38 = vadd.f32 %v780_v30, %v766_v28 }
 0x118   :  { %v989_v21 = vpop.f32.mrf.mxu0 }
 0x119   :  { %v990_v23 = vadd.f32 %v989_v21, %v988_v15  ;;  %v767_v33 = vmul.f32 %v585_v22, %v585_v22  ;;  %v742_v37 = vadd.f32 %v741_v32, %v585_v22 }
 0x11a   :  { %v991_v26 = vpop.f32.mrf.mxu0 }
 0x11b   :  { %v588_v29 = vadd.f32 %v990_v23, %v587_v25  ;;  %v782_v42 = vadd.f32 %v781_v38, %v767_v33 }
 0x11c   :  { %v992_v31 = vpop.f32.mrf.mxu0 }
 0x11d   :  { %v919_v34 = vpack.c.bf16 %v588_v29, %v585_v22  ;;  %v993_v35 = vadd.f32 %v992_v31, %v991_v26  ;;  %v768_v39 = vmul.f32 %v588_v29, %v588_v29  ;;  %v743_v43 = vadd.f32 %v742_v37, %v588_v29 }
 0x11e   :  { %v994_v36 = vpop.f32.mrf.mxu0 }
 0x11f   :  { %931 = vst [vmem:[%s1303_s2 + $0x30] sm:$0xff] %v919_v34   ;;  %v593_v40 = vadd.f32 %v1043_v56, %v993_v35  ;;  %v783_v46 = vadd.f32 %v782_v42, %v768_v39 }
 0x120   :  { %v995_v41 = vpop.f32.mrf.mxu0 }
 0x121   :  { %v769_v44 = vmul.f32 %v593_v40, %v593_v40  ;;  %v996_v45 = vadd.f32 %v995_v41, %v994_v36  ;;  %v744_v47 = vadd.f32 %v743_v43, %v593_v40 }
 0x123   :  { %v596_v48 = vadd.f32 %v1044_v16, %v996_v45  ;;  %v784_v49 = vadd.f32 %v783_v46, %v769_v44 }
 0x125   :  { %v924_v50 = vpack.c.bf16 %v596_v48, %v593_v40  ;;  %v745_v51 = vadd.f32 %v744_v47, %v596_v48  ;;  %v770_v52 = vmul.f32 %v596_v48, %v596_v48 }
 0x127   :  { %932 = vst [vmem:[%s1303_s2 + $0x38] sm:$0xff] %v924_v50   ;;  %v746_v53 = vrot.slane %v745_v51, 4  ;;  %v785_v54 = vadd.f32 %v784_v49, %v770_v52 }
 0x129   :  { %v747_v55 = vadd.f32 %v746_v53, %v745_v51  ;;  %v786_v56 = vrot.slane %v785_v54, 4 }
 0x12b   :  { %v748_v57 = vrot.slane %v747_v55, 2  ;;  %v787_v58 = vadd.f32 %v786_v56, %v785_v54 }
 0x12d   :  { %v749_v59 = vadd.f32 %v748_v57, %v747_v55  ;;  %v788_v60 = vrot.slane %v787_v58, 2 }
 0x12f   :  { %v750_v61 = vrot.slane %v749_v59, 1  ;;  %v789_v62 = vadd.f32 %v788_v60, %v787_v58 }
 0x131   :  { %v751_v63 = vadd.f32 %v750_v61, %v749_v59  ;;  %v790_v0 = vrot.slane %v789_v62, 1 }
 0x133   :  { %v791_v1 = vadd.f32 %v790_v0, %v789_v62  ;;  %753 = vst [vmem:[%s1304_s3] sm:$0xff] %v751_v63 }
 0x135   :  { %793 = vst [vmem:[%s1305_s4] sm:$0xff] %v791_v1 }

// kernel: resnet_generator_forward.63
= control target key start
LH: loop header
LB: loop body
LE: loop exit
PB: predicated region body
PF: predicated region fallthrough
CT: control target
= control target key end

     0   :  { %v140_v0 = vlaneseq  ;;  %s999_s0 = inlined_call_operand.vmem [shape: bf16[512,128], index: 0, kind: input, shape index: {}]   ;;  %s1000_s1 = inlined_call_operand.vmem [shape: f32[8,128], index: 1, kind: input, shape index: {}]   ;;  %s1001_s2 = inlined_call_operand.vmem [shape: f32[512,128], index: 2, kind: output, shape index: {}]  }
   0x1   :  { %v341_v1 = vld [vmem:[%s999_s0] sm:$0xff]   ;;  %v468_v2 = vld [vmem:[%s999_s0 + $0x8] sm:$0xff]   ;;  %v469_v5 = vld [vmem:[%s999_s0 + $0x10] sm:$0xff]  }
   0x2   :  { %v141_v3 = vshrl.u32 %v140_v0, 7  ;;  %v139_v4 = vld [vmem:[%s1000_s1] sm:$0xff]  ;;  %v342_v6 = vunpack.c.l.bf16 %v341_v1  ;;  %v343_v8 = vunpack.c.h.bf16 %v341_v1  ;;  %v346_v9 = vunpack.c.l.bf16 %v468_v2  ;;  %v470_v11 = vld [vmem:[%s999_s0 + $0x18] sm:$0xff]   ;;  %v472_v22 = vld [vmem:[%s999_s0 + $0x28] sm:$0xff]  }
   0x3   :  { %v347_v10 = vunpack.c.h.bf16 %v468_v2  ;;  %v350_v13 = vunpack.c.l.bf16 %v469_v5  ;;  %v351_v14 = vunpack.c.h.bf16 %v469_v5  ;;  %v471_v15 = vld [vmem:[%s999_s0 + $0x20] sm:$0xff]   ;;  %v354_v19 = vunpack.c.l.bf16 %v470_v11  ;;  %v473_v27 = vld [vmem:[%s999_s0 + $0x30] sm:$0xff]   ;;  %v474_v32 = vld [vmem:[%s999_s0 + $0x38] sm:$0xff]  }
   0x4   :  { %v142_v7 = vsub.s32 0, %v141_v3  ;;  %v355_v21 = vunpack.c.h.bf16 %v470_v11  ;;  %v358_v24 = vunpack.c.l.bf16 %v471_v15  ;;  %v359_v26 = vunpack.c.h.bf16 %v471_v15  ;;  %v475_v37 = vld [vmem:[%s999_s0 + $0x40] sm:$0xff]   ;;  %v476_v42 = vld [vmem:[%s999_s0 + $0x48] sm:$0xff]   ;;  %v477_v47 = vld [vmem:[%s999_s0 + $0x50] sm:$0xff]  }
   0x5   :  { %v362_v29 = vunpack.c.l.bf16 %v472_v22  ;;  %v363_v31 = vunpack.c.h.bf16 %v472_v22  ;;  %v366_v34 = vunpack.c.l.bf16 %v473_v27  ;;  %v367_v36 = vunpack.c.h.bf16 %v473_v27  ;;  %v478_v52 = vld [vmem:[%s999_s0 + $0x58] sm:$0xff]   ;;  %v479_v58 = vld [vmem:[%s999_s0 + $0x60] sm:$0xff]   ;;  %v480_v1 = vld [vmem:[%s999_s0 + $0x68] sm:$0xff]  }
   0x6   :  { %v657_v12 = vrot.slane %v139_v4, %v142_v7  ;;  %v370_v39 = vunpack.c.l.bf16 %v474_v32  ;;  %v371_v41 = vunpack.c.h.bf16 %v474_v32  ;;  %v374_v44 = vunpack.c.l.bf16 %v475_v37 }
   0x7   :  { %v375_v46 = vunpack.c.h.bf16 %v475_v37  ;;  %v378_v49 = vunpack.c.l.bf16 %v476_v42  ;;  %v379_v51 = vunpack.c.h.bf16 %v476_v42  ;;  %v382_v54 = vunpack.c.l.bf16 %v477_v47  ;;  %v485_v37 = vld [vmem:[%s999_s0 + $0x90] sm:$0xff]  }
   0x8   :  { %v144_v16 = vadd.f32 %v342_v6, %v657_v12  ;;  %v145_v17 = vadd.f32 %v343_v8, %v657_v12  ;;  %v146_v18 = vadd.f32 %v346_v9, %v657_v12  ;;  %v147_v20 = vadd.f32 %v347_v10, %v657_v12  ;;  %v481_v8 = vld [vmem:[%s999_s0 + $0x70] sm:$0xff]  }
   0x9   :  { %v148_v23 = vadd.f32 %v350_v13, %v657_v12  ;;  %v149_v25 = vadd.f32 %v351_v14, %v657_v12  ;;  %v150_v28 = vadd.f32 %v354_v19, %v657_v12  ;;  %v151_v30 = vadd.f32 %v355_v21, %v657_v12 }
   0xa   :  { %499 = vtanh.f32 %v144_v16  ;;  %v152_v33 = vadd.f32 %v358_v24, %v657_v12  ;;  %v153_v35 = vadd.f32 %v359_v26, %v657_v12  ;;  %v154_v38 = vadd.f32 %v362_v29, %v657_v12  ;;  %v482_v16 = vld [vmem:[%s999_s0 + $0x78] sm:$0xff]  }
   0xb   :  { %501 = vtanh.f32 %v145_v17  ;;  %v155_v40 = vadd.f32 %v363_v31, %v657_v12  ;;  %v156_v43 = vadd.f32 %v366_v34, %v657_v12  ;;  %v157_v45 = vadd.f32 %v367_v36, %v657_v12 }
   0xc   :  { %503 = vtanh.f32 %v146_v18  ;;  %v158_v48 = vadd.f32 %v370_v39, %v657_v12  ;;  %v159_v50 = vadd.f32 %v371_v41, %v657_v12  ;;  %v160_v53 = vadd.f32 %v374_v44, %v657_v12  ;;  %v486_v44 = vld [vmem:[%s999_s0 + $0x98] sm:$0xff]  }
   0xd   :  { %505 = vtanh.f32 %v147_v20  ;;  %v161_v56 = vadd.f32 %v375_v46, %v657_v12  ;;  %v383_v57 = vunpack.c.h.bf16 %v477_v47  ;;  %v162_v60 = vadd.f32 %v378_v49, %v657_v12 }
   0xe   :  { %507 = vtanh.f32 %v148_v23  ;;  %v386_v61 = vunpack.c.l.bf16 %v478_v52  ;;  %v163_v63 = vadd.f32 %v379_v51, %v657_v12  ;;  %v387_v0 = vunpack.c.h.bf16 %v478_v52  ;;  %v483_v23 = vld [vmem:[%s999_s0 + $0x80] sm:$0xff]  }
   0xf   :  { %509 = vtanh.f32 %v149_v25  ;;  %v164_v3 = vadd.f32 %v382_v54, %v657_v12  ;;  %v390_v4 = vunpack.c.l.bf16 %v479_v58  ;;  %v165_v6 = vadd.f32 %v383_v57, %v657_v12  ;;  %v487_v51 = vld [vmem:[%s999_s0 + $0xa0] sm:$0xff]  }
  0x10   :  { %511 = vtanh.f32 %v150_v28  ;;  %v391_v7 = vunpack.c.h.bf16 %v479_v58  ;;  %v166_v10 = vadd.f32 %v386_v61, %v657_v12  ;;  %v394_v11 = vunpack.c.l.bf16 %v480_v1  ;;  %v488_v58 = vld [vmem:[%s999_s0 + $0xa8] sm:$0xff]  }
  0x11   :  { %513 = vtanh.f32 %v151_v30  ;;  %v167_v14 = vadd.f32 %v387_v0, %v657_v12  ;;  %v395_v15 = vunpack.c.h.bf16 %v480_v1  ;;  %v168_v18 = vadd.f32 %v390_v4, %v657_v12  ;;  %v484_v30 = vld [vmem:[%s999_s0 + $0x88] sm:$0xff]   ;;  %v489_v1 = vld [vmem:[%s999_s0 + $0xb0] sm:$0xff]  }
  0x12   :  { %515 = vtanh.f32 %v152_v33  ;;  %v398_v19 = vunpack.c.l.bf16 %v481_v8  ;;  %v169_v21 = vadd.f32 %v391_v7, %v657_v12  ;;  %v399_v22 = vunpack.c.h.bf16 %v481_v8  ;;  %v490_v8 = vld [vmem:[%s999_s0 + $0xb8] sm:$0xff]  }
  0x13   :  { %517 = vtanh.f32 %v153_v35  ;;  %v170_v25 = vadd.f32 %v394_v11, %v657_v12  ;;  %v402_v26 = vunpack.c.l.bf16 %v482_v16  ;;  %v171_v28 = vadd.f32 %v395_v15, %v657_v12 }
  0x14   :  { %519 = vtanh.f32 %v154_v38  ;;  %v403_v29 = vunpack.c.h.bf16 %v482_v16  ;;  %v172_v32 = vadd.f32 %v398_v19, %v657_v12  ;;  %v406_v33 = vunpack.c.l.bf16 %v483_v23  ;;  %v491_v16 = vld [vmem:[%s999_s0 + $0xc0] sm:$0xff]  }
  0x15   :  { %521 = vtanh.f32 %v155_v40  ;;  %v173_v35 = vadd.f32 %v399_v22, %v657_v12  ;;  %v407_v36 = vunpack.c.h.bf16 %v483_v23  ;;  %v174_v39 = vadd.f32 %v402_v26, %v657_v12  ;;  %v492_v23 = vld [vmem:[%s999_s0 + $0xc8] sm:$0xff]  }
  0x16   :  { %523 = vtanh.f32 %v156_v43  ;;  %v410_v40 = vunpack.c.l.bf16 %v484_v30  ;;  %v175_v42 = vadd.f32 %v403_v29, %v657_v12  ;;  %v411_v43 = vunpack.c.h.bf16 %v484_v30  ;;  %v493_v30 = vld [vmem:[%s999_s0 + $0xd0] sm:$0xff]  }
  0x17   :  { %v500_v55 = vpop.eup %499  ;;  %525 = vtanh.f32 %v157_v45  ;;  %v176_v46 = vadd.f32 %v406_v33, %v657_v12  ;;  %v414_v47 = vunpack.c.l.bf16 %v485_v37  ;;  %v177_v49 = vadd.f32 %v407_v36, %v657_v12 }
  0x18   :  { %v502_v59 = vpop.eup %501  ;;  %272 = vst [vmem:[%s1001_s2] sm:$0xff] %v500_v55  ;;  %527 = vtanh.f32 %v158_v48  ;;  %v418_v54 = vunpack.c.l.bf16 %v486_v44  ;;  %v419_v57 = vunpack.c.h.bf16 %v486_v44  ;;  %v422_v61 = vunpack.c.l.bf16 %v487_v51  ;;  %v495_v44 = vld [vmem:[%s999_s0 + $0xe0] sm:$0xff]  }
  0x19   :  { %v504_v62 = vpop.eup %503  ;;  %273 = vst [vmem:[%s1001_s2 + $0x8] sm:$0xff] %v502_v59  ;;  %529 = vtanh.f32 %v159_v50  ;;  %v415_v50 = vunpack.c.h.bf16 %v485_v37  ;;  %v423_v0 = vunpack.c.h.bf16 %v487_v51  ;;  %v426_v4 = vunpack.c.l.bf16 %v488_v58  ;;  %v494_v37 = vld [vmem:[%s999_s0 + $0xd8] sm:$0xff]   ;;  %v496_v51 = vld [vmem:[%s999_s0 + $0xe8] sm:$0xff]  }
  0x1a   :  { %v506_v2 = vpop.eup %505  ;;  %274 = vst [vmem:[%s1001_s2 + $0x10] sm:$0xff] %v504_v62  ;;  %531 = vtanh.f32 %v160_v53  ;;  %v178_v53 = vadd.f32 %v410_v40, %v657_v12  ;;  %v427_v7 = vunpack.c.h.bf16 %v488_v58  ;;  %v430_v11 = vunpack.c.l.bf16 %v489_v1  ;;  %v497_v58 = vld [vmem:[%s999_s0 + $0xf0] sm:$0xff]  }
  0x1b   :  { %v508_v5 = vpop.eup %507  ;;  %275 = vst [vmem:[%s1001_s2 + $0x18] sm:$0xff] %v506_v2  ;;  %533 = vtanh.f32 %v161_v56  ;;  %v179_v56 = vadd.f32 %v411_v43, %v657_v12  ;;  %v431_v15 = vunpack.c.h.bf16 %v489_v1  ;;  %v434_v19 = vunpack.c.l.bf16 %v490_v8  ;;  %v498_v1 = vld [vmem:[%s999_s0 + $0xf8] sm:$0xff]  }
  0x1c   :  { %v510_v9 = vpop.eup %509  ;;  %276 = vst [vmem:[%s1001_s2 + $0x20] sm:$0xff] %v508_v5  ;;  %535 = vtanh.f32 %v162_v60  ;;  %v180_v60 = vadd.f32 %v414_v47, %v657_v12  ;;  %v435_v22 = vunpack.c.h.bf16 %v490_v8  ;;  %v438_v26 = vunpack.c.l.bf16 %v491_v16 }
  0x1d   :  { %v512_v13 = vpop.eup %511  ;;  %277 = vst [vmem:[%s1001_s2 + $0x28] sm:$0xff] %v510_v9  ;;  %537 = vtanh.f32 %v163_v63  ;;  %v181_v63 = vadd.f32 %v415_v50, %v657_v12  ;;  %v439_v29 = vunpack.c.h.bf16 %v491_v16  ;;  %v442_v33 = vunpack.c.l.bf16 %v492_v23 }
  0x1e   :  { %v514_v17 = vpop.eup %513  ;;  %278 = vst [vmem:[%s1001_s2 + $0x30] sm:$0xff] %v512_v13  ;;  %539 = vtanh.f32 %v164_v3  ;;  %v182_v3 = vadd.f32 %v418_v54, %v657_v12  ;;  %v443_v36 = vunpack.c.h.bf16 %v492_v23  ;;  %v446_v40 = vunpack.c.l.bf16 %v493_v30 }
  0x1f   :  { %v516_v20 = vpop.eup %515  ;;  %279 = vst [vmem:[%s1001_s2 + $0x38] sm:$0xff] %v514_v17  ;;  %541 = vtanh.f32 %v165_v6  ;;  %v183_v6 = vadd.f32 %v419_v57, %v657_v12  ;;  %v447_v43 = vunpack.c.h.bf16 %v493_v30  ;;  %v450_v47 = vunpack.c.l.bf16 %v494_v37 }
  0x20   :  { %v518_v24 = vpop.eup %517  ;;  %280 = vst [vmem:[%s1001_s2 + $0x40] sm:$0xff] %v516_v20  ;;  %543 = vtanh.f32 %v166_v10  ;;  %v184_v10 = vadd.f32 %v422_v61, %v657_v12  ;;  %v451_v50 = vunpack.c.h.bf16 %v494_v37  ;;  %v454_v54 = vunpack.c.l.bf16 %v495_v44 }
  0x21   :  { %v520_v27 = vpop.eup %519  ;;  %281 = vst [vmem:[%s1001_s2 + $0x48] sm:$0xff] %v518_v24  ;;  %545 = vtanh.f32 %v167_v14  ;;  %v185_v14 = vadd.f32 %v423_v0, %v657_v12  ;;  %v455_v57 = vunpack.c.h.bf16 %v495_v44  ;;  %v458_v61 = vunpack.c.l.bf16 %v496_v51 }
  0x22   :  { %v522_v31 = vpop.eup %521  ;;  %282 = vst [vmem:[%s1001_s2 + $0x50] sm:$0xff] %v520_v27  ;;  %547 = vtanh.f32 %v168_v18  ;;  %v186_v18 = vadd.f32 %v426_v4, %v657_v12  ;;  %v459_v0 = vunpack.c.h.bf16 %v496_v51  ;;  %v462_v4 = vunpack.c.l.bf16 %v497_v58 }
  0x23   :  { %v524_v34 = vpop.eup %523  ;;  %283 = vst [vmem:[%s1001_s2 + $0x58] sm:$0xff] %v522_v31  ;;  %549 = vtanh.f32 %v169_v21  ;;  %v187_v21 = vadd.f32 %v427_v7, %v657_v12  ;;  %v463_v7 = vunpack.c.h.bf16 %v497_v58 }
  0x24   :  { %v526_v38 = vpop.eup %525  ;;  %284 = vst [vmem:[%s1001_s2 + $0x60] sm:$0xff] %v524_v34  ;;  %551 = vtanh.f32 %v170_v25  ;;  %v188_v25 = vadd.f32 %v430_v11, %v657_v12  ;;  %v204_v16 = vadd.f32 %v462_v4, %v657_v12 }
  0x25   :  { %v528_v41 = vpop.eup %527  ;;  %285 = vst [vmem:[%s1001_s2 + $0x68] sm:$0xff] %v526_v38  ;;  %553 = vtanh.f32 %v171_v28  ;;  %v189_v28 = vadd.f32 %v431_v15, %v657_v12 }
  0x26   :  { %v530_v45 = vpop.eup %529  ;;  %286 = vst [vmem:[%s1001_s2 + $0x70] sm:$0xff] %v528_v41  ;;  %555 = vtanh.f32 %v172_v32  ;;  %v190_v32 = vadd.f32 %v434_v19, %v657_v12 }
  0x27   :  { %v532_v48 = vpop.eup %531  ;;  %287 = vst [vmem:[%s1001_s2 + $0x78] sm:$0xff] %v530_v45  ;;  %557 = vtanh.f32 %v173_v35  ;;  %v191_v35 = vadd.f32 %v435_v22, %v657_v12 }
  0x28   :  { %v534_v52 = vpop.eup %533  ;;  %288 = vst [vmem:[%s1001_s2 + $0x80] sm:$0xff] %v532_v48  ;;  %559 = vtanh.f32 %v174_v39  ;;  %v192_v39 = vadd.f32 %v438_v26, %v657_v12 }
  0x29   :  { %v536_v55 = vpop.eup %535  ;;  %289 = vst [vmem:[%s1001_s2 + $0x88] sm:$0xff] %v534_v52  ;;  %561 = vtanh.f32 %v175_v42  ;;  %v193_v42 = vadd.f32 %v439_v29, %v657_v12 }
  0x2a   :  { %v538_v59 = vpop.eup %537  ;;  %290 = vst [vmem:[%s1001_s2 + $0x90] sm:$0xff] %v536_v55  ;;  %563 = vtanh.f32 %v176_v46  ;;  %v194_v46 = vadd.f32 %v442_v33, %v657_v12 }
  0x2b   :  { %v540_v62 = vpop.eup %539  ;;  %291 = vst [vmem:[%s1001_s2 + $0x98] sm:$0xff] %v538_v59  ;;  %565 = vtanh.f32 %v177_v49  ;;  %v195_v49 = vadd.f32 %v443_v36, %v657_v12 }
  0x2c   :  { %v542_v2 = vpop.eup %541  ;;  %292 = vst [vmem:[%s1001_s2 + $0xa0] sm:$0xff] %v540_v62  ;;  %567 = vtanh.f32 %v178_v53  ;;  %v196_v53 = vadd.f32 %v446_v40, %v657_v12 }
  0x2d   :  { %v544_v5 = vpop.eup %543  ;;  %293 = vst [vmem:[%s1001_s2 + $0xa8] sm:$0xff] %v542_v2  ;;  %569 = vtanh.f32 %v179_v56  ;;  %v197_v56 = vadd.f32 %v447_v43, %v657_v12 }
  0x2e   :  { %v546_v9 = vpop.eup %545  ;;  %294 = vst [vmem:[%s1001_s2 + $0xb0] sm:$0xff] %v544_v5  ;;  %571 = vtanh.f32 %v180_v60  ;;  %v198_v60 = vadd.f32 %v450_v47, %v657_v12 }
  0x2f   :  { %v548_v13 = vpop.eup %547  ;;  %295 = vst [vmem:[%s1001_s2 + $0xb8] sm:$0xff] %v546_v9  ;;  %573 = vtanh.f32 %v181_v63  ;;  %v199_v63 = vadd.f32 %v451_v50, %v657_v12  ;;  %v202_v9 = vadd.f32 %v458_v61, %v657_v12 }
  0x30   :  { %v550_v17 = vpop.eup %549  ;;  %296 = vst [vmem:[%s1001_s2 + $0xc0] sm:$0xff] %v548_v13  ;;  %575 = vtanh.f32 %v182_v3  ;;  %v200_v3 = vadd.f32 %v454_v54, %v657_v12  ;;  %v203_v13 = vadd.f32 %v459_v0, %v657_v12 }
  0x31   :  { %v552_v20 = vpop.eup %551  ;;  %297 = vst [vmem:[%s1001_s2 + $0xc8] sm:$0xff] %v550_v17  ;;  %577 = vtanh.f32 %v183_v6  ;;  %v201_v6 = vadd.f32 %v455_v57, %v657_v12 }
  0x32   :  { %v554_v24 = vpop.eup %553  ;;  %298 = vst [vmem:[%s1001_s2 + $0xd0] sm:$0xff] %v552_v20  ;;  %579 = vtanh.f32 %v184_v10  ;;  %v466_v10 = vunpack.c.l.bf16 %v498_v1 }
  0x33   :  { %v556_v27 = vpop.eup %555  ;;  %299 = vst [vmem:[%s1001_s2 + $0xd8] sm:$0xff] %v554_v24  ;;  %581 = vtanh.f32 %v185_v14  ;;  %v467_v14 = vunpack.c.h.bf16 %v498_v1 }
  0x34   :  { %v558_v31 = vpop.eup %557  ;;  %300 = vst [vmem:[%s1001_s2 + $0xe0] sm:$0xff] %v556_v27  ;;  %583 = vtanh.f32 %v186_v18  ;;  %v205_v18 = vadd.f32 %v463_v7, %v657_v12  ;;  %v206_v20 = vadd.f32 %v466_v10, %v657_v12 }
  0x35   :  { %v560_v34 = vpop.eup %559  ;;  %301 = vst [vmem:[%s1001_s2 + $0xe8] sm:$0xff] %v558_v31  ;;  %585 = vtanh.f32 %v187_v21  ;;  %v207_v22 = vadd.f32 %v467_v14, %v657_v12 }
  0x36   :  { %v562_v38 = vpop.eup %561  ;;  %302 = vst [vmem:[%s1001_s2 + $0xf0] sm:$0xff] %v560_v34  ;;  %587 = vtanh.f32 %v188_v25 }
  0x37   :  { %v564_v41 = vpop.eup %563  ;;  %303 = vst [vmem:[%s1001_s2 + $0xf8] sm:$0xff] %v562_v38  ;;  %589 = vtanh.f32 %v189_v28 }
  0x38   :  { %v566_v45 = vpop.eup %565  ;;  %304 = vst [vmem:[%s1001_s2 + $0x100] sm:$0xff] %v564_v41  ;;  %591 = vtanh.f32 %v190_v32 }
  0x39   :  { %v568_v48 = vpop.eup %567  ;;  %305 = vst [vmem:[%s1001_s2 + $0x108] sm:$0xff] %v566_v45  ;;  %593 = vtanh.f32 %v191_v35 }
  0x3a   :  { %v570_v52 = vpop.eup %569  ;;  %306 = vst [vmem:[%s1001_s2 + $0x110] sm:$0xff] %v568_v48  ;;  %595 = vtanh.f32 %v192_v39 }
  0x3b   :  { %v572_v55 = vpop.eup %571  ;;  %307 = vst [vmem:[%s1001_s2 + $0x118] sm:$0xff] %v570_v52  ;;  %597 = vtanh.f32 %v193_v42 }
  0x3c   :  { %v574_v59 = vpop.eup %573  ;;  %308 = vst [vmem:[%s1001_s2 + $0x120] sm:$0xff] %v572_v55  ;;  %599 = vtanh.f32 %v194_v46 }
  0x3d   :  { %v576_v62 = vpop.eup %575  ;;  %309 = vst [vmem:[%s1001_s2 + $0x128] sm:$0xff] %v574_v59  ;;  %601 = vtanh.f32 %v195_v49 }
  0x3e   :  { %v578_v2 = vpop.eup %577  ;;  %310 = vst [vmem:[%s1001_s2 + $0x130] sm:$0xff] %v576_v62  ;;  %603 = vtanh.f32 %v196_v53 }
  0x3f   :  { %v580_v5 = vpop.eup %579  ;;  %311 = vst [vmem:[%s1001_s2 + $0x138] sm:$0xff] %v578_v2  ;;  %605 = vtanh.f32 %v197_v56 }
  0x40   :  { %v582_v8 = vpop.eup %581  ;;  %312 = vst [vmem:[%s1001_s2 + $0x140] sm:$0xff] %v580_v5  ;;  %607 = vtanh.f32 %v198_v60 }
  0x41   :  { %v584_v11 = vpop.eup %583  ;;  %313 = vst [vmem:[%s1001_s2 + $0x148] sm:$0xff] %v582_v8  ;;  %609 = vtanh.f32 %v199_v63 }
  0x42   :  { %v586_v15 = vpop.eup %585  ;;  %314 = vst [vmem:[%s1001_s2 + $0x150] sm:$0xff] %v584_v11  ;;  %611 = vtanh.f32 %v200_v3 }
  0x43   :  { %v588_v17 = vpop.eup %587  ;;  %315 = vst [vmem:[%s1001_s2 + $0x158] sm:$0xff] %v586_v15  ;;  %613 = vtanh.f32 %v201_v6 }
  0x44   :  { %v590_v19 = vpop.eup %589  ;;  %316 = vst [vmem:[%s1001_s2 + $0x160] sm:$0xff] %v588_v17  ;;  %615 = vtanh.f32 %v202_v9 }
  0x45   :  { %v592_v21 = vpop.eup %591  ;;  %317 = vst [vmem:[%s1001_s2 + $0x168] sm:$0xff] %v590_v19  ;;  %617 = vtanh.f32 %v203_v13 }
  0x46   :  { %v594_v23 = vpop.eup %593  ;;  %318 = vst [vmem:[%s1001_s2 + $0x170] sm:$0xff] %v592_v21  ;;  %619 = vtanh.f32 %v204_v16 }
  0x47   :  { %v596_v24 = vpop.eup %595  ;;  %319 = vst [vmem:[%s1001_s2 + $0x178] sm:$0xff] %v594_v23  ;;  %621 = vtanh.f32 %v205_v18 }
  0x48   :  { %v598_v25 = vpop.eup %597  ;;  %320 = vst [vmem:[%s1001_s2 + $0x180] sm:$0xff] %v596_v24  ;;  %623 = vtanh.f32 %v206_v20 }
  0x49   :  { %v600_v26 = vpop.eup %599  ;;  %321 = vst [vmem:[%s1001_s2 + $0x188] sm:$0xff] %v598_v25  ;;  %625 = vtanh.f32 %v207_v22 }
  0x4a   :  { %v602_v12 = vpop.eup %601  ;;  %322 = vst [vmem:[%s1001_s2 + $0x190] sm:$0xff] %v600_v26 }
  0x4b   :  { %v604_v27 = vpop.eup %603  ;;  %323 = vst [vmem:[%s1001_s2 + $0x198] sm:$0xff] %v602_v12 }
  0x4c   :  { %v606_v28 = vpop.eup %605  ;;  %324 = vst [vmem:[%s1001_s2 + $0x1a0] sm:$0xff] %v604_v27 }
  0x4d   :  { %v608_v29 = vpop.eup %607  ;;  %325 = vst [vmem:[%s1001_s2 + $0x1a8] sm:$0xff] %v606_v28 }
  0x4e   :  { %v610_v30 = vpop.eup %609  ;;  %326 = vst [vmem:[%s1001_s2 + $0x1b0] sm:$0xff] %v608_v29 }
  0x4f   :  { %v612_v31 = vpop.eup %611  ;;  %327 = vst [vmem:[%s1001_s2 + $0x1b8] sm:$0xff] %v610_v30 }
  0x50   :  { %v614_v32 = vpop.eup %613  ;;  %328 = vst [vmem:[%s1001_s2 + $0x1c0] sm:$0xff] %v612_v31 }
  0x51   :  { %v616_v33 = vpop.eup %615  ;;  %329 = vst [vmem:[%s1001_s2 + $0x1c8] sm:$0xff] %v614_v32 }
  0x52   :  { %v618_v34 = vpop.eup %617  ;;  %330 = vst [vmem:[%s1001_s2 + $0x1d0] sm:$0xff] %v616_v33 }
  0x53   :  { %v620_v35 = vpop.eup %619  ;;  %331 = vst [vmem:[%s1001_s2 + $0x1d8] sm:$0xff] %v618_v34 }
  0x54   :  { %v622_v36 = vpop.eup %621  ;;  %332 = vst [vmem:[%s1001_s2 + $0x1e0] sm:$0xff] %v620_v35 }
  0x55   :  { %v624_v37 = vpop.eup %623  ;;  %333 = vst [vmem:[%s1001_s2 + $0x1e8] sm:$0xff] %v622_v36 }
  0x56   :  { %v626_v38 = vpop.eup %625  ;;  %334 = vst [vmem:[%s1001_s2 + $0x1f0] sm:$0xff] %v624_v37 }
  0x57   :  { %335 = vst [vmem:[%s1001_s2 + $0x1f8] sm:$0xff] %v626_v38 }

// kernel: resnet_generator_forward.62
= control target key start
LH: loop header
LB: loop body
LE: loop exit
PB: predicated region body
PF: predicated region fallthrough
CT: control target
= control target key end

     0   :  { %10 = vsyncpa [#allocation4], 0  ;;  %v3259_v1 = vmov 0   ;;  %s4033_s0 = inlined_call_operand.vmem [shape: bf16[512,512], index: 0, kind: input, shape index: {}]   ;;  %s4034_s1 = inlined_call_operand.vmem [shape: bf16[512,128], index: 1, kind: input, shape index: {}]   ;;  %s4035_s2 = inlined_call_operand.vmem [shape: bf16[512,128], index: 2, kind: output, shape index: {0}]   ;;  %s4036_s3 = inlined_call_operand.hbm [shape: f32[8,128], index: 3, kind: output, shape index: {1}]   ;;  %s4037_s4 = inlined_call_operand.hbm [shape: f32[8,128], index: 4, kind: output, shape index: {2}]  }
   0x1   :  { %v2991_v0 = vld [vmem:[%s4034_s1 + $0x38] sm:$0xff]   ;;  %1175 = vmatprep.subr.bf16.mxu0 %v3259_v1  ;;  %1464 = vmatprep.subr.bf16.mxu1 %v3259_v1  ;;  %v2993_v3 = vld [vmem:[%s4034_s1 + $0x30] sm:$0xff]   ;;  %v2995_v5 = vld [vmem:[%s4034_s1 + $0x28] sm:$0xff]  }
   0x2   :  { %v2992_v2 = vld [vmem:[%s4034_s1 + $0xb8] sm:$0xff]   ;;  %1176 = vmatpush1.bf16.msra.mxu0 %v2991_v0  ;;  %v2994_v4 = vld [vmem:[%s4034_s1 + $0xb0] sm:$0xff]   ;;  %v2996_v6 = vld [vmem:[%s4034_s1 + $0xa8] sm:$0xff]  }
   0x3   :  { %1465 = vmatpush1.bf16.msra.mxu1 %v2992_v2  ;;  %1177 = vmatprep.subr.bf16.mxu0 %v3259_v1  ;;  %v2997_v7 = vld [vmem:[%s4034_s1 + $0x20] sm:$0xff]   ;;  %v2999_v9 = vld [vmem:[%s4034_s1 + $0x18] sm:$0xff]   ;;  %v3001_v11 = vld [vmem:[%s4034_s1 + $0x10] sm:$0xff]  }
   0x4   :  { %1466 = vmatprep.subr.bf16.mxu1 %v3259_v1  ;;  %v2998_v8 = vld [vmem:[%s4034_s1 + $0xa0] sm:$0xff]   ;;  %v3000_v10 = vld [vmem:[%s4034_s1 + $0x98] sm:$0xff]   ;;  %v3002_v12 = vld [vmem:[%s4034_s1 + $0x90] sm:$0xff]  }
   0x5   :  { %v3003_v13 = vld [vmem:[%s4034_s1 + $0x8] sm:$0xff]   ;;  %v3005_v15 = vld [vmem:[%s4034_s1] sm:$0xff]   ;;  %v3007_v17 = vld [vmem:[%s4034_s1 + $0x78] sm:$0xff]  }
   0x6   :  { %1178 = vmatpush1.bf16.msra.mxu0 %v2993_v3  ;;  %v3004_v14 = vld [vmem:[%s4034_s1 + $0x88] sm:$0xff]   ;;  %v3006_v16 = vld [vmem:[%s4034_s1 + $0x80] sm:$0xff]   ;;  %v3008_v18 = vld [vmem:[%s4034_s1 + $0xf8] sm:$0xff]  }
   0x7   :  { %1467 = vmatpush1.bf16.msra.mxu1 %v2994_v4  ;;  %1179 = vmatprep.subr.bf16.mxu0 %v3259_v1  ;;  %v3025_v19 = vld [vmem:[%s4033_s0 + $0x4] ss:$16 sps:$4 sm:$0xff]   ;;  %v3028_v21 = vld [vmem:[%s4033_s0 + $0xc] ss:$16 sps:$4 sm:$0xff]   ;;  %v3023_v35 = vld [vmem:[%s4033_s0] ss:$16 sps:$4 sm:$0xff]  }
   0x8   :  { %1468 = vmatprep.subr.bf16.mxu1 %v3259_v1  ;;  %v3009_v20 = vld [vmem:[%s4034_s1 + $0x70] sm:$0xff]   ;;  %1207 = vmatprep.mubr.bf16.mxu0 %v3025_v19  ;;  %v3011_v23 = vld [vmem:[%s4034_s1 + $0x68] sm:$0xff]   ;;  %v3013_v25 = vld [vmem:[%s4034_s1 + $0x60] sm:$0xff]  }
   0x9   :  { %v3010_v22 = vld [vmem:[%s4034_s1 + $0xf0] sm:$0xff]   ;;  %1496 = vmatprep.mubr.bf16.mxu1 %v3028_v21  ;;  %v3012_v24 = vld [vmem:[%s4034_s1 + $0xe8] sm:$0xff]   ;;  %v3014_v26 = vld [vmem:[%s4034_s1 + $0xe0] sm:$0xff]  }
   0xa   :  { %1180 = vmatpush1.bf16.msra.mxu0 %v2995_v5  ;;  %v3015_v27 = vld [vmem:[%s4034_s1 + $0x58] sm:$0xff]   ;;  %v3017_v29 = vld [vmem:[%s4034_s1 + $0x50] sm:$0xff]   ;;  %v3019_v31 = vld [vmem:[%s4034_s1 + $0x48] sm:$0xff]  }
   0xb   :  { %1469 = vmatpush1.bf16.msra.mxu1 %v2996_v6  ;;  %1181 = vmatprep.subr.bf16.mxu0 %v3259_v1  ;;  %v3016_v28 = vld [vmem:[%s4034_s1 + $0xd8] sm:$0xff]   ;;  %v3018_v30 = vld [vmem:[%s4034_s1 + $0xd0] sm:$0xff]   ;;  %v3020_v32 = vld [vmem:[%s4034_s1 + $0xc8] sm:$0xff]  }
   0xc   :  { %1470 = vmatprep.subr.bf16.mxu1 %v3259_v1  ;;  %v3021_v33 = vld [vmem:[%s4034_s1 + $0x40] sm:$0xff]   ;;  %v3026_v36 = vld [vmem:[%s4033_s0 + $0x8] ss:$16 sps:$4 sm:$0xff]   ;;  %v3031_v38 = vld [vmem:[%s4033_s0 + $0x2c] ss:$16 sps:$4 sm:$0xff]  }
   0xd   :  { %v3022_v34 = vld [vmem:[%s4034_s1 + $0xc0] sm:$0xff]   ;;  %v3034_v40 = vld [vmem:[%s4033_s0 + $0x28] ss:$16 sps:$4 sm:$0xff]   ;;  %v3037_v42 = vld [vmem:[%s4033_s0 + $0x4c] ss:$16 sps:$4 sm:$0xff]  }
   0xe   :  { %1182 = vmatpush1.bf16.msra.mxu0 %v2997_v7  ;;  %v3029_v37 = vld [vmem:[%s4033_s0 + $0x24] ss:$16 sps:$4 sm:$0xff]   ;;  %v3033_v39 = vld [vmem:[%s4033_s0 + $0x20] ss:$16 sps:$4 sm:$0xff]   ;;  %v3040_v44 = vld [vmem:[%s4033_s0 + $0x48] ss:$16 sps:$4 sm:$0xff]  }
   0xf   :  { %1471 = vmatpush1.bf16.msra.mxu1 %v2998_v8  ;;  %1183 = vmatprep.subr.bf16.mxu0 %v3259_v1  ;;  %v3035_v41 = vld [vmem:[%s4033_s0 + $0x44] ss:$16 sps:$4 sm:$0xff]   ;;  %v3039_v43 = vld [vmem:[%s4033_s0 + $0x40] ss:$16 sps:$4 sm:$0xff]   ;;  %v3043_v46 = vld [vmem:[%s4033_s0 + $0x6c] ss:$16 sps:$4 sm:$0xff]  }
  0x10   :  { %1472 = vmatprep.subr.bf16.mxu1 %v3259_v1  ;;  %v3041_v45 = vld [vmem:[%s4033_s0 + $0x64] ss:$16 sps:$4 sm:$0xff]   ;;  %v3045_v47 = vld [vmem:[%s4033_s0 + $0x60] ss:$16 sps:$4 sm:$0xff]   ;;  %v3046_v48 = vld [vmem:[%s4033_s0 + $0x68] ss:$16 sps:$4 sm:$0xff]  }
  0x11   :  { %v3047_v49 = vld [vmem:[%s4033_s0 + $0x84] ss:$16 sps:$4 sm:$0xff]   ;;  %v3049_v50 = vld [vmem:[%s4033_s0 + $0x8c] ss:$16 sps:$4 sm:$0xff]   ;;  %v3051_v51 = vld [vmem:[%s4033_s0 + $0x80] ss:$16 sps:$4 sm:$0xff]  }
  0x12   :  { %1184 = vmatpush1.bf16.msra.mxu0 %v2999_v9  ;;  %v3052_v52 = vld [vmem:[%s4033_s0 + $0x88] ss:$16 sps:$4 sm:$0xff]   ;;  %v3053_v53 = vld [vmem:[%s4033_s0 + $0xa4] ss:$16 sps:$4 sm:$0xff]   ;;  %v3055_v54 = vld [vmem:[%s4033_s0 + $0xac] ss:$16 sps:$4 sm:$0xff]  }
  0x13   :  { %1473 = vmatpush1.bf16.msra.mxu1 %v3000_v10  ;;  %1185 = vmatprep.subr.bf16.mxu0 %v3259_v1  ;;  %v3057_v55 = vld [vmem:[%s4033_s0 + $0xa0] ss:$16 sps:$4 sm:$0xff]   ;;  %v3058_v56 = vld [vmem:[%s4033_s0 + $0xa8] ss:$16 sps:$4 sm:$0xff]   ;;  %v3059_v57 = vld [vmem:[%s4033_s0 + $0xc4] ss:$16 sps:$4 sm:$0xff]  }
  0x14   :  { %1474 = vmatprep.subr.bf16.mxu1 %v3259_v1  ;;  %v3061_v58 = vld [vmem:[%s4033_s0 + $0xcc] ss:$16 sps:$4 sm:$0xff]  }
  0x16   :  { %1186 = vmatpush1.bf16.msra.mxu0 %v3001_v11 }
  0x17   :  { %1475 = vmatpush1.bf16.msra.mxu1 %v3002_v12  ;;  %1187 = vmatprep.subr.bf16.mxu0 %v3259_v1 }
  0x18   :  { %1476 = vmatprep.subr.bf16.mxu1 %v3259_v1 }
  0x1a   :  { %1188 = vmatpush1.bf16.msra.mxu0 %v3003_v13 }
  0x1b   :  { %1477 = vmatpush1.bf16.msra.mxu1 %v3004_v14  ;;  %1189 = vmatprep.subr.bf16.mxu0 %v3259_v1 }
  0x1c   :  { %1478 = vmatprep.subr.bf16.mxu1 %v3259_v1 }
  0x1e   :  { %1190 = vmatpush1.bf16.msra.mxu0 %v3005_v15 }
  0x1f   :  { %1479 = vmatpush1.bf16.msra.mxu1 %v3006_v16  ;;  %1191 = vmatprep.subr.bf16.mxu0 %v3259_v1 }
  0x20   :  { %1480 = vmatprep.subr.bf16.mxu1 %v3259_v1 }
  0x22   :  { %1192 = vmatpush2.bf16.msra.mxu0 %v3007_v17 }
  0x23   :  { %1481 = vmatpush2.bf16.msra.mxu1 %v3008_v18  ;;  %1193 = vmatprep.subr.bf16.mxu0 %v3259_v1 }
  0x24   :  { %1482 = vmatprep.subr.bf16.mxu1 %v3259_v1 }
  0x26   :  { %1194 = vmatpush2.bf16.msra.mxu0 %v3009_v20 }
  0x27   :  { %1483 = vmatpush2.bf16.msra.mxu1 %v3010_v22  ;;  %1195 = vmatprep.subr.bf16.mxu0 %v3259_v1 }
  0x28   :  { %1484 = vmatprep.subr.bf16.mxu1 %v3259_v1 }
  0x2a   :  { %1196 = vmatpush2.bf16.msra.mxu0 %v3011_v23 }
  0x2b   :  { %1485 = vmatpush2.bf16.msra.mxu1 %v3012_v24  ;;  %1197 = vmatprep.subr.bf16.mxu0 %v3259_v1 }
  0x2c   :  { %1486 = vmatprep.subr.bf16.mxu1 %v3259_v1 }
  0x2e   :  { %1198 = vmatpush2.bf16.msra.mxu0 %v3013_v25 }
  0x2f   :  { %1487 = vmatpush2.bf16.msra.mxu1 %v3014_v26  ;;  %1199 = vmatprep.subr.bf16.mxu0 %v3259_v1 }
  0x30   :  { %1488 = vmatprep.subr.bf16.mxu1 %v3259_v1 }
  0x32   :  { %1200 = vmatpush2.bf16.msra.mxu0 %v3015_v27 }
  0x33   :  { %1489 = vmatpush2.bf16.msra.mxu1 %v3016_v28  ;;  %1201 = vmatprep.subr.bf16.mxu0 %v3259_v1 }
  0x34   :  { %1490 = vmatprep.subr.bf16.mxu1 %v3259_v1 }
  0x36   :  { %1202 = vmatpush2.bf16.msra.mxu0 %v3017_v29 }
  0x37   :  { %1491 = vmatpush2.bf16.msra.mxu1 %v3018_v30  ;;  %1203 = vmatprep.subr.bf16.mxu0 %v3259_v1 }
  0x38   :  { %1492 = vmatprep.subr.bf16.mxu1 %v3259_v1 }
  0x3a   :  { %1204 = vmatpush2.bf16.msra.mxu0 %v3019_v31 }
  0x3b   :  { %1493 = vmatpush2.bf16.msra.mxu1 %v3020_v32  ;;  %1205 = vmatprep.subr.bf16.mxu0 %v3259_v1 }
  0x3c   :  { %1494 = vmatprep.subr.bf16.mxu1 %v3259_v1 }
  0x3e   :  { %1206 = vmatpush2.bf16.msra.mxu0 %v3021_v33 }
  0x3f   :  { %1495 = vmatpush2.bf16.msra.mxu1 %v3022_v34 }
  0x41   :  { %1208 = vmatmul.mubr.bf16.vlgmr.msra.gmra.mxu0 %v3023_v35 }
  0x42   :  { %1497 = vmatmul.mubr.bf16.vlgmr.msra.gmra.mxu1 %v3026_v36  ;;  %1215 = vmatprep.mubr.bf16.mxu0 %v3029_v37 }
  0x43   :  { %1504 = vmatprep.mubr.bf16.mxu1 %v3031_v38 }
  0x49   :  { %1216 = vmatmul.mubr.bf16.gmra.mxu0 %v3033_v39 }
  0x4a   :  { %1505 = vmatmul.mubr.bf16.gmra.mxu1 %v3034_v40  ;;  %1223 = vmatprep.mubr.bf16.mxu0 %v3035_v41 }
  0x4b   :  { %1512 = vmatprep.mubr.bf16.mxu1 %v3037_v42 }
  0x51   :  { %1224 = vmatmul.mubr.bf16.gmra.mxu0 %v3039_v43 }
  0x52   :  { %1513 = vmatmul.mubr.bf16.gmra.mxu1 %v3040_v44  ;;  %1231 = vmatprep.mubr.bf16.mxu0 %v3041_v45 }
  0x53   :  { %1520 = vmatprep.mubr.bf16.mxu1 %v3043_v46 }
  0x59   :  { %1232 = vmatmul.mubr.bf16.gmra.mxu0 %v3045_v47 }
  0x5a   :  { %1521 = vmatmul.mubr.bf16.gmra.mxu1 %v3046_v48  ;;  %1239 = vmatprep.mubr.bf16.mxu0 %v3047_v49 }
  0x5b   :  { %1528 = vmatprep.mubr.bf16.mxu1 %v3049_v50 }
  0x61   :  { %1240 = vmatmul.mubr.bf16.gmra.mxu0 %v3051_v51 }
  0x62   :  { %1529 = vmatmul.mubr.bf16.gmra.mxu1 %v3052_v52  ;;  %1247 = vmatprep.mubr.bf16.mxu0 %v3053_v53 }
  0x63   :  { %1536 = vmatprep.mubr.bf16.mxu1 %v3055_v54 }
  0x64   :  { %11 = vsyncpa [#allocation6], 0  ;;  %v3063_v59 = vld [vmem:[%s4033_s0 + $0xc0] ss:$16 sps:$4 sm:$0xff]   ;;  %v3064_v60 = vld [vmem:[%s4033_s0 + $0xc8] ss:$16 sps:$4 sm:$0xff]  }
  0x65   :  { %v3065_v61 = vld [vmem:[%s4033_s0 + $0xe4] ss:$16 sps:$4 sm:$0xff]   ;;  %v3067_v62 = vld [vmem:[%s4033_s0 + $0xec] ss:$16 sps:$4 sm:$0xff]   ;;  %v3069_v63 = vld [vmem:[%s4033_s0 + $0xe0] ss:$16 sps:$4 sm:$0xff]  }
  0x66   :  { %v3070_v0 = vld [vmem:[%s4033_s0 + $0xe8] ss:$16 sps:$4 sm:$0xff]   ;;  %v3071_v1 = vld [vmem:[%s4033_s0 + $0x104] ss:$16 sps:$4 sm:$0xff]   ;;  %v3073_v2 = vld [vmem:[%s4033_s0 + $0x10c] ss:$16 sps:$4 sm:$0xff]  }
  0x67   :  { %v3075_v3 = vld [vmem:[%s4033_s0 + $0x100] ss:$16 sps:$4 sm:$0xff]   ;;  %v3076_v4 = vld [vmem:[%s4033_s0 + $0x108] ss:$16 sps:$4 sm:$0xff]   ;;  %v3077_v5 = vld [vmem:[%s4033_s0 + $0x124] ss:$16 sps:$4 sm:$0xff]  }
  0x68   :  { %v3079_v6 = vld [vmem:[%s4033_s0 + $0x12c] ss:$16 sps:$4 sm:$0xff]   ;;  %v3081_v7 = vld [vmem:[%s4033_s0 + $0x120] ss:$16 sps:$4 sm:$0xff]   ;;  %v3082_v8 = vld [vmem:[%s4033_s0 + $0x128] ss:$16 sps:$4 sm:$0xff]  }
  0x69   :  { %1248 = vmatmul.mubr.bf16.gmra.mxu0 %v3057_v55  ;;  %v3083_v9 = vld [vmem:[%s4033_s0 + $0x144] ss:$16 sps:$4 sm:$0xff]   ;;  %v3085_v10 = vld [vmem:[%s4033_s0 + $0x14c] ss:$16 sps:$4 sm:$0xff]   ;;  %v3087_v11 = vld [vmem:[%s4033_s0 + $0x140] ss:$16 sps:$4 sm:$0xff]  }
  0x6a   :  { %1537 = vmatmul.mubr.bf16.gmra.mxu1 %v3058_v56  ;;  %1255 = vmatprep.mubr.bf16.mxu0 %v3059_v57  ;;  %v3088_v12 = vld [vmem:[%s4033_s0 + $0x148] ss:$16 sps:$4 sm:$0xff]   ;;  %v3089_v13 = vld [vmem:[%s4033_s0 + $0x164] ss:$16 sps:$4 sm:$0xff]   ;;  %v3091_v14 = vld [vmem:[%s4033_s0 + $0x16c] ss:$16 sps:$4 sm:$0xff]  }
  0x6b   :  { %1544 = vmatprep.mubr.bf16.mxu1 %v3061_v58  ;;  %v3093_v15 = vld [vmem:[%s4033_s0 + $0x160] ss:$16 sps:$4 sm:$0xff]   ;;  %v3094_v16 = vld [vmem:[%s4033_s0 + $0x168] ss:$16 sps:$4 sm:$0xff]   ;;  %v3095_v17 = vld [vmem:[%s4033_s0 + $0x184] ss:$16 sps:$4 sm:$0xff]  }
  0x6c   :  { %v3097_v18 = vld [vmem:[%s4033_s0 + $0x18c] ss:$16 sps:$4 sm:$0xff]   ;;  %v3099_v19 = vld [vmem:[%s4033_s0 + $0x180] ss:$16 sps:$4 sm:$0xff]   ;;  %v3100_v20 = vld [vmem:[%s4033_s0 + $0x188] ss:$16 sps:$4 sm:$0xff]  }
  0x6d   :  { %v3101_v21 = vld [vmem:[%s4033_s0 + $0x1a4] ss:$16 sps:$4 sm:$0xff]   ;;  %v3103_v22 = vld [vmem:[%s4033_s0 + $0x1ac] ss:$16 sps:$4 sm:$0xff]   ;;  %v3105_v23 = vld [vmem:[%s4033_s0 + $0x1a0] ss:$16 sps:$4 sm:$0xff]  }
  0x6e   :  { %v3106_v24 = vld [vmem:[%s4033_s0 + $0x1a8] ss:$16 sps:$4 sm:$0xff]   ;;  %v3107_v25 = vld [vmem:[%s4033_s0 + $0x1c4] ss:$16 sps:$4 sm:$0xff]   ;;  %v3109_v26 = vld [vmem:[%s4033_s0 + $0x1cc] ss:$16 sps:$4 sm:$0xff]  }
  0x6f   :  { %v3111_v27 = vld [vmem:[%s4033_s0 + $0x1c0] ss:$16 sps:$4 sm:$0xff]   ;;  %v3112_v28 = vld [vmem:[%s4033_s0 + $0x1c8] ss:$16 sps:$4 sm:$0xff]   ;;  %v3113_v29 = vld [vmem:[%s4033_s0 + $0x1e4] ss:$16 sps:$4 sm:$0xff]  }
  0x70   :  { %v3115_v30 = vld [vmem:[%s4033_s0 + $0x1ec] ss:$16 sps:$4 sm:$0xff]   ;;  %v3117_v31 = vld [vmem:[%s4033_s0 + $0x1e0] ss:$16 sps:$4 sm:$0xff]   ;;  %v3118_v32 = vld [vmem:[%s4033_s0 + $0x1e8] ss:$16 sps:$4 sm:$0xff]  }
  0x71   :  { %1256 = vmatmul.mubr.bf16.gmra.mxu0 %v3063_v59  ;;  %v3119_v33 = vld [vmem:[%s4033_s0 + $0x204] ss:$16 sps:$4 sm:$0xff]   ;;  %v3121_v34 = vld [vmem:[%s4033_s0 + $0x20c] ss:$16 sps:$4 sm:$0xff]   ;;  %v3123_v35 = vld [vmem:[%s4033_s0 + $0x200] ss:$16 sps:$4 sm:$0xff]  }
  0x72   :  { %1545 = vmatmul.mubr.bf16.gmra.mxu1 %v3064_v60  ;;  %1263 = vmatprep.mubr.bf16.mxu0 %v3065_v61  ;;  %v3124_v36 = vld [vmem:[%s4033_s0 + $0x208] ss:$16 sps:$4 sm:$0xff]   ;;  %v3125_v37 = vld [vmem:[%s4033_s0 + $0x224] ss:$16 sps:$4 sm:$0xff]   ;;  %v3127_v38 = vld [vmem:[%s4033_s0 + $0x22c] ss:$16 sps:$4 sm:$0xff]  }
  0x73   :  { %1552 = vmatprep.mubr.bf16.mxu1 %v3067_v62  ;;  %v3129_v39 = vld [vmem:[%s4033_s0 + $0x220] ss:$16 sps:$4 sm:$0xff]   ;;  %v3130_v40 = vld [vmem:[%s4033_s0 + $0x228] ss:$16 sps:$4 sm:$0xff]   ;;  %v3131_v41 = vld [vmem:[%s4033_s0 + $0x244] ss:$16 sps:$4 sm:$0xff]  }
  0x74   :  { %v3133_v42 = vld [vmem:[%s4033_s0 + $0x24c] ss:$16 sps:$4 sm:$0xff]   ;;  %v3135_v43 = vld [vmem:[%s4033_s0 + $0x240] ss:$16 sps:$4 sm:$0xff]   ;;  %v3136_v44 = vld [vmem:[%s4033_s0 + $0x248] ss:$16 sps:$4 sm:$0xff]  }
  0x75   :  { %v3137_v45 = vld [vmem:[%s4033_s0 + $0x264] ss:$16 sps:$4 sm:$0xff]   ;;  %v3139_v46 = vld [vmem:[%s4033_s0 + $0x26c] ss:$16 sps:$4 sm:$0xff]   ;;  %v3141_v47 = vld [vmem:[%s4033_s0 + $0x260] ss:$16 sps:$4 sm:$0xff]  }
  0x76   :  { %v3142_v48 = vld [vmem:[%s4033_s0 + $0x268] ss:$16 sps:$4 sm:$0xff]   ;;  %v3143_v49 = vld [vmem:[%s4033_s0 + $0x284] ss:$16 sps:$4 sm:$0xff]   ;;  %v3145_v50 = vld [vmem:[%s4033_s0 + $0x28c] ss:$16 sps:$4 sm:$0xff]  }
  0x77   :  { %v3147_v51 = vld [vmem:[%s4033_s0 + $0x280] ss:$16 sps:$4 sm:$0xff]   ;;  %v3148_v52 = vld [vmem:[%s4033_s0 + $0x288] ss:$16 sps:$4 sm:$0xff]   ;;  %v3149_v53 = vld [vmem:[%s4033_s0 + $0x2a4] ss:$16 sps:$4 sm:$0xff]  }
  0x78   :  { %v3151_v54 = vld [vmem:[%s4033_s0 + $0x2ac] ss:$16 sps:$4 sm:$0xff]   ;;  %v3153_v55 = vld [vmem:[%s4033_s0 + $0x2a0] ss:$16 sps:$4 sm:$0xff]   ;;  %v3154_v56 = vld [vmem:[%s4033_s0 + $0x2a8] ss:$16 sps:$4 sm:$0xff]  }
  0x79   :  { %1264 = vmatmul.mubr.bf16.gmra.mxu0 %v3069_v63  ;;  %v3155_v57 = vld [vmem:[%s4033_s0 + $0x2c4] ss:$16 sps:$4 sm:$0xff]   ;;  %v3157_v58 = vld [vmem:[%s4033_s0 + $0x2cc] ss:$16 sps:$4 sm:$0xff]   ;;  %v3159_v59 = vld [vmem:[%s4033_s0 + $0x2c0] ss:$16 sps:$4 sm:$0xff]  }
  0x7a   :  { %1553 = vmatmul.mubr.bf16.gmra.mxu1 %v3070_v0  ;;  %1271 = vmatprep.mubr.bf16.mxu0 %v3071_v1  ;;  %v3160_v60 = vld [vmem:[%s4033_s0 + $0x2c8] ss:$16 sps:$4 sm:$0xff]   ;;  %v3161_v61 = vld [vmem:[%s4033_s0 + $0x2e4] ss:$16 sps:$4 sm:$0xff]   ;;  %v3163_v62 = vld [vmem:[%s4033_s0 + $0x2ec] ss:$16 sps:$4 sm:$0xff]  }
  0x7b   :  { %1560 = vmatprep.mubr.bf16.mxu1 %v3073_v2  ;;  %v3165_v63 = vld [vmem:[%s4033_s0 + $0x2e0] ss:$16 sps:$4 sm:$0xff]   ;;  %v3166_v0 = vld [vmem:[%s4033_s0 + $0x2e8] ss:$16 sps:$4 sm:$0xff]   ;;  %v3167_v1 = vld [vmem:[%s4033_s0 + $0x304] ss:$16 sps:$4 sm:$0xff]  }
  0x7c   :  { %v3169_v2 = vld [vmem:[%s4033_s0 + $0x30c] ss:$16 sps:$4 sm:$0xff]   ;;  %s3260_s21 = smov [#allocation3]   ;;  %s3261_s23 = smov [#allocation5]  }
  0x7d   :  { %s2484_s22 = sshll.u32 %s3260_s21, 4  ;;  %s2494_s24 = sshll.u32 %s3261_s23, 4  ;;  %s2485_s22 = int_to_ptr.vmem [resolvable:$true] %s2484_s22  ;;  %s2495_s24 = int_to_ptr.vmem [resolvable:$true] %s2494_s24 }
  0x7e   :  { %p3220_p1 = scmp.lt.s32.totalorder %s2485_s22, %s2485_s22 }
  0x81   :  { %1272 = vmatmul.mubr.bf16.gmra.mxu0 %v3075_v3  ;;  %v3171_v3 = vld [vmem:[%s4033_s0 + $0x300] ss:$16 sps:$4 sm:$0xff]  }
  0x82   :  { %1561 = vmatmul.mubr.bf16.gmra.mxu1 %v3076_v4  ;;  %1279 = vmatprep.mubr.bf16.mxu0 %v3077_v5  ;;  %v3172_v4 = vld [vmem:[%s4033_s0 + $0x308] ss:$16 sps:$4 sm:$0xff]   ;;  %v3173_v5 = vld [vmem:[%s4033_s0 + $0x324] ss:$16 sps:$4 sm:$0xff]  }
  0x83   :  { %1568 = vmatprep.mubr.bf16.mxu1 %v3079_v6  ;;  %v3175_v6 = vld [vmem:[%s4033_s0 + $0x32c] ss:$16 sps:$4 sm:$0xff]  }
  0x89   :  { %1280 = vmatmul.mubr.bf16.gmra.mxu0 %v3081_v7 }
  0x8a   :  { %1569 = vmatmul.mubr.bf16.gmra.mxu1 %v3082_v8  ;;  %1287 = vmatprep.mubr.bf16.mxu0 %v3083_v9 }
  0x8b   :  { %1576 = vmatprep.mubr.bf16.mxu1 %v3085_v10 }
  0x91   :  { %1288 = vmatmul.mubr.bf16.gmra.mxu0 %v3087_v11 }
  0x92   :  { %1577 = vmatmul.mubr.bf16.gmra.mxu1 %v3088_v12  ;;  %1295 = vmatprep.mubr.bf16.mxu0 %v3089_v13  ;;  %v3177_v13 = vld [vmem:[%s4033_s0 + $0x320] ss:$16 sps:$4 sm:$0xff]  }
  0x93   :  { %1584 = vmatprep.mubr.bf16.mxu1 %v3091_v14 }
  0x99   :  { %1296 = vmatmul.mubr.bf16.gmra.mxu0 %v3093_v15  ;;  %v3178_v15 = vld [vmem:[%s4033_s0 + $0x328] ss:$16 sps:$4 sm:$0xff]  }
  0x9a   :  { %1585 = vmatmul.mubr.bf16.gmra.mxu1 %v3094_v16  ;;  %1303 = vmatprep.mubr.bf16.mxu0 %v3095_v17  ;;  %v3179_v16 = vld [vmem:[%s4033_s0 + $0x344] ss:$16 sps:$4 sm:$0xff]  }
  0x9b   :  { %1592 = vmatprep.mubr.bf16.mxu1 %v3097_v18 }
  0xa1   :  { %1304 = vmatmul.mubr.bf16.gmra.mxu0 %v3099_v19  ;;  %v3181_v19 = vld [vmem:[%s4033_s0 + $0x34c] ss:$16 sps:$4 sm:$0xff]  }
  0xa2   :  { %1593 = vmatmul.mubr.bf16.gmra.mxu1 %v3100_v20  ;;  %1311 = vmatprep.mubr.bf16.mxu0 %v3101_v21 }
  0xa3   :  { %1600 = vmatprep.mubr.bf16.mxu1 %v3103_v22 }
  0xa9   :  { %1312 = vmatmul.mubr.bf16.gmra.mxu0 %v3105_v23 }
  0xaa   :  { %1601 = vmatmul.mubr.bf16.gmra.mxu1 %v3106_v24  ;;  %1319 = vmatprep.mubr.bf16.mxu0 %v3107_v25 }
  0xab   :  { %1608 = vmatprep.mubr.bf16.mxu1 %v3109_v26 }
  0xb1   :  { %1320 = vmatmul.mubr.bf16.gmra.mxu0 %v3111_v27 }
  0xb2   :  { %1609 = vmatmul.mubr.bf16.gmra.mxu1 %v3112_v28  ;;  %1327 = vmatprep.mubr.bf16.mxu0 %v3113_v29 }
  0xb3   :  { %1616 = vmatprep.mubr.bf16.mxu1 %v3115_v30 }
  0xb9   :  { %1328 = vmatmul.mubr.bf16.gmra.mxu0 %v3117_v31 }
  0xba   :  { %1617 = vmatmul.mubr.bf16.gmra.mxu1 %v3118_v32  ;;  %1335 = vmatprep.mubr.bf16.mxu0 %v3119_v33 }
  0xbb   :  { %1624 = vmatprep.mubr.bf16.mxu1 %v3121_v34  ;;  %v3183_v34 = vld [vmem:[%s4033_s0 + $0x340] ss:$16 sps:$4 sm:$0xff]  }
  0xc1   :  { %1336 = vmatmul.mubr.bf16.gmra.mxu0 %v3123_v35 }
  0xc2   :  { %1625 = vmatmul.mubr.bf16.gmra.mxu1 %v3124_v36  ;;  %1343 = vmatprep.mubr.bf16.mxu0 %v3125_v37  ;;  %v3184_v36 = vld [vmem:[%s4033_s0 + $0x348] ss:$16 sps:$4 sm:$0xff]   ;;  %v3185_v37 = vld [vmem:[%s4033_s0 + $0x364] ss:$16 sps:$4 sm:$0xff]  }
  0xc3   :  { %1632 = vmatprep.mubr.bf16.mxu1 %v3127_v38 }
  0xc9   :  { %1344 = vmatmul.mubr.bf16.gmra.mxu0 %v3129_v39 }
  0xca   :  { %1633 = vmatmul.mubr.bf16.gmra.mxu1 %v3130_v40  ;;  %1351 = vmatprep.mubr.bf16.mxu0 %v3131_v41  ;;  %v3187_v41 = vld [vmem:[%s4033_s0 + $0x36c] ss:$16 sps:$4 sm:$0xff]  }
  0xcb   :  { %1640 = vmatprep.mubr.bf16.mxu1 %v3133_v42 }
  0xd1   :  { %1352 = vmatmul.mubr.bf16.gmra.mxu0 %v3135_v43 }
  0xd2   :  { %1641 = vmatmul.mubr.bf16.gmra.mxu1 %v3136_v44  ;;  %1359 = vmatprep.mubr.bf16.mxu0 %v3137_v45 }
  0xd3   :  { %1648 = vmatprep.mubr.bf16.mxu1 %v3139_v46 }
  0xd9   :  { %1360 = vmatmul.mubr.bf16.gmra.mxu0 %v3141_v47 }
  0xda   :  { %1649 = vmatmul.mubr.bf16.gmra.mxu1 %v3142_v48  ;;  %1367 = vmatprep.mubr.bf16.mxu0 %v3143_v49 }
  0xdb   :  { %1656 = vmatprep.mubr.bf16.mxu1 %v3145_v50 }
  0xe1   :  { %1368 = vmatmul.mubr.bf16.gmra.mxu0 %v3147_v51 }
  0xe2   :  { %1657 = vmatmul.mubr.bf16.gmra.mxu1 %v3148_v52  ;;  %1375 = vmatprep.mubr.bf16.mxu0 %v3149_v53 }
  0xe3   :  { %1664 = vmatprep.mubr.bf16.mxu1 %v3151_v54 }
  0xe9   :  { %1376 = vmatmul.mubr.bf16.gmra.mxu0 %v3153_v55  ;;  %v3189_v55 = vld [vmem:[%s4033_s0 + $0x360] ss:$16 sps:$4 sm:$0xff]  }
  0xea   :  { %1665 = vmatmul.mubr.bf16.gmra.mxu1 %v3154_v56  ;;  %1383 = vmatprep.mubr.bf16.mxu0 %v3155_v57  ;;  %v3190_v57 = vld [vmem:[%s4033_s0 + $0x368] ss:$16 sps:$4 sm:$0xff]  }
  0xeb   :  { %1672 = vmatprep.mubr.bf16.mxu1 %v3157_v58  ;;  %v3193_v58 = vld [vmem:[%s4033_s0 + $0x384] ss:$16 sps:$4 sm:$0xff]  }
  0xf1   :  { %1384 = vmatmul.mubr.bf16.gmra.mxu0 %v3159_v59 }
  0xf2   :  { %1673 = vmatmul.mubr.bf16.gmra.mxu1 %v3160_v60  ;;  %1391 = vmatprep.mubr.bf16.mxu0 %v3161_v61 }
  0xf3   :  { %1680 = vmatprep.mubr.bf16.mxu1 %v3163_v62  ;;  %v3196_v62 = vld [vmem:[%s4033_s0 + $0x38c] ss:$16 sps:$4 sm:$0xff]  }
  0xf9   :  { %1392 = vmatmul.mubr.bf16.gmra.mxu0 %v3165_v63 }
  0xfa   :  { %1681 = vmatmul.mubr.bf16.gmra.mxu1 %v3166_v0  ;;  %1399 = vmatprep.mubr.bf16.mxu0 %v3167_v1 }
  0xfb   :  { %1688 = vmatprep.mubr.bf16.mxu1 %v3169_v2 }
 0x101   :  { %v1209_v7 = vpop.f32.mrf.mxu0  ;;  %1400 = vmatmul.mubr.bf16.gmra.mxu0 %v3171_v3 }
 0x102   :  { %v1498_v8 = vpop.f32.mrf.mxu1  ;;  %1689 = vmatmul.mubr.bf16.gmra.mxu1 %v3172_v4  ;;  %1407 = vmatprep.mubr.bf16.mxu0 %v3173_v5 }
 0x103   :  { %v1211_v9 = vpop.f32.mrf.mxu0  ;;  %1696 = vmatprep.mubr.bf16.mxu1 %v3175_v6  ;;  %v1499_v11 = vadd.f32 %v1498_v8, %v1209_v7 }
 0x104   :  { %v1500_v10 = vpop.f32.mrf.mxu1 }
 0x105   :  { %v1212_v12 = vpop.f32.mrf.mxu0  ;;  %v2341_v21 = vmul.f32 %v1499_v11, %v1499_v11 }
 0x106   :  { %v1501_v14 = vpop.f32.mrf.mxu1 }
 0x107   :  { %v1502_v17 = vadd.f32 %v1501_v14, %v1212_v12  ;;  %v1214_v18 = vpop.f32.mrf.mxu0  ;;  %v3191_v12 = vld [vmem:[%s4033_s0 + $0x380] ss:$16 sps:$4 sm:$0xff]   ;;  %v3194_v14 = vld [vmem:[%s4033_s0 + $0x388] ss:$16 sps:$4 sm:$0xff]  }
 0x108   :  { %v1503_v20 = vpop.f32.mrf.mxu1 }
 0x109   :  { %v2799_v22 = vpack.c.bf16 %v1502_v17, %v1499_v11  ;;  %v2269_v23 = vadd.f32 %v1502_v17, %v1499_v11  ;;  %v2342_v24 = vmul.f32 %v1502_v17, %v1502_v17  ;;  %v1217_v25 = vpop.f32.mrf.mxu0  ;;  %1408 = vmatmul.mubr.bf16.gmra.mxu0 %v3177_v13 }
 0x10a   :  { %v1506_v26 = vpop.f32.mrf.mxu1  ;;  %1697 = vmatmul.mubr.bf16.gmra.mxu1 %v3178_v15  ;;  %1415 = vmatprep.mubr.bf16.mxu0 %v3179_v16  ;;  %v3199_v15 = vld [vmem:[%s4033_s0 + $0x3a4] ss:$16 sps:$4 sm:$0xff]  }
 0x10b   :  { %2800 = vst [vmem:[%s4035_s2] sm:$0xff] %v2799_v22   ;;  %v2405_v27 = vadd.f32 %v2342_v24, %v2341_v21  ;;  %v1507_v28 = vadd.f32 %v1506_v26, %v1217_v25  ;;  %v1219_v29 = vpop.f32.mrf.mxu0  ;;  %1704 = vmatprep.mubr.bf16.mxu1 %v3181_v19  ;;  %v3202_v19 = vld [vmem:[%s4033_s0 + $0x3ac] ss:$16 sps:$4 sm:$0xff]  }
 0x10c   :  { %v1508_v30 = vpop.f32.mrf.mxu1 }
 0x10d   :  { %v2270_v31 = vadd.f32 %v2269_v23, %v1507_v28  ;;  %v2343_v32 = vmul.f32 %v1507_v28, %v1507_v28  ;;  %v1220_v33 = vpop.f32.mrf.mxu0 }
 0x10e   :  { %v1509_v35 = vpop.f32.mrf.mxu1 }
 0x10f   :  { %v2406_v38 = vadd.f32 %v2405_v27, %v2343_v32  ;;  %v1510_v39 = vadd.f32 %v1509_v35, %v1220_v33  ;;  %v1222_v40 = vpop.f32.mrf.mxu0  ;;  %v3197_v33 = vld [vmem:[%s4033_s0 + $0x3a0] ss:$16 sps:$4 sm:$0xff]   ;;  %v3200_v35 = vld [vmem:[%s4033_s0 + $0x3a8] ss:$16 sps:$4 sm:$0xff]  }
 0x110   :  { %v1511_v42 = vpop.f32.mrf.mxu1  ;;  %v3208_v40 = vld [vmem:[%s4033_s0 + $0x3cc] ss:$16 sps:$4 sm:$0xff]  }
 0x111   :  { %v2804_v43 = vpack.c.bf16 %v1510_v39, %v1507_v28  ;;  %v2271_v44 = vadd.f32 %v2270_v31, %v1510_v39  ;;  %v2344_v45 = vmul.f32 %v1510_v39, %v1510_v39  ;;  %v1225_v46 = vpop.f32.mrf.mxu0  ;;  %1416 = vmatmul.mubr.bf16.gmra.mxu0 %v3183_v34 }
 0x112   :  { %v1514_v47 = vpop.f32.mrf.mxu1  ;;  %1705 = vmatmul.mubr.bf16.gmra.mxu1 %v3184_v36  ;;  %1423 = vmatprep.mubr.bf16.mxu0 %v3185_v37  ;;  %v3205_v36 = vld [vmem:[%s4033_s0 + $0x3c4] ss:$16 sps:$4 sm:$0xff]  }
 0x113   :  { %2956 = vst [vmem:[%s4035_s2 + $0x8] sm:$0xff] %v2804_v43   ;;  %v2407_v48 = vadd.f32 %v2406_v38, %v2344_v45  ;;  %v1515_v49 = vadd.f32 %v1514_v47, %v1225_v46  ;;  %v1227_v50 = vpop.f32.mrf.mxu0  ;;  %1712 = vmatprep.mubr.bf16.mxu1 %v3187_v41 }
 0x114   :  { %v1516_v51 = vpop.f32.mrf.mxu1 }
 0x115   :  { %v2272_v52 = vadd.f32 %v2271_v44, %v1515_v49  ;;  %v2345_v53 = vmul.f32 %v1515_v49, %v1515_v49  ;;  %v1228_v54 = vpop.f32.mrf.mxu0 }
 0x116   :  { %v1517_v56 = vpop.f32.mrf.mxu1 }
 0x117   :  { %v2408_v59 = vadd.f32 %v2407_v48, %v2345_v53  ;;  %v1518_v60 = vadd.f32 %v1517_v56, %v1228_v54  ;;  %v1230_v61 = vpop.f32.mrf.mxu0  ;;  %v3203_v54 = vld [vmem:[%s4033_s0 + $0x3c0] ss:$16 sps:$4 sm:$0xff]   ;;  %v3206_v56 = vld [vmem:[%s4033_s0 + $0x3c8] ss:$16 sps:$4 sm:$0xff]  }
 0x118   :  { %v1519_v63 = vpop.f32.mrf.mxu1  ;;  %v3214_v61 = vld [vmem:[%s4033_s0 + $0x3ec] ss:$16 sps:$4 sm:$0xff]  }
 0x119   :  { %v2809_v0 = vpack.c.bf16 %v1518_v60, %v1515_v49  ;;  %v2273_v1 = vadd.f32 %v2272_v52, %v1518_v60  ;;  %v2346_v2 = vmul.f32 %v1518_v60, %v1518_v60  ;;  %v1233_v3 = vpop.f32.mrf.mxu0  ;;  %1424 = vmatmul.mubr.bf16.gmra.mxu0 %v3189_v55 }
 0x11a   :  { %v1522_v4 = vpop.f32.mrf.mxu1  ;;  %1713 = vmatmul.mubr.bf16.gmra.mxu1 %v3190_v57  ;;  %1431 = vmatprep.mubr.bf16.mxu0 %v3193_v58  ;;  %v3211_v57 = vld [vmem:[%s4033_s0 + $0x3e4] ss:$16 sps:$4 sm:$0xff]  }
 0x11b   :  { %2957 = vst [vmem:[%s4035_s2 + $0x10] sm:$0xff] %v2809_v0   ;;  %v2409_v5 = vadd.f32 %v2408_v59, %v2346_v2  ;;  %v1523_v6 = vadd.f32 %v1522_v4, %v1233_v3  ;;  %v1235_v7 = vpop.f32.mrf.mxu0  ;;  %1720 = vmatprep.mubr.bf16.mxu1 %v3196_v62 }
 0x11c   :  { %v1524_v8 = vpop.f32.mrf.mxu1 }
 0x11d   :  { %v2274_v9 = vadd.f32 %v2273_v1, %v1523_v6  ;;  %v2347_v10 = vmul.f32 %v1523_v6, %v1523_v6  ;;  %v1236_v11 = vpop.f32.mrf.mxu0 }
 0x11e   :  { %v1525_v13 = vpop.f32.mrf.mxu1 }
 0x11f   :  { %v2410_v16 = vadd.f32 %v2409_v5, %v2347_v10  ;;  %v1526_v17 = vadd.f32 %v1525_v13, %v1236_v11  ;;  %v1238_v18 = vpop.f32.mrf.mxu0  ;;  %v3209_v11 = vld [vmem:[%s4033_s0 + $0x3e0] ss:$16 sps:$4 sm:$0xff]   ;;  %v3212_v13 = vld [vmem:[%s4033_s0 + $0x3e8] ss:$16 sps:$4 sm:$0xff]  }
 0x120   :  { %v1527_v20 = vpop.f32.mrf.mxu1 }
 0x121   :  { %v2814_v21 = vpack.c.bf16 %v1526_v17, %v1523_v6  ;;  %v2275_v22 = vadd.f32 %v2274_v9, %v1526_v17  ;;  %v2348_v23 = vmul.f32 %v1526_v17, %v1526_v17  ;;  %v1241_v24 = vpop.f32.mrf.mxu0  ;;  %1432 = vmatmul.mubr.bf16.gmra.mxu0 %v3191_v12 }
 0x122   :  { %v1530_v25 = vpop.f32.mrf.mxu1  ;;  %1721 = vmatmul.mubr.bf16.gmra.mxu1 %v3194_v14  ;;  %1439 = vmatprep.mubr.bf16.mxu0 %v3199_v15 }
 0x123   :  { %2958 = vst [vmem:[%s4035_s2 + $0x18] sm:$0xff] %v2814_v21   ;;  %v2411_v26 = vadd.f32 %v2410_v16, %v2348_v23  ;;  %v1531_v27 = vadd.f32 %v1530_v25, %v1241_v24  ;;  %v1243_v28 = vpop.f32.mrf.mxu0  ;;  %1728 = vmatprep.mubr.bf16.mxu1 %v3202_v19 }
 0x124   :  { %v1532_v29 = vpop.f32.mrf.mxu1 }
 0x125   :  { %v2276_v30 = vadd.f32 %v2275_v22, %v1531_v27  ;;  %v2349_v31 = vmul.f32 %v1531_v27, %v1531_v27  ;;  %v1244_v32 = vpop.f32.mrf.mxu0 }
 0x126   :  { %v1533_v34 = vpop.f32.mrf.mxu1 }
 0x127   :  { %v2412_v37 = vadd.f32 %v2411_v26, %v2349_v31  ;;  %v1534_v38 = vadd.f32 %v1533_v34, %v1244_v32  ;;  %v1246_v39 = vpop.f32.mrf.mxu0 }
 0x128   :  { %v1535_v41 = vpop.f32.mrf.mxu1 }
 0x129   :  { %v2819_v42 = vpack.c.bf16 %v1534_v38, %v1531_v27  ;;  %v2277_v43 = vadd.f32 %v2276_v30, %v1534_v38  ;;  %v2350_v44 = vmul.f32 %v1534_v38, %v1534_v38  ;;  %v1249_v45 = vpop.f32.mrf.mxu0  ;;  %1440 = vmatmul.mubr.bf16.gmra.mxu0 %v3197_v33 }
 0x12a   :  { %v1538_v46 = vpop.f32.mrf.mxu1  ;;  %1729 = vmatmul.mubr.bf16.gmra.mxu1 %v3200_v35  ;;  %1447 = vmatprep.mubr.bf16.mxu0 %v3205_v36 }
 0x12b   :  { %2959 = vst [vmem:[%s4035_s2 + $0x20] sm:$0xff] %v2819_v42   ;;  %v2413_v47 = vadd.f32 %v2412_v37, %v2350_v44  ;;  %v1539_v48 = vadd.f32 %v1538_v46, %v1249_v45  ;;  %v1251_v49 = vpop.f32.mrf.mxu0  ;;  %1736 = vmatprep.mubr.bf16.mxu1 %v3208_v40 }
 0x12c   :  { %v1540_v50 = vpop.f32.mrf.mxu1 }
 0x12d   :  { %v2278_v51 = vadd.f32 %v2277_v43, %v1539_v48  ;;  %v2351_v52 = vmul.f32 %v1539_v48, %v1539_v48  ;;  %v1252_v53 = vpop.f32.mrf.mxu0 }
 0x12e   :  { %v1541_v55 = vpop.f32.mrf.mxu1 }
 0x12f   :  { %v2414_v58 = vadd.f32 %v2413_v47, %v2351_v52  ;;  %v1542_v59 = vadd.f32 %v1541_v55, %v1252_v53  ;;  %v1254_v60 = vpop.f32.mrf.mxu0 }
 0x130   :  { %v1543_v62 = vpop.f32.mrf.mxu1 }
 0x131   :  { %v2824_v63 = vpack.c.bf16 %v1542_v59, %v1539_v48  ;;  %v2279_v0 = vadd.f32 %v2278_v51, %v1542_v59  ;;  %v2352_v1 = vmul.f32 %v1542_v59, %v1542_v59  ;;  %v1257_v2 = vpop.f32.mrf.mxu0  ;;  %1448 = vmatmul.mubr.bf16.gmra.mxu0 %v3203_v54 }
 0x132   :  { %v1546_v3 = vpop.f32.mrf.mxu1  ;;  %1737 = vmatmul.mubr.bf16.gmra.mxu1 %v3206_v56  ;;  %1455 = vmatprep.mubr.bf16.mxu0 %v3211_v57 }
 0x133   :  { %2960 = vst [vmem:[%s4035_s2 + $0x28] sm:$0xff] %v2824_v63   ;;  %v2415_v4 = vadd.f32 %v2414_v58, %v2352_v1  ;;  %v1547_v5 = vadd.f32 %v1546_v3, %v1257_v2  ;;  %v1259_v6 = vpop.f32.mrf.mxu0  ;;  %1744 = vmatprep.mubr.bf16.mxu1 %v3214_v61 }
 0x134   :  { %v1548_v7 = vpop.f32.mrf.mxu1 }
 0x135   :  { %v2280_v8 = vadd.f32 %v2279_v0, %v1547_v5  ;;  %v2353_v9 = vmul.f32 %v1547_v5, %v1547_v5  ;;  %v1260_v10 = vpop.f32.mrf.mxu0 }
 0x136   :  { %v1549_v12 = vpop.f32.mrf.mxu1 }
 0x137   :  { %v2416_v14 = vadd.f32 %v2415_v4, %v2353_v9  ;;  %v1550_v15 = vadd.f32 %v1549_v12, %v1260_v10  ;;  %v1262_v16 = vpop.f32.mrf.mxu0 }
 0x138   :  { %v1551_v17 = vpop.f32.mrf.mxu1 }
 0x139   :  { %v2829_v18 = vpack.c.bf16 %v1550_v15, %v1547_v5  ;;  %v2281_v19 = vadd.f32 %v2280_v8, %v1550_v15  ;;  %v2354_v20 = vmul.f32 %v1550_v15, %v1550_v15  ;;  %v1265_v21 = vpop.f32.mrf.mxu0  ;;  %1456 = vmatmul.mubr.bf16.gmra.mxu0 %v3209_v11 }
 0x13a   :  { %v1554_v22 = vpop.f32.mrf.mxu1  ;;  %1745 = vmatmul.mubr.bf16.gmra.mxu1 %v3212_v13 }
 0x13b   :  { %2961 = vst [vmem:[%s4035_s2 + $0x30] sm:$0xff] %v2829_v18   ;;  %v2417_v23 = vadd.f32 %v2416_v14, %v2354_v20  ;;  %v1555_v24 = vadd.f32 %v1554_v22, %v1265_v21  ;;  %v1267_v25 = vpop.f32.mrf.mxu0 }
 0x13c   :  { %v1556_v26 = vpop.f32.mrf.mxu1 }
 0x13d   :  { %v2282_v27 = vadd.f32 %v2281_v19, %v1555_v24  ;;  %v2355_v28 = vmul.f32 %v1555_v24, %v1555_v24  ;;  %v1268_v29 = vpop.f32.mrf.mxu0 }
 0x13e   :  { %v1557_v30 = vpop.f32.mrf.mxu1 }
 0x13f   :  { %v2418_v31 = vadd.f32 %v2417_v23, %v2355_v28  ;;  %v1558_v32 = vadd.f32 %v1557_v30, %v1268_v29  ;;  %v1270_v33 = vpop.f32.mrf.mxu0 }
 0x140   :  { %v1559_v34 = vpop.f32.mrf.mxu1 }
 0x141   :  { %v2834_v35 = vpack.c.bf16 %v1558_v32, %v1555_v24  ;;  %v2283_v36 = vadd.f32 %v2282_v27, %v1558_v32  ;;  %v2356_v37 = vmul.f32 %v1558_v32, %v1558_v32  ;;  %v1273_v38 = vpop.f32.mrf.mxu0 }
 0x142   :  { %v1562_v39 = vpop.f32.mrf.mxu1 }
 0x143   :  { %2962 = vst [vmem:[%s4035_s2 + $0x38] sm:$0xff] %v2834_v35   ;;  %v2419_v40 = vadd.f32 %v2418_v31, %v2356_v37  ;;  %v1563_v41 = vadd.f32 %v1562_v39, %v1273_v38  ;;  %v1275_v42 = vpop.f32.mrf.mxu0 }
 0x144   :  { %v1564_v43 = vpop.f32.mrf.mxu1 }
 0x145   :  { %v2284_v44 = vadd.f32 %v2283_v36, %v1563_v41  ;;  %v2357_v45 = vmul.f32 %v1563_v41, %v1563_v41  ;;  %v1276_v46 = vpop.f32.mrf.mxu0 }
 0x146   :  { %v1565_v47 = vpop.f32.mrf.mxu1 }
 0x147   :  { %v2420_v48 = vadd.f32 %v2419_v40, %v2357_v45  ;;  %v1566_v49 = vadd.f32 %v1565_v47, %v1276_v46  ;;  %v1278_v50 = vpop.f32.mrf.mxu0 }
 0x148   :  { %v1567_v51 = vpop.f32.mrf.mxu1 }
 0x149   :  { %v2839_v52 = vpack.c.bf16 %v1566_v49, %v1563_v41  ;;  %v2285_v53 = vadd.f32 %v2284_v44, %v1566_v49  ;;  %v2358_v54 = vmul.f32 %v1566_v49, %v1566_v49  ;;  %v1281_v55 = vpop.f32.mrf.mxu0 }
 0x14a   :  { %v1570_v56 = vpop.f32.mrf.mxu1 }
 0x14b   :  { %2963 = vst [vmem:[%s4035_s2 + $0x40] sm:$0xff] %v2839_v52   ;;  %v2421_v57 = vadd.f32 %v2420_v48, %v2358_v54  ;;  %v1571_v58 = vadd.f32 %v1570_v56, %v1281_v55  ;;  %v1283_v59 = vpop.f32.mrf.mxu0 }
 0x14c   :  { %v1572_v60 = vpop.f32.mrf.mxu1 }
 0x14d   :  { %v2286_v61 = vadd.f32 %v2285_v53, %v1571_v58  ;;  %v2359_v62 = vmul.f32 %v1571_v58, %v1571_v58  ;;  %v1284_v63 = vpop.f32.mrf.mxu0 }
 0x14e   :  { %v1573_v0 = vpop.f32.mrf.mxu1 }
 0x14f   :  { %v2422_v1 = vadd.f32 %v2421_v57, %v2359_v62  ;;  %v1574_v2 = vadd.f32 %v1573_v0, %v1284_v63  ;;  %v1286_v3 = vpop.f32.mrf.mxu0 }
 0x150   :  { %v1575_v4 = vpop.f32.mrf.mxu1 }
 0x151   :  { %v2844_v5 = vpack.c.bf16 %v1574_v2, %v1571_v58  ;;  %v2287_v6 = vadd.f32 %v2286_v61, %v1574_v2  ;;  %v2360_v7 = vmul.f32 %v1574_v2, %v1574_v2  ;;  %v1289_v8 = vpop.f32.mrf.mxu0 }
 0x152   :  { %v1578_v9 = vpop.f32.mrf.mxu1 }
 0x153   :  { %2964 = vst [vmem:[%s4035_s2 + $0x48] sm:$0xff] %v2844_v5   ;;  %v2423_v10 = vadd.f32 %v2422_v1, %v2360_v7  ;;  %v1579_v11 = vadd.f32 %v1578_v9, %v1289_v8  ;;  %v1291_v12 = vpop.f32.mrf.mxu0 }
 0x154   :  { %v1580_v13 = vpop.f32.mrf.mxu1 }
 0x155   :  { %v2288_v14 = vadd.f32 %v2287_v6, %v1579_v11  ;;  %v2361_v15 = vmul.f32 %v1579_v11, %v1579_v11  ;;  %v1292_v16 = vpop.f32.mrf.mxu0 }
 0x156   :  { %v1581_v17 = vpop.f32.mrf.mxu1 }
 0x157   :  { %v2424_v18 = vadd.f32 %v2423_v10, %v2361_v15  ;;  %v1582_v19 = vadd.f32 %v1581_v17, %v1292_v16  ;;  %v1294_v20 = vpop.f32.mrf.mxu0 }
 0x158   :  { %v1583_v21 = vpop.f32.mrf.mxu1 }
 0x159   :  { %v2849_v22 = vpack.c.bf16 %v1582_v19, %v1579_v11  ;;  %v2289_v23 = vadd.f32 %v2288_v14, %v1582_v19  ;;  %v2362_v24 = vmul.f32 %v1582_v19, %v1582_v19  ;;  %v1297_v25 = vpop.f32.mrf.mxu0 }
 0x15a   :  { %v1586_v26 = vpop.f32.mrf.mxu1 }
 0x15b   :  { %2965 = vst [vmem:[%s4035_s2 + $0x50] sm:$0xff] %v2849_v22   ;;  %v2425_v27 = vadd.f32 %v2424_v18, %v2362_v24  ;;  %v1587_v28 = vadd.f32 %v1586_v26, %v1297_v25  ;;  %v1299_v29 = vpop.f32.mrf.mxu0 }
 0x15c   :  { %v1588_v30 = vpop.f32.mrf.mxu1 }
 0x15d   :  { %v2290_v31 = vadd.f32 %v2289_v23, %v1587_v28  ;;  %v2363_v32 = vmul.f32 %v1587_v28, %v1587_v28  ;;  %v1300_v33 = vpop.f32.mrf.mxu0 }
 0x15e   :  { %v1589_v34 = vpop.f32.mrf.mxu1 }
 0x15f   :  { %v2426_v35 = vadd.f32 %v2425_v27, %v2363_v32  ;;  %v1590_v36 = vadd.f32 %v1589_v34, %v1300_v33  ;;  %v1302_v37 = vpop.f32.mrf.mxu0 }
 0x160   :  { %v1591_v38 = vpop.f32.mrf.mxu1 }
 0x161   :  { %v2854_v39 = vpack.c.bf16 %v1590_v36, %v1587_v28  ;;  %v2291_v40 = vadd.f32 %v2290_v31, %v1590_v36  ;;  %v2364_v41 = vmul.f32 %v1590_v36, %v1590_v36  ;;  %v1305_v42 = vpop.f32.mrf.mxu0 }
 0x162   :  { %v1594_v43 = vpop.f32.mrf.mxu1 }
 0x163   :  { %2966 = vst [vmem:[%s4035_s2 + $0x58] sm:$0xff] %v2854_v39   ;;  %v2427_v44 = vadd.f32 %v2426_v35, %v2364_v41  ;;  %v1595_v45 = vadd.f32 %v1594_v43, %v1305_v42  ;;  %v1307_v46 = vpop.f32.mrf.mxu0 }
 0x164   :  { %v1596_v47 = vpop.f32.mrf.mxu1 }
 0x165   :  { %v2292_v48 = vadd.f32 %v2291_v40, %v1595_v45  ;;  %v2365_v49 = vmul.f32 %v1595_v45, %v1595_v45  ;;  %v1308_v50 = vpop.f32.mrf.mxu0 }
 0x166   :  { %v1597_v51 = vpop.f32.mrf.mxu1 }
 0x167   :  { %v2428_v52 = vadd.f32 %v2427_v44, %v2365_v49  ;;  %v1598_v53 = vadd.f32 %v1597_v51, %v1308_v50  ;;  %v1310_v54 = vpop.f32.mrf.mxu0 }
 0x168   :  { %v1599_v55 = vpop.f32.mrf.mxu1 }
 0x169   :  { %v2859_v56 = vpack.c.bf16 %v1598_v53, %v1595_v45  ;;  %v2293_v57 = vadd.f32 %v2292_v48, %v1598_v53  ;;  %v2366_v58 = vmul.f32 %v1598_v53, %v1598_v53  ;;  %v1313_v59 = vpop.f32.mrf.mxu0 }
 0x16a   :  { %v1602_v60 = vpop.f32.mrf.mxu1 }
 0x16b   :  { %2967 = vst [vmem:[%s4035_s2 + $0x60] sm:$0xff] %v2859_v56   ;;  %v2429_v61 = vadd.f32 %v2428_v52, %v2366_v58  ;;  %v1603_v62 = vadd.f32 %v1602_v60, %v1313_v59  ;;  %v1315_v63 = vpop.f32.mrf.mxu0 }
 0x16c   :  { %v1604_v0 = vpop.f32.mrf.mxu1 }
 0x16d   :  { %v2294_v1 = vadd.f32 %v2293_v57, %v1603_v62  ;;  %v2367_v2 = vmul.f32 %v1603_v62, %v1603_v62  ;;  %v1316_v3 = vpop.f32.mrf.mxu0 }
 0x16e   :  { %v1605_v4 = vpop.f32.mrf.mxu1 }
 0x16f   :  { %v2430_v5 = vadd.f32 %v2429_v61, %v2367_v2  ;;  %v1606_v6 = vadd.f32 %v1605_v4, %v1316_v3  ;;  %v1318_v7 = vpop.f32.mrf.mxu0 }
 0x170   :  { %v1607_v8 = vpop.f32.mrf.mxu1 }
 0x171   :  { %v2864_v9 = vpack.c.bf16 %v1606_v6, %v1603_v62  ;;  %v2295_v10 = vadd.f32 %v2294_v1, %v1606_v6  ;;  %v2368_v11 = vmul.f32 %v1606_v6, %v1606_v6  ;;  %v1321_v12 = vpop.f32.mrf.mxu0 }
 0x172   :  { %v1610_v13 = vpop.f32.mrf.mxu1 }
 0x173   :  { %2968 = vst [vmem:[%s4035_s2 + $0x68] sm:$0xff] %v2864_v9   ;;  %v2431_v14 = vadd.f32 %v2430_v5, %v2368_v11  ;;  %v1611_v15 = vadd.f32 %v1610_v13, %v1321_v12  ;;  %v1323_v16 = vpop.f32.mrf.mxu0 }
 0x174   :  { %v1612_v17 = vpop.f32.mrf.mxu1 }
 0x175   :  { %v2296_v18 = vadd.f32 %v2295_v10, %v1611_v15  ;;  %v2369_v19 = vmul.f32 %v1611_v15, %v1611_v15  ;;  %v1324_v20 = vpop.f32.mrf.mxu0 }
 0x176   :  { %v1613_v21 = vpop.f32.mrf.mxu1 }
 0x177   :  { %v2432_v22 = vadd.f32 %v2431_v14, %v2369_v19  ;;  %v1614_v23 = vadd.f32 %v1613_v21, %v1324_v20  ;;  %v1326_v24 = vpop.f32.mrf.mxu0 }
 0x178   :  { %v1615_v25 = vpop.f32.mrf.mxu1 }
 0x179   :  { %v2869_v26 = vpack.c.bf16 %v1614_v23, %v1611_v15  ;;  %v2297_v27 = vadd.f32 %v2296_v18, %v1614_v23  ;;  %v2370_v28 = vmul.f32 %v1614_v23, %v1614_v23  ;;  %v1329_v29 = vpop.f32.mrf.mxu0 }
 0x17a   :  { %v1618_v30 = vpop.f32.mrf.mxu1 }
 0x17b   :  { %2969 = vst [vmem:[%s4035_s2 + $0x70] sm:$0xff] %v2869_v26   ;;  %v2433_v31 = vadd.f32 %v2432_v22, %v2370_v28  ;;  %v1619_v32 = vadd.f32 %v1618_v30, %v1329_v29  ;;  %v1331_v33 = vpop.f32.mrf.mxu0 }
 0x17c   :  { %v1620_v34 = vpop.f32.mrf.mxu1 }
 0x17d   :  { %v2371_v35 = vmul.f32 %v1619_v32, %v1619_v32  ;;  %v1332_v36 = vpop.f32.mrf.mxu0  ;;  %v2298_v38 = vadd.f32 %v2297_v27, %v1619_v32 }
 0x17e   :  { %v1621_v37 = vpop.f32.mrf.mxu1 }
 0x17f   :  { %v1622_v39 = vadd.f32 %v1621_v37, %v1332_v36  ;;  %v1334_v40 = vpop.f32.mrf.mxu0  ;;  %v2434_v42 = vadd.f32 %v2433_v31, %v2371_v35 }
 0x180   :  { %v1623_v41 = vpop.f32.mrf.mxu1 }
 0x181   :  { %v2874_v43 = vpack.c.bf16 %v1622_v39, %v1619_v32  ;;  %v3844_v44 = vadd.f32 %v2298_v38, %v1622_v39  ;;  %v2372_v45 = vmul.f32 %v1622_v39, %v1622_v39  ;;  %v1337_v46 = vpop.f32.mrf.mxu0 }
 0x182   :  { %v1626_v47 = vpop.f32.mrf.mxu1 }
 0x183   :  { %2970 = vst [vmem:[%s4035_s2 + $0x78] sm:$0xff] %v2874_v43   ;;  %v3849_v48 = vadd.f32 %v2434_v42, %v2372_v45  ;;  %v1339_v49 = vpop.f32.mrf.mxu0  ;;  %v3851_v53 = vadd.f32 %v1626_v47, %v1337_v46 }
 0x184   :  { %v1628_v50 = vpop.f32.mrf.mxu1 }
 0x185   :  { %v1340_v51 = vpop.f32.mrf.mxu0 }
 0x186   :  { %v1629_v52 = vpop.f32.mrf.mxu1 }
 0x187   :  { %v3853_v54 = vadd.f32 %v1629_v52, %v1340_v51  ;;  %v1342_v55 = vpop.f32.mrf.mxu0 }
 0x188   :  { %v1631_v56 = vpop.f32.mrf.mxu1 }
 0x189   :  { %v2879_v57 = vpack.c.bf16 %v3853_v54, %v3851_v53  ;;  %v1345_v58 = vpop.f32.mrf.mxu0 }
 0x18a   :  { %v1634_v59 = vpop.f32.mrf.mxu1 }
 0x18b   :  { %2971 = vst [vmem:[%s4035_s2 + $0x80] sm:$0xff] %v2879_v57   ;;  %v1347_v60 = vpop.f32.mrf.mxu0  ;;  %v3860_v0 = vadd.f32 %v1634_v59, %v1345_v58 }
 0x18c   :  { %v1636_v61 = vpop.f32.mrf.mxu1 }
 0x18d   :  { %v1348_v62 = vpop.f32.mrf.mxu0 }
 0x18e   :  { %v1637_v63 = vpop.f32.mrf.mxu1 }
 0x18f   :  { %v3862_v1 = vadd.f32 %v1637_v63, %v1348_v62  ;;  %v1350_v2 = vpop.f32.mrf.mxu0 }
 0x190   :  { %v1639_v3 = vpop.f32.mrf.mxu1 }
 0x191   :  { %v2884_v4 = vpack.c.bf16 %v3862_v1, %v3860_v0  ;;  %v1353_v5 = vpop.f32.mrf.mxu0 }
 0x192   :  { %v1642_v6 = vpop.f32.mrf.mxu1 }
 0x193   :  { %2972 = vst [vmem:[%s4035_s2 + $0x88] sm:$0xff] %v2884_v4   ;;  %v1355_v7 = vpop.f32.mrf.mxu0  ;;  %v3869_v11 = vadd.f32 %v1642_v6, %v1353_v5 }
 0x194   :  { %v1644_v8 = vpop.f32.mrf.mxu1 }
 0x195   :  { %v1356_v9 = vpop.f32.mrf.mxu0 }
 0x196   :  { %v1645_v10 = vpop.f32.mrf.mxu1 }
 0x197   :  { %v3871_v12 = vadd.f32 %v1645_v10, %v1356_v9  ;;  %v1358_v13 = vpop.f32.mrf.mxu0 }
 0x198   :  { %v1647_v14 = vpop.f32.mrf.mxu1  ;;  %v2373_v13 = vmul.f32 %v3851_v53, %v3851_v53 }
 0x199   :  { %v2889_v15 = vpack.c.bf16 %v3871_v12, %v3869_v11  ;;  %v1361_v16 = vpop.f32.mrf.mxu0 }
 0x19a   :  { %v1650_v17 = vpop.f32.mrf.mxu1 }
 0x19b   :  { %2973 = vst [vmem:[%s4035_s2 + $0x90] sm:$0xff] %v2889_v15   ;;  %v1363_v18 = vpop.f32.mrf.mxu0  ;;  %v3878_v22 = vadd.f32 %v1650_v17, %v1361_v16  ;;  %v2374_v17 = vmul.f32 %v3853_v54, %v3853_v54 }
 0x19c   :  { %v1652_v19 = vpop.f32.mrf.mxu1 }
 0x19d   :  { %v1364_v20 = vpop.f32.mrf.mxu0  ;;  %v2300_v19 = vadd.f32 %v3844_v44, %v3851_v53 }
 0x19e   :  { %v1653_v21 = vpop.f32.mrf.mxu1 }
 0x19f   :  { %v3880_v23 = vadd.f32 %v1653_v21, %v1364_v20  ;;  %v1366_v24 = vpop.f32.mrf.mxu0  ;;  %v2436_v21 = vadd.f32 %v3849_v48, %v2373_v13 }
 0x1a0   :  { %v1655_v25 = vpop.f32.mrf.mxu1  ;;  %v2375_v24 = vmul.f32 %v3860_v0, %v3860_v0 }
 0x1a1   :  { %v2894_v26 = vpack.c.bf16 %v3880_v23, %v3878_v22  ;;  %v1369_v27 = vpop.f32.mrf.mxu0 }
 0x1a2   :  { %v1658_v28 = vpop.f32.mrf.mxu1 }
 0x1a3   :  { %2974 = vst [vmem:[%s4035_s2 + $0x98] sm:$0xff] %v2894_v26   ;;  %v1371_v29 = vpop.f32.mrf.mxu0  ;;  %v3887_v33 = vadd.f32 %v1658_v28, %v1369_v27  ;;  %v2301_v26 = vadd.f32 %v2300_v19, %v3853_v54  ;;  %v2437_v28 = vadd.f32 %v2436_v21, %v2374_v17 }
 0x1a4   :  { %v1660_v30 = vpop.f32.mrf.mxu1  ;;  %v2376_v29 = vmul.f32 %v3862_v1, %v3862_v1 }
 0x1a5   :  { %v1372_v31 = vpop.f32.mrf.mxu0  ;;  %v2302_v44 = vadd.f32 %v2301_v26, %v3860_v0  ;;  %v2438_v48 = vadd.f32 %v2437_v28, %v2375_v24  ;;  %v2378_v0 = vmul.f32 %v3871_v12, %v3871_v12 }
 0x1a6   :  { %v1661_v32 = vpop.f32.mrf.mxu1 }
 0x1a7   :  { %v3889_v34 = vadd.f32 %v1661_v32, %v1372_v31  ;;  %v1374_v35 = vpop.f32.mrf.mxu0  ;;  %v2303_v54 = vadd.f32 %v2302_v44, %v3862_v1  ;;  %v2379_v1 = vmul.f32 %v3878_v22, %v3878_v22 }
 0x1a8   :  { %v1663_v36 = vpop.f32.mrf.mxu1  ;;  %v2377_v35 = vmul.f32 %v3869_v11, %v3869_v11 }
 0x1a9   :  { %v2899_v37 = vpack.c.bf16 %v3889_v34, %v3887_v33  ;;  %v1377_v38 = vpop.f32.mrf.mxu0 }
 0x1aa   :  { %v1666_v39 = vpop.f32.mrf.mxu1 }
 0x1ab   :  { %2975 = vst [vmem:[%s4035_s2 + $0xa0] sm:$0xff] %v2899_v37   ;;  %v1379_v40 = vpop.f32.mrf.mxu0  ;;  %v3896_v45 = vadd.f32 %v1666_v39, %v1377_v38  ;;  %v2439_v39 = vadd.f32 %v2438_v48, %v2376_v29 }
 0x1ac   :  { %v1668_v41 = vpop.f32.mrf.mxu1 }
 0x1ad   :  { %v1380_v42 = vpop.f32.mrf.mxu0  ;;  %v2304_v41 = vadd.f32 %v2303_v54, %v3869_v11 }
 0x1ae   :  { %v1669_v43 = vpop.f32.mrf.mxu1 }
 0x1af   :  { %v3898_v46 = vadd.f32 %v1669_v43, %v1380_v42  ;;  %v1382_v47 = vpop.f32.mrf.mxu0  ;;  %v2440_v43 = vadd.f32 %v2439_v39, %v2377_v35 }
 0x1b0   :  { %v1671_v49 = vpop.f32.mrf.mxu1 }
 0x1b1   :  { %v2904_v50 = vpack.c.bf16 %v3898_v46, %v3896_v45  ;;  %v1385_v51 = vpop.f32.mrf.mxu0  ;;  %v2305_v49 = vadd.f32 %v2304_v41, %v3871_v12  ;;  %v2384_v17 = vmul.f32 %v3898_v46, %v3898_v46 }
 0x1b2   :  { %v1674_v52 = vpop.f32.mrf.mxu1 }
 0x1b3   :  { %2976 = vst [vmem:[%s4035_s2 + $0xa8] sm:$0xff] %v2904_v50   ;;  %v1387_v55 = vpop.f32.mrf.mxu0  ;;  %v3905_v59 = vadd.f32 %v1674_v52, %v1385_v51  ;;  %v2441_v51 = vadd.f32 %v2440_v43, %v2378_v0  ;;  %v2380_v52 = vmul.f32 %v3880_v23, %v3880_v23  ;;  %v2306_v11 = vadd.f32 %v2305_v49, %v3878_v22 }
 0x1b4   :  { %v1676_v56 = vpop.f32.mrf.mxu1  ;;  %v2382_v22 = vmul.f32 %v3889_v34, %v3889_v34 }
 0x1b5   :  { %v1388_v57 = vpop.f32.mrf.mxu0  ;;  %v2307_v12 = vadd.f32 %v2306_v11, %v3880_v23  ;;  %v2383_v23 = vmul.f32 %v3896_v45, %v3896_v45 }
 0x1b6   :  { %v1677_v58 = vpop.f32.mrf.mxu1 }
 0x1b7   :  { %v3907_v60 = vadd.f32 %v1677_v58, %v1388_v57  ;;  %v1390_v61 = vpop.f32.mrf.mxu0 }
 0x1b8   :  { %v1679_v62 = vpop.f32.mrf.mxu1  ;;  %v2442_v61 = vadd.f32 %v2441_v51, %v2379_v1 }
 0x1b9   :  { %v2909_v63 = vpack.c.bf16 %v3907_v60, %v3905_v59  ;;  %v1393_v2 = vpop.f32.mrf.mxu0  ;;  %v2381_v62 = vmul.f32 %v3887_v33, %v3887_v33 }
 0x1ba   :  { %v1682_v3 = vpop.f32.mrf.mxu1 }
 0x1bb   :  { %2977 = vst [vmem:[%s4035_s2 + $0xb0] sm:$0xff] %v2909_v63   ;;  %v1395_v4 = vpop.f32.mrf.mxu0  ;;  %v3914_v8 = vadd.f32 %v1682_v3, %v1393_v2 }
 0x1bc   :  { %v1684_v5 = vpop.f32.mrf.mxu1  ;;  %v2443_v4 = vadd.f32 %v2442_v61, %v2380_v52 }
 0x1bd   :  { %v1396_v6 = vpop.f32.mrf.mxu0  ;;  %v2387_v35 = vmul.f32 %v3914_v8, %v3914_v8 }
 0x1be   :  { %v1685_v7 = vpop.f32.mrf.mxu1 }
 0x1bf   :  { %v3916_v9 = vadd.f32 %v1685_v7, %v1396_v6  ;;  %v1398_v10 = vpop.f32.mrf.mxu0  ;;  %v2308_v6 = vadd.f32 %v2307_v12, %v3887_v33 }
 0x1c0   :  { %v1687_v14 = vpop.f32.mrf.mxu1  ;;  %v2444_v10 = vadd.f32 %v2443_v4, %v2381_v62 }
 0x1c1   :  { %v2914_v15 = vpack.c.bf16 %v3916_v9, %v3914_v8  ;;  %v1401_v16 = vpop.f32.mrf.mxu0  ;;  %v2309_v14 = vadd.f32 %v2308_v6, %v3889_v34 }
 0x1c2   :  { %v1690_v18 = vpop.f32.mrf.mxu1 }
 0x1c3   :  { %2978 = vst [vmem:[%s4035_s2 + $0xb8] sm:$0xff] %v2914_v15   ;;  %v1403_v20 = vpop.f32.mrf.mxu0  ;;  %v3936_v53 = vadd.f32 %v1690_v18, %v1401_v16  ;;  %v2445_v16 = vadd.f32 %v2444_v10, %v2382_v22  ;;  %v2310_v33 = vadd.f32 %v2309_v14, %v3896_v45 }
 0x1c4   :  { %v1692_v25 = vpop.f32.mrf.mxu1 }
 0x1c5   :  { %v1404_v27 = vpop.f32.mrf.mxu0  ;;  %v2446_v24 = vadd.f32 %v2445_v16, %v2383_v23  ;;  %v2385_v25 = vmul.f32 %v3905_v59, %v3905_v59  ;;  %v2389_v43 = vmul.f32 %v3936_v53, %v3936_v53 }
 0x1c6   :  { %v1693_v30 = vpop.f32.mrf.mxu1 }
 0x1c7   :  { %v3938_v31 = vadd.f32 %v1693_v30, %v1404_v27  ;;  %v1406_v32 = vpop.f32.mrf.mxu0  ;;  %v2311_v27 = vadd.f32 %v2310_v33, %v3898_v46  ;;  %v2447_v29 = vadd.f32 %v2446_v24, %v2384_v17  ;;  %v2386_v30 = vmul.f32 %v3907_v60, %v3907_v60 }
 0x1c8   :  { %v1695_v36 = vpop.f32.mrf.mxu1 }
 0x1c9   :  { %v2919_v37 = vpack.c.bf16 %v3938_v31, %v3936_v53  ;;  %v1409_v38 = vpop.f32.mrf.mxu0  ;;  %v2312_v45 = vadd.f32 %v2311_v27, %v3905_v59  ;;  %v2448_v48 = vadd.f32 %v2447_v29, %v2385_v25  ;;  %v2390_v51 = vmul.f32 %v3938_v31, %v3938_v31 }
 0x1ca   :  { %v1698_v40 = vpop.f32.mrf.mxu1 }
 0x1cb   :  { %2979 = vst [vmem:[%s4035_s2 + $0xc0] sm:$0xff] %v2919_v37   ;;  %v1411_v42 = vpop.f32.mrf.mxu0  ;;  %v3957_v56 = vadd.f32 %v1698_v40, %v1409_v38  ;;  %v2313_v36 = vadd.f32 %v2312_v45, %v3907_v60  ;;  %v2449_v37 = vadd.f32 %v2448_v48, %v2386_v30  ;;  %v2388_v38 = vmul.f32 %v3916_v9, %v3916_v9 }
 0x1cc   :  { %v1700_v47 = vpop.f32.mrf.mxu1 }
 0x1cd   :  { %v1412_v50 = vpop.f32.mrf.mxu0  ;;  %v2314_v59 = vadd.f32 %v2313_v36, %v3914_v8  ;;  %v2450_v42 = vadd.f32 %v2449_v37, %v2387_v35 }
 0x1ce   :  { %v1701_v55 = vpop.f32.mrf.mxu1 }
 0x1cf   :  { %v3959_v57 = vadd.f32 %v1701_v55, %v1412_v50  ;;  %v1414_v58 = vpop.f32.mrf.mxu0  ;;  %v2315_v47 = vadd.f32 %v2314_v59, %v3916_v9  ;;  %v2451_v50 = vadd.f32 %v2450_v42, %v2388_v38 }
 0x1d0   :  { %v1703_v63 = vpop.f32.mrf.mxu1  ;;  %v2391_v58 = vmul.f32 %v3957_v56, %v3957_v56 }
 0x1d1   :  { %v2924_v2 = vpack.c.bf16 %v3959_v57, %v3957_v56  ;;  %v1417_v3 = vpop.f32.mrf.mxu0  ;;  %v2316_v55 = vadd.f32 %v2315_v47, %v3936_v53  ;;  %v2452_v11 = vadd.f32 %v2451_v50, %v2389_v43  ;;  %v2392_v12 = vmul.f32 %v3959_v57, %v3959_v57 }
 0x1d2   :  { %v1706_v5 = vpop.f32.mrf.mxu1 }
 0x1d3   :  { %2980 = vst [vmem:[%s4035_s2 + $0xc8] sm:$0xff] %v2924_v2   ;;  %v1419_v7 = vpop.f32.mrf.mxu0  ;;  %v1707_v19 = vadd.f32 %v1706_v5, %v1417_v3  ;;  %v2317_v9 = vadd.f32 %v2316_v55, %v3938_v31  ;;  %v2453_v63 = vadd.f32 %v2452_v11, %v2390_v51 }
 0x1d4   :  { %v1708_v13 = vpop.f32.mrf.mxu1 }
 0x1d5   :  { %v1420_v15 = vpop.f32.mrf.mxu0  ;;  %v2318_v53 = vadd.f32 %v2317_v9, %v3957_v56  ;;  %v2454_v5 = vadd.f32 %v2453_v63, %v2391_v58  ;;  %v2393_v6 = vmul.f32 %v1707_v19, %v1707_v19 }
 0x1d6   :  { %v1709_v18 = vpop.f32.mrf.mxu1 }
 0x1d7   :  { %v3978_v20 = vadd.f32 %v1709_v18, %v1420_v15  ;;  %v1422_v21 = vpop.f32.mrf.mxu0  ;;  %v2319_v10 = vadd.f32 %v2318_v53, %v3959_v57  ;;  %v2455_v14 = vadd.f32 %v2454_v5, %v2392_v12 }
 0x1d8   :  { %v1711_v26 = vpop.f32.mrf.mxu1 }
 0x1d9   :  { %v2929_v34 = vpack.c.bf16 %v3978_v20, %v1707_v19  ;;  %v1425_v28 = vpop.f32.mrf.mxu0  ;;  %v2394_v31 = vmul.f32 %v3978_v20, %v3978_v20  ;;  %v2320_v16 = vadd.f32 %v2319_v10, %v1707_v19  ;;  %v2456_v17 = vadd.f32 %v2455_v14, %v2393_v6 }
 0x1da   :  { %v1714_v44 = vpop.f32.mrf.mxu1 }
 0x1db   :  { %2981 = vst [vmem:[%s4035_s2 + $0xd0] sm:$0xff] %v2929_v34   ;;  %v1427_v32 = vpop.f32.mrf.mxu0  ;;  %v1715_v0 = vadd.f32 %v1714_v44, %v1425_v28  ;;  %v2321_v33 = vadd.f32 %v2320_v16, %v3978_v20  ;;  %v2457_v57 = vadd.f32 %v2456_v17, %v2394_v31 }
 0x1dc   :  { %v1716_v46 = vpop.f32.mrf.mxu1 }
 0x1dd   :  { %v1428_v54 = vpop.f32.mrf.mxu0  ;;  %v2395_v21 = vmul.f32 %v1715_v0, %v1715_v0  ;;  %v2322_v26 = vadd.f32 %v2321_v33, %v1715_v0 }
 0x1de   :  { %v1717_v39 = vpop.f32.mrf.mxu1 }
 0x1df   :  { %v1718_v40 = vadd.f32 %v1717_v39, %v1428_v54  ;;  %v1430_v41 = vpop.f32.mrf.mxu0  ;;  %v2458_v19 = vadd.f32 %v2457_v57, %v2395_v21 }
 0x1e0   :  { %v1719_v1 = vpop.f32.mrf.mxu1 }
 0x1e1   :  { %v2934_v49 = vpack.c.bf16 %v1718_v40, %v1715_v0  ;;  %v1433_v60 = vpop.f32.mrf.mxu0  ;;  %v2396_v27 = vmul.f32 %v1718_v40, %v1718_v40  ;;  %v2323_v44 = vadd.f32 %v2322_v26, %v1718_v40 }
 0x1e2   :  { %v1722_v52 = vpop.f32.mrf.mxu1 }
 0x1e3   :  { %2982 = vst [vmem:[%s4035_s2 + $0xd8] sm:$0xff] %v2934_v49   ;;  %v1435_v8 = vpop.f32.mrf.mxu0  ;;  %v1723_v3 = vadd.f32 %v1722_v52, %v1433_v60  ;;  %v2459_v46 = vadd.f32 %v2458_v19, %v2396_v27 }
 0x1e4   :  { %v1724_v61 = vpop.f32.mrf.mxu1 }
 0x1e5   :  { %v1436_v62 = vpop.f32.mrf.mxu0  ;;  %v2397_v45 = vmul.f32 %v1723_v3, %v1723_v3  ;;  %v2324_v36 = vadd.f32 %v2323_v44, %v1723_v3 }
 0x1e6   :  { %v1725_v2 = vpop.f32.mrf.mxu1 }
 0x1e7   :  { %v1726_v4 = vadd.f32 %v1725_v2, %v1436_v62  ;;  %v1438_v22 = vpop.f32.mrf.mxu0  ;;  %v2460_v38 = vadd.f32 %v2459_v46, %v2397_v45 }
 0x1e8   :  { %v1727_v7 = vpop.f32.mrf.mxu1 }
 0x1e9   :  { %v2939_v23 = vpack.c.bf16 %v1726_v4, %v1723_v3  ;;  %v1441_v13 = vpop.f32.mrf.mxu0  ;;  %v2398_v54 = vmul.f32 %v1726_v4, %v1726_v4  ;;  %v2325_v39 = vadd.f32 %v2324_v36, %v1726_v4 }
 0x1ea   :  { %v1730_v15 = vpop.f32.mrf.mxu1 }
 0x1eb   :  { %2983 = vst [vmem:[%s4035_s2 + $0xe0] sm:$0xff] %v2939_v23   ;;  %v1443_v56 = vpop.f32.mrf.mxu0  ;;  %v1731_v34 = vadd.f32 %v1730_v15, %v1441_v13  ;;  %v2461_v40 = vadd.f32 %v2460_v38, %v2398_v54 }
 0x1ec   :  { %v1732_v18 = vpop.f32.mrf.mxu1 }
 0x1ed   :  { %v1444_v24 = vpop.f32.mrf.mxu0  ;;  %v2399_v59 = vmul.f32 %v1731_v34, %v1731_v34  ;;  %v2326_v43 = vadd.f32 %v2325_v39, %v1731_v34 }
 0x1ee   :  { %v1733_v25 = vpop.f32.mrf.mxu1 }
 0x1ef   :  { %v1734_v28 = vadd.f32 %v1733_v25, %v1444_v24  ;;  %v1446_v29 = vpop.f32.mrf.mxu0  ;;  %v2462_v50 = vadd.f32 %v2461_v40, %v2399_v59 }
 0x1f0   :  { %v1735_v30 = vpop.f32.mrf.mxu1 }
 0x1f1   :  { %v2944_v32 = vpack.c.bf16 %v1734_v28, %v1731_v34  ;;  %v1449_v48 = vpop.f32.mrf.mxu0  ;;  %v2400_v1 = vmul.f32 %v1734_v28, %v1734_v28  ;;  %v2327_v51 = vadd.f32 %v2326_v43, %v1734_v28 }
 0x1f2   :  { %v1738_v35 = vpop.f32.mrf.mxu1 }
 0x1f3   :  { %2984 = vst [vmem:[%s4035_s2 + $0xe8] sm:$0xff] %v2944_v32   ;;  %v1451_v20 = vpop.f32.mrf.mxu0  ;;  %v1739_v0 = vadd.f32 %v1738_v35, %v1449_v48  ;;  %v2463_v58 = vadd.f32 %v2462_v50, %v2400_v1 }
 0x1f4   :  { %v1740_v37 = vpop.f32.mrf.mxu1 }
 0x1f5   :  { %v1452_v41 = vpop.f32.mrf.mxu0  ;;  %v2401_v52 = vmul.f32 %v1739_v0, %v1739_v0  ;;  %v2328_v61 = vadd.f32 %v2327_v51, %v1739_v0 }
 0x1f6   :  { %v1741_v42 = vpop.f32.mrf.mxu1 }
 0x1f7   :  { %v1742_v47 = vadd.f32 %v1741_v42, %v1452_v41  ;;  %v1454_v49 = vpop.f32.mrf.mxu0  ;;  %v2464_v2 = vadd.f32 %v2463_v58, %v2401_v52 }
 0x1f8   :  { %v1743_v60 = vpop.f32.mrf.mxu1 }
 0x1f9   :  { %v2949_v55 = vpack.c.bf16 %v1742_v47, %v1739_v0  ;;  %v1457_v8 = vpop.f32.mrf.mxu0  ;;  %v2402_v9 = vmul.f32 %v1742_v47, %v1742_v47  ;;  %v2329_v53 = vadd.f32 %v2328_v61, %v1742_v47 }
 0x1fa   :  { %v1746_v11 = vpop.f32.mrf.mxu1 }
 0x1fb   :  { %2985 = vst [vmem:[%s4035_s2 + $0xf0] sm:$0xff] %v2949_v55   ;;  %v1747_v62 = vadd.f32 %v1746_v11, %v1457_v8  ;;  %v1459_v63 = vpop.f32.mrf.mxu0  ;;  %v2465_v5 = vadd.f32 %v2464_v2, %v2402_v9 }
 0x1fc   :  { %v1748_v12 = vpop.f32.mrf.mxu1 }
 0x1fd   :  { %v2403_v3 = vmul.f32 %v1747_v62, %v1747_v62  ;;  %v1460_v4 = vpop.f32.mrf.mxu0  ;;  %v2330_v6 = vadd.f32 %v2329_v53, %v1747_v62 }
 0x1fe   :  { %v1749_v22 = vpop.f32.mrf.mxu1 }
 0x1ff   :  { %v1750_v7 = vadd.f32 %v1749_v22, %v1460_v4  ;;  %v1462_v10 = vpop.f32.mrf.mxu0  ;;  %v2466_v13 = vadd.f32 %v2465_v5, %v2403_v3 }
 0x200   :  { %v1751_v23 = vpop.f32.mrf.mxu1 }
 0x201   :  { %v2954_v14 = vpack.c.bf16 %v1750_v7, %v1747_v62  ;;  %v2331_v31 = vadd.f32 %v2330_v6, %v1750_v7  ;;  %v2404_v15 = vmul.f32 %v1750_v7, %v1750_v7 }
 0x203   :  { %2986 = vst [vmem:[%s4035_s2 + $0xf8] sm:$0xff] %v2954_v14   ;;  %v2332_v16 = vrot.slane %v2331_v31, 4  ;;  %v2467_v56 = vadd.f32 %v2466_v13, %v2404_v15  ;;  %s3215_s2 = scalar_lea.vmem %s2485_s22, 128 }
 0x204   :  { %p3216_p0 = scmp.ne.s32.totalorder %s2485_s22, %s3215_s2  ;;  %p3221_p2 = scmp.lt.s32.totalorder %s3215_s2, %s3215_s2 }
 0x205   :  { %v2333_v17 = vadd.f32 %v2332_v16, %v2331_v31  ;;  %v2468_v18 = vrot.slane %v2467_v56, 4 }
 0x206   :  { %p3222_p3 = por %p3221_p2, %p3220_p1 }
 0x207   :  { %v2334_v33 = vrot.slane %v2333_v17, 2  ;;  %v2469_v21 = vadd.f32 %v2468_v18, %v2467_v56 }
 0x208   :  { %p3223_p4 = pnand %p3222_p3, %p3216_p0 }
 0x209   :  { %v2335_v24 = vadd.f32 %v2334_v33, %v2333_v17  ;;  %v2470_v57 = vrot.slane %v2469_v21, 2 }
 0x20b   :  { %v2336_v25 = vrot.slane %v2335_v24, 1  ;;  %v2471_v26 = vadd.f32 %v2470_v57, %v2469_v21 }
 0x20d   :  { %v2337_v27 = vadd.f32 %v2336_v25, %v2335_v24  ;;  %v2472_v34 = vrot.slane %v2471_v26, 1 }
 0x20f   :  { %v2473_v28 = vadd.f32 %v2472_v34, %v2471_v26  ;;  %2339 = vst [vmem:[#allocation3] sm:$0xff] %v2337_v27 }
 0x210   :  { %3226 = shalt.err (!%p3223_p4)
}
 0x211   :  { %2487 = dma.vmem_to_hbm [thread:$0]  %s2485_s22, 128, %s4036_s3, [#allocation4]   ;;  %2475 = vst [vmem:[#allocation5] sm:$0xff] %v2473_v28 }
 0x212   :  { %s3235_s0 = scalar_lea.vmem %s2495_s24, 128  ;;  %p3240_p6 = scmp.lt.s32.totalorder %s2495_s24, %s2495_s24 }
 0x213   :  { %p3236_p5 = scmp.ne.s32.totalorder %s2495_s24, %s3235_s0  ;;  %p3241_p7 = scmp.lt.s32.totalorder %s3235_s0, %s3235_s0 }
 0x215   :  { %p3242_p8 = por %p3241_p7, %p3240_p6 }
 0x217   :  { %p3243_p9 = pnand %p3242_p8, %p3236_p5 }
 0x219   :  { %3246 = shalt.err (!%p3243_p9)
}
 0x21a   :  { %2497 = dma.vmem_to_hbm [thread:$0]  %s2495_s24, 128, %s4037_s4, [#allocation6]  }
 0x21b   :  { %3255 = dma.done.wait [#allocation4], 128  }
 0x21c   :  { %3256 = vsyncadd [#allocation4], 4294967168 }
 0x21d   :  { %3257 = dma.done.wait [#allocation6], 128  }
 0x21e   :  { %3258 = vsyncadd [#allocation6], 4294967168 }
 0x21f   :  { %2506 = vsyncpa [#allocation4], 1 }
 0x220   :  { %2507 = vsyncpa [#allocation6], 1 }

</bundles_post_ra>
